<compile_context>
chip_gen: v6e
topology: v6e:2x2x1
jax: 0.10.0
libtpu: 0.0.40
codegen_flags: <defaults>
</compile_context>

<pallas_src>
import numpy as np

import jax
import jax.numpy as jnp
from jax.experimental import pallas as pl
from jax.experimental.pallas import tpu as pltpu

FEATURE_DIM = 288
N_ACTIONS = 2
_CPAD = 128           # padded channel width: [l4 0..31 | l5 32..63 | zeros]


def _elu(x):
    # F.elu(alpha=1.0); exp(min(x,0))-1 keeps the arg bounded for lowering.
    return jnp.where(x > 0, x, jnp.exp(jnp.minimum(x, 0.0)) - 1.0)


def _conv_down(n):
    # nn.Conv2d(k=3, stride=2, padding=1) output size
    return (n + 2 - 3) // 2 + 1


def _spatial_chain(h, w):
    sizes = []
    for _ in range(4):
        h, w = _conv_down(h), _conv_down(w)
        sizes.append((h, w))
    return sizes


# ---------------------------------------------------------------------------
# The single fused Pallas kernel
# ---------------------------------------------------------------------------
def _icm_kernel(p1_ref, g2_ref, g3_ref, g4_ref, sel_ref, act_ref,
                w1_ref, b1_ref, w2_ref, b2_ref, w3_ref, b3_ref,
                w4_ref, b4_ref, wfc_ref, bfc_ref,
                winv_ref, binv_ref, wpi_ref, bpi_ref,
                wd_ref, wda_ref, bd_ref, wpns_ref, bpns_ref,
                ns_ref, pi_ref, pred_ref, stk_ref, flat_ref):
    f32 = jnp.float32
    bf16 = jnp.bfloat16
    C = _CPAD
    bsz = act_ref.shape[0]
    feat = wpns_ref.shape[1]
    sf = g4_ref.shape[0] // bsz

    # ---- conv1: both encoders fused along channels, one K=2*9*Cin matmul ----
    x = jnp.dot(p1_ref[...], w1_ref[...], preferred_element_type=f32) + b1_ref[...]
    x = _elu(x).astype(bf16)                                      # (M1, 128)

    # ---- conv2..4: 3 chunked weight matmuls + 1 wide gather matmul ----------
    def conv_layer(x, g_ref, w_ref, b_ref, apply_elu):
        m_in = x.shape[0]
        for chunk in range(3):                 # 3 taps per weight matmul
            y = jnp.dot(x, w_ref[:, chunk * 3 * C:(chunk + 1) * 3 * C],
                        preferred_element_type=f32)               # (m_in, 384)
            for k in range(3):
                t = chunk * 3 + k
                stk_ref[pl.ds(t * m_in, m_in), :] = (
                    y[:, k * C:(k + 1) * C].astype(bf16))
        out = jnp.dot(g_ref[...], stk_ref[pl.ds(0, 9 * m_in), :],
                      preferred_element_type=f32) + b_ref[...]
        if apply_elu:
            out = _elu(out)
        return out.astype(bf16)                                   # (m_out, 128)

    x = conv_layer(x, g2_ref, w2_ref, b2_ref, True)
    x = conv_layer(x, g3_ref, w3_ref, b3_ref, True)
    x = conv_layer(x, g4_ref, w4_ref, b4_ref, False)              # conv4: no ELU

    # ---- fc1 (torch NCHW flatten folded into the weight layout) -------------
    if sf == 1:
        flat = x                                                  # (B, 128)
    else:
        for s in range(sf):
            rows = jnp.dot(sel_ref[s], x, preferred_element_type=f32)
            flat_ref[:, s * C:(s + 1) * C] = rows.astype(bf16)
        flat = flat_ref[...]
    feats = jnp.dot(flat, wfc_ref[...], preferred_element_type=f32) + bfc_ref[...]
    # feats columns = [ new_state (F) | state (F) ]
    ns_ref[...] = feats[:, :feat]

    # ---- tail: inverse / pi_logits / dense1(+ELU) / predicted_new_state ----
    fb = feats.astype(bf16)
    inv = jnp.dot(fb, winv_ref[...], preferred_element_type=f32) + binv_ref[...]
    pi_ref[...] = (jnp.dot(inv.astype(bf16), wpi_ref[...],
                           preferred_element_type=f32) + bpi_ref[...])
    dense = _elu(jnp.dot(fb, wd_ref[...], preferred_element_type=f32)
                 + act_ref[...] * wda_ref[...] + bd_ref[...])
    pred_ref[...] = (jnp.dot(dense.astype(bf16), wpns_ref[...],
                             preferred_element_type=f32) + bpns_ref[...])


# ---------------------------------------------------------------------------
# Trace-time helpers (numpy constants / cheap XLA glue on the raw inputs)
# ---------------------------------------------------------------------------
def _im2col_s2_p1(x_nchw):
    """Raw image -> lane-dense (B*Ho*Wo, 9*Cin) patches, cols ordered (kh,kw,c)."""
    b, c, h, w = x_nchw.shape
    ho, wo = _conv_down(h), _conv_down(w)
    x = jnp.transpose(x_nchw, (0, 2, 3, 1))                       # NHWC
    xp = jnp.pad(x, ((0, 0), (1, 1), (1, 1), (0, 0)))
    cols = []
    for kh in range(3):
        for kw in range(3):
            t = xp[:, kh:kh + 2 * ho:2, kw:kw + 2 * wo:2, :]
            cols.append(t.reshape(b * ho * wo, c))
    return jnp.concatenate(cols, axis=1)


def _gather_cat(bsz, h, w):
    """Concatenated one-hot gather matrix G_cat (M_out, 9*M_in) for 3x3/s2/p1.
    Zero entries encode the zero padding."""
    ho, wo = _conv_down(h), _conv_down(w)
    m_in = bsz * h * w
    g = np.zeros((bsz * ho * wo, 9 * m_in), np.float32)
    for b in range(bsz):
        for oh in range(ho):
            for ow in range(wo):
                row = (b * ho + oh) * wo + ow
                for kh in range(3):
                    for kw in range(3):
                        ih, iw = 2 * oh + kh - 1, 2 * ow + kw - 1
                        if 0 <= ih < h and 0 <= iw < w:
                            t = kh * 3 + kw
                            g[row, t * m_in + (b * h + ih) * w + iw] = 1.0
    return g


def _fc_sel(bsz, sf):
    """Row selectors (sf, B, B*sf): pick spatial position s of each batch row."""
    sel = np.zeros((sf, bsz, bsz * sf), np.float32)
    for s in range(sf):
        for b in range(bsz):
            sel[s, b, b * sf + s] = 1.0
    return sel


# ---------------------------------------------------------------------------
# Parameter init (PyTorch-shaped) and one-time preparation for the kernel
# ---------------------------------------------------------------------------
def _w(key, shape):
    return (0.05 * jax.random.normal(key, shape)).astype(jnp.float32)


def conv_out_flat(input_dims):
    _, h, w = input_dims
    h4, w4 = _spatial_chain(h, w)[-1]
    return 32 * h4 * w4


def init_encoder_params(key, in_ch, conv_flat, feature_dim=FEATURE_DIM):
    ks = jax.random.split(key, 10)
    return {
        "conv1_w": _w(ks[0], (32, in_ch, 3, 3)), "conv1_b": _w(ks[1], (32,)),
        "conv2_w": _w(ks[2], (32, 32, 3, 3)),    "conv2_b": _w(ks[3], (32,)),
        "conv3_w": _w(ks[4], (32, 32, 3, 3)),    "conv3_b": _w(ks[5], (32,)),
        "conv4_w": _w(ks[6], (32, 32, 3, 3)),    "conv4_b": _w(ks[7], (32,)),
        "fc1_w":   _w(ks[8], (feature_dim, conv_flat)),
        "fc1_b":   _w(ks[9], (feature_dim,)),
    }


def init_icm_params(key, input_dims, n_actions=N_ACTIONS, feature_dims=FEATURE_DIM):
    flat = conv_out_flat(input_dims)
    ks = jax.random.split(key, 10)
    return {
        # torch's `self.encoder` is constructed but unused in forward(); omitted.
        "l4_encoder": init_encoder_params(ks[0], input_dims[0], flat, feature_dims),
        "l5_encoder": init_encoder_params(ks[1], input_dims[0], flat, feature_dims),
        "inverse_w": _w(ks[2], (256, feature_dims * 2)), "inverse_b": _w(ks[3], (256,)),
        "pi_w":      _w(ks[4], (n_actions, 256)),        "pi_b":      _w(ks[5], (n_actions,)),
        "dense1_w":  _w(ks[6], (256, feature_dims + 1)), "dense1_b":  _w(ks[7], (256,)),
        "pns_w":     _w(ks[8], (feature_dims, 256)),     "pns_b":     _w(ks[9], (feature_dims,)),
    }


def prepare_icm_params(params, input_dims):
    """One-time (outside jit) weight repacking into the fused bf16 layouts."""
    cin, h, w = input_dims
    h4, w4 = _spatial_chain(h, w)[-1]
    sf = h4 * w4
    F = int(params["l4_encoder"]["fc1_b"].shape[0])
    C = _CPAD
    p4, p5 = params["l4_encoder"], params["l5_encoder"]

    def c1rows(wc):                                  # OIHW -> (9*cin, 32)
        a = np.asarray(wc)
        return a.transpose(2, 3, 1, 0).reshape(9 * cin, 32)

    w1 = np.zeros((2 * 9 * cin, C), np.float32)
    w1[:9 * cin, :32] = c1rows(p4["conv1_w"])        # obs  -> channels 0..31
    w1[9 * cin:, 32:64] = c1rows(p5["conv1_w"])      # new  -> channels 32..63

    def bias_cat(b_l4, b_l5):
        b = np.zeros((1, C), np.float32)
        b[0, :32] = np.asarray(b_l4)
        b[0, 32:64] = np.asarray(b_l5)
        return jnp.asarray(b)

    def tap_weight(w_l4, w_l5):
        # W_all (C, 9*C): per-tap block-diagonal (l4, l5) weights, (in, out).
        a4, a5 = np.asarray(w_l4), np.asarray(w_l5)  # OIHW (32,32,3,3)
        out = np.zeros((C, 9 * C), np.float32)
        for kh in range(3):
            for kw in range(3):
                t = kh * 3 + kw
                out[0:32, t * C:t * C + 32] = a4[:, :, kh, kw].T
                out[32:64, t * C + 32:t * C + 64] = a5[:, :, kh, kw].T
        return jnp.asarray(out, dtype=jnp.bfloat16)

    # fc1: torch NCHW flatten (index = c*sf + s) folded into one (sf*C, 2F)
    # weight; output columns ordered [ new_state | state ].
    wfc = np.zeros((sf * C, 2 * F), np.float32)
    a4 = np.asarray(p4["fc1_w"]).reshape(F, 32, sf)
    a5 = np.asarray(p5["fc1_w"]).reshape(F, 32, sf)
    for s in range(sf):
        wfc[s * C:s * C + 32, F:] = a4[:, :, s].T        # l4 -> state cols
        wfc[s * C + 32:s * C + 64, :F] = a5[:, :, s].T   # l5 -> new_state cols
    bfc = np.zeros((1, 2 * F), np.float32)
    bfc[0, :F] = np.asarray(p5["fc1_b"])
    bfc[0, F:] = np.asarray(p4["fc1_b"])

    winv_t = np.asarray(params["inverse_w"]).T           # (2F, 256)
    winv = np.concatenate([winv_t[F:], winv_t[:F]], axis=0)   # [new|state] rows
    wd_t = np.asarray(params["dense1_w"]).T               # (F+1, 256)
    wd = np.zeros((2 * F, 256), np.float32)
    wd[F:, :] = wd_t[:F]                                  # only the state block
    wda = wd_t[F:F + 1]                                   # action-column weight

    bf = lambda x: jnp.asarray(x, dtype=jnp.bfloat16)
    f32row = lambda x: jnp.asarray(np.asarray(x), dtype=jnp.float32).reshape(1, -1)

    return {
        "w1": bf(w1), "b1": bias_cat(p4["conv1_b"], p5["conv1_b"]),
        "w2": tap_weight(p4["conv2_w"], p5["conv2_w"]),
        "b2": bias_cat(p4["conv2_b"], p5["conv2_b"]),
        "w3": tap_weight(p4["conv3_w"], p5["conv3_w"]),
        "b3": bias_cat(p4["conv3_b"], p5["conv3_b"]),
        "w4": tap_weight(p4["conv4_w"], p5["conv4_w"]),
        "b4": bias_cat(p4["conv4_b"], p5["conv4_b"]),
        "wfc": bf(wfc), "bfc": jnp.asarray(bfc),
        "winv": bf(winv), "binv": f32row(params["inverse_b"]),
        "wpi": bf(np.asarray(params["pi_w"]).T), "bpi": f32row(params["pi_b"]),
        "wd": bf(wd),
        "wda": jnp.asarray(wda, dtype=jnp.float32).reshape(1, -1),
        "bd": f32row(params["dense1_b"]),
        "wpns": bf(np.asarray(params["pns_w"]).T), "bpns": f32row(params["pns_b"]),
    }


# ---------------------------------------------------------------------------
# Forward pass
# ---------------------------------------------------------------------------
def icm_forward(prepped, obs, new_obs, action):
    bsz, _, h, w = obs.shape
    (h1, w1), (h2, w2), (h3, w3), (h4, w4) = _spatial_chain(h, w)
    sf = h4 * w4
    C = _CPAD
    m1 = bsz * h1 * w1
    F = prepped["bpns"].shape[1]
    n_act = prepped["bpi"].shape[1]

    # conv1 im2col of both inputs (cheap XLA glue on the raw HBM tensors)
    p1 = jnp.concatenate(
        [_im2col_s2_p1(obs), _im2col_s2_p1(new_obs)], axis=1).astype(jnp.bfloat16)
    # compile-time gather constants (0/1 values, exactly representable in bf16)
    g2 = jnp.asarray(_gather_cat(bsz, h1, w1), dtype=jnp.bfloat16)
    g3 = jnp.asarray(_gather_cat(bsz, h2, w2), dtype=jnp.bfloat16)
    g4 = jnp.asarray(_gather_cat(bsz, h3, w3), dtype=jnp.bfloat16)
    sel = jnp.asarray(_fc_sel(bsz, sf), dtype=jnp.bfloat16)
    act = action.reshape(bsz, 1).astype(jnp.float32)

    operands = (p1, g2, g3, g4, sel, act,
                prepped["w1"], prepped["b1"], prepped["w2"], prepped["b2"],
                prepped["w3"], prepped["b3"], prepped["w4"], prepped["b4"],
                prepped["wfc"], prepped["bfc"],
                prepped["winv"], prepped["binv"], prepped["wpi"], prepped["bpi"],
                prepped["wd"], prepped["wda"], prepped["bd"],
                prepped["wpns"], prepped["bpns"])

    # Explicit VMEM budget (v7x has 64 MiB/core; default scoped limit 32 MiB).
    in_bytes = sum(int(np.prod(t.shape)) * t.dtype.itemsize for t in operands)
    scratch_bytes = 9 * m1 * C * 2 + bsz * sf * C * 2
    out_bytes = bsz * (2 * F + n_act) * 4
    working = in_bytes + scratch_bytes + out_bytes
    assert working < 48 * (1 << 20), (
        "ICM gather-matrix working set too large for VMEM at this shape; "
        "switch the conv gathers to strided row slices.")
    vmem_limit = int(min(48 * (1 << 20), max(32 * (1 << 20), 2 * working)))

    vmem = pl.BlockSpec(memory_space=pltpu.MemorySpace.VMEM)

    new_state, pi_logits, predicted_new_state = pl.pallas_call(
        _icm_kernel,
        out_shape=(jax.ShapeDtypeStruct((bsz, F), jnp.float32),
                   jax.ShapeDtypeStruct((bsz, n_act), jnp.float32),
                   jax.ShapeDtypeStruct((bsz, F), jnp.float32)),
        in_specs=[vmem] * len(operands),
        out_specs=(vmem, vmem, vmem),
        scratch_shapes=[pltpu.VMEM((9 * m1, C), jnp.bfloat16),   # tap stack
                        pltpu.VMEM((bsz, sf * C), jnp.bfloat16)],  # fc flatten
        compiler_params=pltpu.CompilerParams(vmem_limit_bytes=vmem_limit),
    )(*operands)
    return new_state, pi_logits, predicted_new_state


if __name__ == "__main__":
    key = jax.random.PRNGKey(0)
    k_param, k_obs, k_new, k_act = jax.random.split(key, 4)

    input_dims = (4, 16, 16)   # (C, H, W) -> conv stack output 32*1*1 = 32
    B = 2

    params = init_icm_params(k_param, input_dims)
    prepped = prepare_icm_params(params, input_dims)

    obs = jax.random.normal(k_obs, (B,) + input_dims, dtype=jnp.float32)
    new_obs = jax.random.normal(k_new, (B,) + input_dims, dtype=jnp.float32)
    action = jax.random.randint(k_act, (B,), 0, N_ACTIONS).astype(jnp.float32)

    fwd = jax.jit(icm_forward)
    new_state, pi_logits, predicted_new_state = fwd(prepped, obs, new_obs, action)
    jax.block_until_ready((new_state, pi_logits, predicted_new_state))

    assert new_state.shape == (B, FEATURE_DIM)
    assert pi_logits.shape == (B, N_ACTIONS)
    assert predicted_new_state.shape == (B, FEATURE_DIM)
    print("KERNEL_OK")
</pallas_src>

<mosaic_0001>
module attributes {stable_mosaic.version = 11 : i64} {
  func.func @_icm_kernel(%arg0: memref<128x72xbf16, #tpu.memory_space<vmem>>, %arg1: memref<32x1152xbf16, #tpu.memory_space<vmem>>, %arg2: memref<8x288xbf16, #tpu.memory_space<vmem>>, %arg3: memref<2x72xbf16, #tpu.memory_space<vmem>>, %arg4: memref<1x2x2xbf16, #tpu.memory_space<vmem>>, %arg5: memref<2x1xf32, #tpu.memory_space<vmem>>, %arg6: memref<72x128xbf16, #tpu.memory_space<vmem>>, %arg7: memref<1x128xf32, #tpu.memory_space<vmem>>, %arg8: memref<128x1152xbf16, #tpu.memory_space<vmem>>, %arg9: memref<1x128xf32, #tpu.memory_space<vmem>>, %arg10: memref<128x1152xbf16, #tpu.memory_space<vmem>>, %arg11: memref<1x128xf32, #tpu.memory_space<vmem>>, %arg12: memref<128x1152xbf16, #tpu.memory_space<vmem>>, %arg13: memref<1x128xf32, #tpu.memory_space<vmem>>, %arg14: memref<128x576xbf16, #tpu.memory_space<vmem>>, %arg15: memref<1x576xf32, #tpu.memory_space<vmem>>, %arg16: memref<576x256xbf16, #tpu.memory_space<vmem>>, %arg17: memref<1x256xf32, #tpu.memory_space<vmem>>, %arg18: memref<256x2xbf16, #tpu.memory_space<vmem>>, %arg19: memref<1x2xf32, #tpu.memory_space<vmem>>, %arg20: memref<576x256xbf16, #tpu.memory_space<vmem>>, %arg21: memref<1x256xf32, #tpu.memory_space<vmem>>, %arg22: memref<1x256xf32, #tpu.memory_space<vmem>>, %arg23: memref<256x288xbf16, #tpu.memory_space<vmem>>, %arg24: memref<1x288xf32, #tpu.memory_space<vmem>>, %arg25: memref<2x288xf32, #tpu.memory_space<vmem>>, %arg26: memref<2x2xf32, #tpu.memory_space<vmem>>, %arg27: memref<2x288xf32, #tpu.memory_space<vmem>>, %arg28: memref<1152x128xbf16, #tpu.memory_space<vmem>>, %arg29: memref<2x128xbf16, #tpu.memory_space<vmem>>) attributes {dimension_semantics = [], scalar_prefetch = 0 : i64, scratch_operands = 2 : i64, tpu.core_type = #tpu.core_type<tc>} {
    %c0 = arith.constant 0 : index
    %c0_0 = arith.constant 0 : index
    %0 = vector.load %arg0[%c0, %c0_0] : memref<128x72xbf16, #tpu.memory_space<vmem>>, vector<128x72xbf16>
    %c0_1 = arith.constant 0 : index
    %c0_2 = arith.constant 0 : index
    %1 = vector.load %arg6[%c0_1, %c0_2] : memref<72x128xbf16, #tpu.memory_space<vmem>>, vector<72x128xbf16>
    %cst = arith.constant dense<0.000000e+00> : vector<128x128xf32>
    %2 = tpu.matmul %0, %1, %cst {dimension_numbers = #tpu.dot_dimension_numbers<[1], [0], [0], [1], [0, 0, 1, 1], [], []>} : vector<128x72xbf16>, vector<72x128xbf16>, vector<128x128xf32> -> vector<128x128xf32>
    %c0_3 = arith.constant 0 : index
    %c0_4 = arith.constant 0 : index
    %3 = vector.load %arg7[%c0_3, %c0_4] : memref<1x128xf32, #tpu.memory_space<vmem>>, vector<1x128xf32>
    %4 = vector.broadcast %3 : vector<1x128xf32> to vector<128x128xf32>
    %5 = arith.addf %2, %4 : vector<128x128xf32>
    %cst_5 = arith.constant 0.000000e+00 : f32
    %6 = vector.broadcast %cst_5 : f32 to vector<128x128xf32>
    %7 = arith.cmpf ogt, %5, %6 : vector<128x128xf32>
    %cst_6 = arith.constant 0.000000e+00 : f32
    %8 = vector.broadcast %cst_6 : f32 to vector<128x128xf32>
    %9 = arith.minimumf %5, %8 : vector<128x128xf32>
    %10 = math.exp %9 : vector<128x128xf32>
    %cst_7 = arith.constant 1.000000e+00 : f32
    %11 = vector.broadcast %cst_7 : f32 to vector<128x128xf32>
    %12 = arith.subf %10, %11 : vector<128x128xf32>
    %13 = arith.select %7, %5, %12 : vector<128x128xi1>, vector<128x128xf32>
    %14 = arith.truncf %13 : vector<128x128xf32> to vector<128x128xbf16>
    %c0_8 = arith.constant 0 : index
    %c0_9 = arith.constant 0 : index
    %15 = vector.load %arg8[%c0_8, %c0_9] : memref<128x1152xbf16, #tpu.memory_space<vmem>>, vector<128x384xbf16>
    %cst_10 = arith.constant dense<0.000000e+00> : vector<128x384xf32>
    %16 = tpu.matmul %14, %15, %cst_10 {dimension_numbers = #tpu.dot_dimension_numbers<[1], [0], [0], [1], [0, 0, 1, 1], [], []>} : vector<128x128xbf16>, vector<128x384xbf16>, vector<128x384xf32> -> vector<128x384xf32>
    %17 = vector.extract_strided_slice %16 {offsets = [0, 0], sizes = [128, 128], strides = [1, 1]} : vector<128x384xf32> to vector<128x128xf32>
    %18 = arith.truncf %17 : vector<128x128xf32> to vector<128x128xbf16>
    %c0_11 = arith.constant 0 : index
    %c0_12 = arith.constant 0 : index
    %19 = vector.load %arg28[%c0_11, %c0_12] : memref<1152x128xbf16, #tpu.memory_space<vmem>>, vector<128x128xbf16>
    tpu.vector_store %arg28[%c0_11, %c0_12], %18 {strides = array<i32>} : memref<1152x128xbf16, #tpu.memory_space<vmem>>, vector<128x128xbf16>,
    %20 = vector.extract_strided_slice %16 {offsets = [0, 128], sizes = [128, 128], strides = [1, 1]} : vector<128x384xf32> to vector<128x128xf32>
    %21 = arith.truncf %20 : vector<128x128xf32> to vector<128x128xbf16>
    %c128 = arith.constant 128 : index
    %c0_13 = arith.constant 0 : index
    %22 = vector.load %arg28[%c128, %c0_13] : memref<1152x128xbf16, #tpu.memory_space<vmem>>, vector<128x128xbf16>
    tpu.vector_store %arg28[%c128, %c0_13], %21 {strides = array<i32>} : memref<1152x128xbf16, #tpu.memory_space<vmem>>, vector<128x128xbf16>,
    %23 = vector.extract_strided_slice %16 {offsets = [0, 256], sizes = [128, 128], strides = [1, 1]} : vector<128x384xf32> to vector<128x128xf32>
    %24 = arith.truncf %23 : vector<128x128xf32> to vector<128x128xbf16>
    %c256 = arith.constant 256 : index
    %c0_14 = arith.constant 0 : index
    %25 = vector.load %arg28[%c256, %c0_14] : memref<1152x128xbf16, #tpu.memory_space<vmem>>, vector<128x128xbf16>
    tpu.vector_store %arg28[%c256, %c0_14], %24 {strides = array<i32>} : memref<1152x128xbf16, #tpu.memory_space<vmem>>, vector<128x128xbf16>,
    %c0_15 = arith.constant 0 : index
    %c384 = arith.constant 384 : index
    %26 = vector.load %arg8[%c0_15, %c384] : memref<128x1152xbf16, #tpu.memory_space<vmem>>, vector<128x384xbf16>
    %cst_16 = arith.constant dense<0.000000e+00> : vector<128x384xf32>
    %27 = tpu.matmul %14, %26, %cst_16 {dimension_numbers = #tpu.dot_dimension_numbers<[1], [0], [0], [1], [0, 0, 1, 1], [], []>} : vector<128x128xbf16>, vector<128x384xbf16>, vector<128x384xf32> -> vector<128x384xf32>
    %28 = vector.extract_strided_slice %27 {offsets = [0, 0], sizes = [128, 128], strides = [1, 1]} : vector<128x384xf32> to vector<128x128xf32>
    %29 = arith.truncf %28 : vector<128x128xf32> to vector<128x128xbf16>
    %c384_17 = arith.constant 384 : index
    %c0_18 = arith.constant 0 : index
    %30 = vector.load %arg28[%c384_17, %c0_18] : memref<1152x128xbf16, #tpu.memory_space<vmem>>, vector<128x128xbf16>
    tpu.vector_store %arg28[%c384_17, %c0_18], %29 {strides = array<i32>} : memref<1152x128xbf16, #tpu.memory_space<vmem>>, vector<128x128xbf16>,
    %31 = vector.extract_strided_slice %27 {offsets = [0, 128], sizes = [128, 128], strides = [1, 1]} : vector<128x384xf32> to vector<128x128xf32>
    %32 = arith.truncf %31 : vector<128x128xf32> to vector<128x128xbf16>
    %c512 = arith.constant 512 : index
    %c0_19 = arith.constant 0 : index
    %33 = vector.load %arg28[%c512, %c0_19] : memref<1152x128xbf16, #tpu.memory_space<vmem>>, vector<128x128xbf16>
    tpu.vector_store %arg28[%c512, %c0_19], %32 {strides = array<i32>} : memref<1152x128xbf16, #tpu.memory_space<vmem>>, vector<128x128xbf16>,
    %34 = vector.extract_strided_slice %27 {offsets = [0, 256], sizes = [128, 128], strides = [1, 1]} : vector<128x384xf32> to vector<128x128xf32>
    %35 = arith.truncf %34 : vector<128x128xf32> to vector<128x128xbf16>
    %c640 = arith.constant 640 : index
    %c0_20 = arith.constant 0 : index
    %36 = vector.load %arg28[%c640, %c0_20] : memref<1152x128xbf16, #tpu.memory_space<vmem>>, vector<128x128xbf16>
    tpu.vector_store %arg28[%c640, %c0_20], %35 {strides = array<i32>} : memref<1152x128xbf16, #tpu.memory_space<vmem>>, vector<128x128xbf16>,
    %c0_21 = arith.constant 0 : index
    %c768 = arith.constant 768 : index
    %37 = vector.load %arg8[%c0_21, %c768] : memref<128x1152xbf16, #tpu.memory_space<vmem>>, vector<128x384xbf16>
    %cst_22 = arith.constant dense<0.000000e+00> : vector<128x384xf32>
    %38 = tpu.matmul %14, %37, %cst_22 {dimension_numbers = #tpu.dot_dimension_numbers<[1], [0], [0], [1], [0, 0, 1, 1], [], []>} : vector<128x128xbf16>, vector<128x384xbf16>, vector<128x384xf32> -> vector<128x384xf32>
    %39 = vector.extract_strided_slice %38 {offsets = [0, 0], sizes = [128, 128], strides = [1, 1]} : vector<128x384xf32> to vector<128x128xf32>
    %40 = arith.truncf %39 : vector<128x128xf32> to vector<128x128xbf16>
    %c768_23 = arith.constant 768 : index
    %c0_24 = arith.constant 0 : index
    %41 = vector.load %arg28[%c768_23, %c0_24] : memref<1152x128xbf16, #tpu.memory_space<vmem>>, vector<128x128xbf16>
    tpu.vector_store %arg28[%c768_23, %c0_24], %40 {strides = array<i32>} : memref<1152x128xbf16, #tpu.memory_space<vmem>>, vector<128x128xbf16>,
    %42 = vector.extract_strided_slice %38 {offsets = [0, 128], sizes = [128, 128], strides = [1, 1]} : vector<128x384xf32> to vector<128x128xf32>
    %43 = arith.truncf %42 : vector<128x128xf32> to vector<128x128xbf16>
    %c896 = arith.constant 896 : index
    %c0_25 = arith.constant 0 : index
    %44 = vector.load %arg28[%c896, %c0_25] : memref<1152x128xbf16, #tpu.memory_space<vmem>>, vector<128x128xbf16>
    tpu.vector_store %arg28[%c896, %c0_25], %43 {strides = array<i32>} : memref<1152x128xbf16, #tpu.memory_space<vmem>>, vector<128x128xbf16>,
    %45 = vector.extract_strided_slice %38 {offsets = [0, 256], sizes = [128, 128], strides = [1, 1]} : vector<128x384xf32> to vector<128x128xf32>
    %46 = arith.truncf %45 : vector<128x128xf32> to vector<128x128xbf16>
    %c1024 = arith.constant 1024 : index
    %c0_26 = arith.constant 0 : index
    %47 = vector.load %arg28[%c1024, %c0_26] : memref<1152x128xbf16, #tpu.memory_space<vmem>>, vector<128x128xbf16>
    tpu.vector_store %arg28[%c1024, %c0_26], %46 {strides = array<i32>} : memref<1152x128xbf16, #tpu.memory_space<vmem>>, vector<128x128xbf16>,
    %c0_27 = arith.constant 0 : index
    %c0_28 = arith.constant 0 : index
    %48 = vector.load %arg1[%c0_27, %c0_28] : memref<32x1152xbf16, #tpu.memory_space<vmem>>, vector<32x1152xbf16>
    %c0_29 = arith.constant 0 : index
    %c0_30 = arith.constant 0 : index
    %49 = vector.load %arg28[%c0_29, %c0_30] : memref<1152x128xbf16, #tpu.memory_space<vmem>>, vector<1152x128xbf16>
    %cst_31 = arith.constant dense<0.000000e+00> : vector<32x128xf32>
    %50 = tpu.matmul %48, %49, %cst_31 {dimension_numbers = #tpu.dot_dimension_numbers<[1], [0], [0], [1], [0, 0, 1, 1], [], []>} : vector<32x1152xbf16>, vector<1152x128xbf16>, vector<32x128xf32> -> vector<32x128xf32>
    %c0_32 = arith.constant 0 : index
    %c0_33 = arith.constant 0 : index
    %51 = vector.load %arg9[%c0_32, %c0_33] : memref<1x128xf32, #tpu.memory_space<vmem>>, vector<1x128xf32>
    %52 = vector.broadcast %51 : vector<1x128xf32> to vector<32x128xf32>
    %53 = arith.addf %50, %52 : vector<32x128xf32>
    %cst_34 = arith.constant 0.000000e+00 : f32
    %54 = vector.broadcast %cst_34 : f32 to vector<32x128xf32>
    %55 = arith.cmpf ogt, %53, %54 : vector<32x128xf32>
    %cst_35 = arith.constant 0.000000e+00 : f32
    %56 = vector.broadcast %cst_35 : f32 to vector<32x128xf32>
    %57 = arith.minimumf %53, %56 : vector<32x128xf32>
    %58 = math.exp %57 : vector<32x128xf32>
    %cst_36 = arith.constant 1.000000e+00 : f32
    %59 = vector.broadcast %cst_36 : f32 to vector<32x128xf32>
    %60 = arith.subf %58, %59 : vector<32x128xf32>
    %61 = arith.select %55, %53, %60 : vector<32x128xi1>, vector<32x128xf32>
    %62 = arith.truncf %61 : vector<32x128xf32> to vector<32x128xbf16>
    %c0_37 = arith.constant 0 : index
    %c0_38 = arith.constant 0 : index
    %63 = vector.load %arg10[%c0_37, %c0_38] : memref<128x1152xbf16, #tpu.memory_space<vmem>>, vector<128x384xbf16>
    %cst_39 = arith.constant dense<0.000000e+00> : vector<32x384xf32>
    %64 = tpu.matmul %62, %63, %cst_39 {dimension_numbers = #tpu.dot_dimension_numbers<[1], [0], [0], [1], [0, 0, 1, 1], [], []>} : vector<32x128xbf16>, vector<128x384xbf16>, vector<32x384xf32> -> vector<32x384xf32>
    %65 = vector.extract_strided_slice %64 {offsets = [0, 0], sizes = [32, 128], strides = [1, 1]} : vector<32x384xf32> to vector<32x128xf32>
    %66 = arith.truncf %65 : vector<32x128xf32> to vector<32x128xbf16>
    %c0_40 = arith.constant 0 : index
    %c0_41 = arith.constant 0 : index
    %67 = vector.load %arg28[%c0_40, %c0_41] : memref<1152x128xbf16, #tpu.memory_space<vmem>>, vector<32x128xbf16>
    tpu.vector_store %arg28[%c0_40, %c0_41], %66 {strides = array<i32>} : memref<1152x128xbf16, #tpu.memory_space<vmem>>, vector<32x128xbf16>,
    %68 = vector.extract_strided_slice %64 {offsets = [0, 128], sizes = [32, 128], strides = [1, 1]} : vector<32x384xf32> to vector<32x128xf32>
    %69 = arith.truncf %68 : vector<32x128xf32> to vector<32x128xbf16>
    %c32 = arith.constant 32 : index
    %c0_42 = arith.constant 0 : index
    %70 = vector.load %arg28[%c32, %c0_42] : memref<1152x128xbf16, #tpu.memory_space<vmem>>, vector<32x128xbf16>
    tpu.vector_store %arg28[%c32, %c0_42], %69 {strides = array<i32>} : memref<1152x128xbf16, #tpu.memory_space<vmem>>, vector<32x128xbf16>,
    %71 = vector.extract_strided_slice %64 {offsets = [0, 256], sizes = [32, 128], strides = [1, 1]} : vector<32x384xf32> to vector<32x128xf32>
    %72 = arith.truncf %71 : vector<32x128xf32> to vector<32x128xbf16>
    %c64 = arith.constant 64 : index
    %c0_43 = arith.constant 0 : index
    %73 = vector.load %arg28[%c64, %c0_43] : memref<1152x128xbf16, #tpu.memory_space<vmem>>, vector<32x128xbf16>
    tpu.vector_store %arg28[%c64, %c0_43], %72 {strides = array<i32>} : memref<1152x128xbf16, #tpu.memory_space<vmem>>, vector<32x128xbf16>,
    %c0_44 = arith.constant 0 : index
    %c384_45 = arith.constant 384 : index
    %74 = vector.load %arg10[%c0_44, %c384_45] : memref<128x1152xbf16, #tpu.memory_space<vmem>>, vector<128x384xbf16>
    %cst_46 = arith.constant dense<0.000000e+00> : vector<32x384xf32>
    %75 = tpu.matmul %62, %74, %cst_46 {dimension_numbers = #tpu.dot_dimension_numbers<[1], [0], [0], [1], [0, 0, 1, 1], [], []>} : vector<32x128xbf16>, vector<128x384xbf16>, vector<32x384xf32> -> vector<32x384xf32>
    %76 = vector.extract_strided_slice %75 {offsets = [0, 0], sizes = [32, 128], strides = [1, 1]} : vector<32x384xf32> to vector<32x128xf32>
    %77 = arith.truncf %76 : vector<32x128xf32> to vector<32x128xbf16>
    %c96 = arith.constant 96 : index
    %c0_47 = arith.constant 0 : index
    %78 = vector.load %arg28[%c96, %c0_47] : memref<1152x128xbf16, #tpu.memory_space<vmem>>, vector<32x128xbf16>
    tpu.vector_store %arg28[%c96, %c0_47], %77 {strides = array<i32>} : memref<1152x128xbf16, #tpu.memory_space<vmem>>, vector<32x128xbf16>,
    %79 = vector.extract_strided_slice %75 {offsets = [0, 128], sizes = [32, 128], strides = [1, 1]} : vector<32x384xf32> to vector<32x128xf32>
    %80 = arith.truncf %79 : vector<32x128xf32> to vector<32x128xbf16>
    %c128_48 = arith.constant 128 : index
    %c0_49 = arith.constant 0 : index
    %81 = vector.load %arg28[%c128_48, %c0_49] : memref<1152x128xbf16, #tpu.memory_space<vmem>>, vector<32x128xbf16>
    tpu.vector_store %arg28[%c128_48, %c0_49], %80 {strides = array<i32>} : memref<1152x128xbf16, #tpu.memory_space<vmem>>, vector<32x128xbf16>,
    %82 = vector.extract_strided_slice %75 {offsets = [0, 256], sizes = [32, 128], strides = [1, 1]} : vector<32x384xf32> to vector<32x128xf32>
    %83 = arith.truncf %82 : vector<32x128xf32> to vector<32x128xbf16>
    %c160 = arith.constant 160 : index
    %c0_50 = arith.constant 0 : index
    %84 = vector.load %arg28[%c160, %c0_50] : memref<1152x128xbf16, #tpu.memory_space<vmem>>, vector<32x128xbf16>
    tpu.vector_store %arg28[%c160, %c0_50], %83 {strides = array<i32>} : memref<1152x128xbf16, #tpu.memory_space<vmem>>, vector<32x128xbf16>,
    %c0_51 = arith.constant 0 : index
    %c768_52 = arith.constant 768 : index
    %85 = vector.load %arg10[%c0_51, %c768_52] : memref<128x1152xbf16, #tpu.memory_space<vmem>>, vector<128x384xbf16>
    %cst_53 = arith.constant dense<0.000000e+00> : vector<32x384xf32>
    %86 = tpu.matmul %62, %85, %cst_53 {dimension_numbers = #tpu.dot_dimension_numbers<[1], [0], [0], [1], [0, 0, 1, 1], [], []>} : vector<32x128xbf16>, vector<128x384xbf16>, vector<32x384xf32> -> vector<32x384xf32>
    %87 = vector.extract_strided_slice %86 {offsets = [0, 0], sizes = [32, 128], strides = [1, 1]} : vector<32x384xf32> to vector<32x128xf32>
    %88 = arith.truncf %87 : vector<32x128xf32> to vector<32x128xbf16>
    %c192 = arith.constant 192 : index
    %c0_54 = arith.constant 0 : index
    %89 = vector.load %arg28[%c192, %c0_54] : memref<1152x128xbf16, #tpu.memory_space<vmem>>, vector<32x128xbf16>
    tpu.vector_store %arg28[%c192, %c0_54], %88 {strides = array<i32>} : memref<1152x128xbf16, #tpu.memory_space<vmem>>, vector<32x128xbf16>,
    %90 = vector.extract_strided_slice %86 {offsets = [0, 128], sizes = [32, 128], strides = [1, 1]} : vector<32x384xf32> to vector<32x128xf32>
    %91 = arith.truncf %90 : vector<32x128xf32> to vector<32x128xbf16>
    %c224 = arith.constant 224 : index
    %c0_55 = arith.constant 0 : index
    %92 = vector.load %arg28[%c224, %c0_55] : memref<1152x128xbf16, #tpu.memory_space<vmem>>, vector<32x128xbf16>
    tpu.vector_store %arg28[%c224, %c0_55], %91 {strides = array<i32>} : memref<1152x128xbf16, #tpu.memory_space<vmem>>, vector<32x128xbf16>,
    %93 = vector.extract_strided_slice %86 {offsets = [0, 256], sizes = [32, 128], strides = [1, 1]} : vector<32x384xf32> to vector<32x128xf32>
    %94 = arith.truncf %93 : vector<32x128xf32> to vector<32x128xbf16>
    %c256_56 = arith.constant 256 : index
    %c0_57 = arith.constant 0 : index
    %95 = vector.load %arg28[%c256_56, %c0_57] : memref<1152x128xbf16, #tpu.memory_space<vmem>>, vector<32x128xbf16>
    tpu.vector_store %arg28[%c256_56, %c0_57], %94 {strides = array<i32>} : memref<1152x128xbf16, #tpu.memory_space<vmem>>, vector<32x128xbf16>,
    %c0_58 = arith.constant 0 : index
    %c0_59 = arith.constant 0 : index
    %96 = vector.load %arg2[%c0_58, %c0_59] : memref<8x288xbf16, #tpu.memory_space<vmem>>, vector<8x288xbf16>
    %c0_60 = arith.constant 0 : index
    %c0_61 = arith.constant 0 : index
    %97 = vector.load %arg28[%c0_60, %c0_61] : memref<1152x128xbf16, #tpu.memory_space<vmem>>, vector<288x128xbf16>
    %cst_62 = arith.constant dense<0.000000e+00> : vector<8x128xf32>
    %98 = tpu.matmul %96, %97, %cst_62 {dimension_numbers = #tpu.dot_dimension_numbers<[1], [0], [0], [1], [0, 0, 1, 1], [], []>} : vector<8x288xbf16>, vector<288x128xbf16>, vector<8x128xf32> -> vector<8x128xf32>
    %c0_63 = arith.constant 0 : index
    %c0_64 = arith.constant 0 : index
    %99 = vector.load %arg11[%c0_63, %c0_64] : memref<1x128xf32, #tpu.memory_space<vmem>>, vector<1x128xf32>
    %100 = vector.broadcast %99 : vector<1x128xf32> to vector<8x128xf32>
    %101 = arith.addf %98, %100 : vector<8x128xf32>
    %cst_65 = arith.constant 0.000000e+00 : f32
    %102 = vector.broadcast %cst_65 : f32 to vector<8x128xf32>
    %103 = arith.cmpf ogt, %101, %102 : vector<8x128xf32>
    %cst_66 = arith.constant 0.000000e+00 : f32
    %104 = vector.broadcast %cst_66 : f32 to vector<8x128xf32>
    %105 = arith.minimumf %101, %104 : vector<8x128xf32>
    %106 = math.exp %105 : vector<8x128xf32>
    %cst_67 = arith.constant 1.000000e+00 : f32
    %107 = vector.broadcast %cst_67 : f32 to vector<8x128xf32>
    %108 = arith.subf %106, %107 : vector<8x128xf32>
    %109 = arith.select %103, %101, %108 : vector<8x128xi1>, vector<8x128xf32>
    %110 = arith.truncf %109 : vector<8x128xf32> to vector<8x128xbf16>
    %c0_68 = arith.constant 0 : index
    %c0_69 = arith.constant 0 : index
    %111 = vector.load %arg12[%c0_68, %c0_69] : memref<128x1152xbf16, #tpu.memory_space<vmem>>, vector<128x384xbf16>
    %cst_70 = arith.constant dense<0.000000e+00> : vector<8x384xf32>
    %112 = tpu.matmul %110, %111, %cst_70 {dimension_numbers = #tpu.dot_dimension_numbers<[1], [0], [0], [1], [0, 0, 1, 1], [], []>} : vector<8x128xbf16>, vector<128x384xbf16>, vector<8x384xf32> -> vector<8x384xf32>
    %113 = vector.extract_strided_slice %112 {offsets = [0, 0], sizes = [8, 128], strides = [1, 1]} : vector<8x384xf32> to vector<8x128xf32>
    %114 = arith.truncf %113 : vector<8x128xf32> to vector<8x128xbf16>
    %c0_71 = arith.constant 0 : index
    %c0_72 = arith.constant 0 : index
    %115 = vector.load %arg28[%c0_71, %c0_72] : memref<1152x128xbf16, #tpu.memory_space<vmem>>, vector<8x128xbf16>
    tpu.vector_store %arg28[%c0_71, %c0_72], %114 {strides = array<i32>} : memref<1152x128xbf16, #tpu.memory_space<vmem>>, vector<8x128xbf16>,
    %116 = vector.extract_strided_slice %112 {offsets = [0, 128], sizes = [8, 128], strides = [1, 1]} : vector<8x384xf32> to vector<8x128xf32>
    %117 = arith.truncf %116 : vector<8x128xf32> to vector<8x128xbf16>
    %c8 = arith.constant 8 : index
    %c0_73 = arith.constant 0 : index
    %118 = vector.load %arg28[%c8, %c0_73] : memref<1152x128xbf16, #tpu.memory_space<vmem>>, vector<8x128xbf16>
    tpu.vector_store %arg28[%c8, %c0_73], %117 {strides = array<i32>} : memref<1152x128xbf16, #tpu.memory_space<vmem>>, vector<8x128xbf16>,
    %119 = vector.extract_strided_slice %112 {offsets = [0, 256], sizes = [8, 128], strides = [1, 1]} : vector<8x384xf32> to vector<8x128xf32>
    %120 = arith.truncf %119 : vector<8x128xf32> to vector<8x128xbf16>
    %c16 = arith.constant 16 : index
    %c0_74 = arith.constant 0 : index
    %121 = vector.load %arg28[%c16, %c0_74] : memref<1152x128xbf16, #tpu.memory_space<vmem>>, vector<8x128xbf16>
    tpu.vector_store %arg28[%c16, %c0_74], %120 {strides = array<i32>} : memref<1152x128xbf16, #tpu.memory_space<vmem>>, vector<8x128xbf16>,
    %c0_75 = arith.constant 0 : index
    %c384_76 = arith.constant 384 : index
    %122 = vector.load %arg12[%c0_75, %c384_76] : memref<128x1152xbf16, #tpu.memory_space<vmem>>, vector<128x384xbf16>
    %cst_77 = arith.constant dense<0.000000e+00> : vector<8x384xf32>
    %123 = tpu.matmul %110, %122, %cst_77 {dimension_numbers = #tpu.dot_dimension_numbers<[1], [0], [0], [1], [0, 0, 1, 1], [], []>} : vector<8x128xbf16>, vector<128x384xbf16>, vector<8x384xf32> -> vector<8x384xf32>
    %124 = vector.extract_strided_slice %123 {offsets = [0, 0], sizes = [8, 128], strides = [1, 1]} : vector<8x384xf32> to vector<8x128xf32>
    %125 = arith.truncf %124 : vector<8x128xf32> to vector<8x128xbf16>
    %c24 = arith.constant 24 : index
    %c0_78 = arith.constant 0 : index
    %126 = vector.load %arg28[%c24, %c0_78] : memref<1152x128xbf16, #tpu.memory_space<vmem>>, vector<8x128xbf16>
    tpu.vector_store %arg28[%c24, %c0_78], %125 {strides = array<i32>} : memref<1152x128xbf16, #tpu.memory_space<vmem>>, vector<8x128xbf16>,
    %127 = vector.extract_strided_slice %123 {offsets = [0, 128], sizes = [8, 128], strides = [1, 1]} : vector<8x384xf32> to vector<8x128xf32>
    %128 = arith.truncf %127 : vector<8x128xf32> to vector<8x128xbf16>
    %c32_79 = arith.constant 32 : index
    %c0_80 = arith.constant 0 : index
    %129 = vector.load %arg28[%c32_79, %c0_80] : memref<1152x128xbf16, #tpu.memory_space<vmem>>, vector<8x128xbf16>
    tpu.vector_store %arg28[%c32_79, %c0_80], %128 {strides = array<i32>} : memref<1152x128xbf16, #tpu.memory_space<vmem>>, vector<8x128xbf16>,
    %130 = vector.extract_strided_slice %123 {offsets = [0, 256], sizes = [8, 128], strides = [1, 1]} : vector<8x384xf32> to vector<8x128xf32>
    %131 = arith.truncf %130 : vector<8x128xf32> to vector<8x128xbf16>
    %c40 = arith.constant 40 : index
    %c0_81 = arith.constant 0 : index
    %132 = vector.load %arg28[%c40, %c0_81] : memref<1152x128xbf16, #tpu.memory_space<vmem>>, vector<8x128xbf16>
    tpu.vector_store %arg28[%c40, %c0_81], %131 {strides = array<i32>} : memref<1152x128xbf16, #tpu.memory_space<vmem>>, vector<8x128xbf16>,
    %c0_82 = arith.constant 0 : index
    %c768_83 = arith.constant 768 : index
    %133 = vector.load %arg12[%c0_82, %c768_83] : memref<128x1152xbf16, #tpu.memory_space<vmem>>, vector<128x384xbf16>
    %cst_84 = arith.constant dense<0.000000e+00> : vector<8x384xf32>
    %134 = tpu.matmul %110, %133, %cst_84 {dimension_numbers = #tpu.dot_dimension_numbers<[1], [0], [0], [1], [0, 0, 1, 1], [], []>} : vector<8x128xbf16>, vector<128x384xbf16>, vector<8x384xf32> -> vector<8x384xf32>
    %135 = vector.extract_strided_slice %134 {offsets = [0, 0], sizes = [8, 128], strides = [1, 1]} : vector<8x384xf32> to vector<8x128xf32>
    %136 = arith.truncf %135 : vector<8x128xf32> to vector<8x128xbf16>
    %c48 = arith.constant 48 : index
    %c0_85 = arith.constant 0 : index
    %137 = vector.load %arg28[%c48, %c0_85] : memref<1152x128xbf16, #tpu.memory_space<vmem>>, vector<8x128xbf16>
    tpu.vector_store %arg28[%c48, %c0_85], %136 {strides = array<i32>} : memref<1152x128xbf16, #tpu.memory_space<vmem>>, vector<8x128xbf16>,
    %138 = vector.extract_strided_slice %134 {offsets = [0, 128], sizes = [8, 128], strides = [1, 1]} : vector<8x384xf32> to vector<8x128xf32>
    %139 = arith.truncf %138 : vector<8x128xf32> to vector<8x128xbf16>
    %c56 = arith.constant 56 : index
    %c0_86 = arith.constant 0 : index
    %140 = vector.load %arg28[%c56, %c0_86] : memref<1152x128xbf16, #tpu.memory_space<vmem>>, vector<8x128xbf16>
    tpu.vector_store %arg28[%c56, %c0_86], %139 {strides = array<i32>} : memref<1152x128xbf16, #tpu.memory_space<vmem>>, vector<8x128xbf16>,
    %141 = vector.extract_strided_slice %134 {offsets = [0, 256], sizes = [8, 128], strides = [1, 1]} : vector<8x384xf32> to vector<8x128xf32>
    %142 = arith.truncf %141 : vector<8x128xf32> to vector<8x128xbf16>
    %c64_87 = arith.constant 64 : index
    %c0_88 = arith.constant 0 : index
    %143 = vector.load %arg28[%c64_87, %c0_88] : memref<1152x128xbf16, #tpu.memory_space<vmem>>, vector<8x128xbf16>
    tpu.vector_store %arg28[%c64_87, %c0_88], %142 {strides = array<i32>} : memref<1152x128xbf16, #tpu.memory_space<vmem>>, vector<8x128xbf16>,
    %c0_89 = arith.constant 0 : index
    %c0_90 = arith.constant 0 : index
    %144 = vector.load %arg3[%c0_89, %c0_90] : memref<2x72xbf16, #tpu.memory_space<vmem>>, vector<2x72xbf16>
    %c0_91 = arith.constant 0 : index
    %c0_92 = arith.constant 0 : index
    %145 = vector.load %arg28[%c0_91, %c0_92] : memref<1152x128xbf16, #tpu.memory_space<vmem>>, vector<72x128xbf16>
    %cst_93 = arith.constant dense<0.000000e+00> : vector<2x128xf32>
    %146 = tpu.matmul %144, %145, %cst_93 {dimension_numbers = #tpu.dot_dimension_numbers<[1], [0], [0], [1], [0, 0, 1, 1], [], []>} : vector<2x72xbf16>, vector<72x128xbf16>, vector<2x128xf32> -> vector<2x128xf32>
    %c0_94 = arith.constant 0 : index
    %c0_95 = arith.constant 0 : index
    %147 = vector.load %arg13[%c0_94, %c0_95] : memref<1x128xf32, #tpu.memory_space<vmem>>, vector<1x128xf32>
    %148 = vector.broadcast %147 : vector<1x128xf32> to vector<2x128xf32>
    %149 = arith.addf %146, %148 : vector<2x128xf32>
    %150 = arith.truncf %149 : vector<2x128xf32> to vector<2x128xbf16>
    %c0_96 = arith.constant 0 : index
    %c0_97 = arith.constant 0 : index
    %151 = vector.load %arg14[%c0_96, %c0_97] : memref<128x576xbf16, #tpu.memory_space<vmem>>, vector<128x576xbf16>
    %cst_98 = arith.constant dense<0.000000e+00> : vector<2x576xf32>
    %152 = tpu.matmul %150, %151, %cst_98 {dimension_numbers = #tpu.dot_dimension_numbers<[1], [0], [0], [1], [0, 0, 1, 1], [], []>} : vector<2x128xbf16>, vector<128x576xbf16>, vector<2x576xf32> -> vector<2x576xf32>
    %c0_99 = arith.constant 0 : index
    %c0_100 = arith.constant 0 : index
    %153 = vector.load %arg15[%c0_99, %c0_100] : memref<1x576xf32, #tpu.memory_space<vmem>>, vector<1x576xf32>
    %154 = vector.broadcast %153 : vector<1x576xf32> to vector<2x576xf32>
    %155 = arith.addf %152, %154 : vector<2x576xf32>
    %156 = vector.extract_strided_slice %155 {offsets = [0, 0], sizes = [2, 288], strides = [1, 1]} : vector<2x576xf32> to vector<2x288xf32>
    %c0_101 = arith.constant 0 : index
    %c0_102 = arith.constant 0 : index
    %157 = vector.load %arg25[%c0_101, %c0_102] : memref<2x288xf32, #tpu.memory_space<vmem>>, vector<2x288xf32>
    tpu.vector_store %arg25[%c0_101, %c0_102], %156 {strides = array<i32>} : memref<2x288xf32, #tpu.memory_space<vmem>>, vector<2x288xf32>,
    %158 = arith.truncf %155 : vector<2x576xf32> to vector<2x576xbf16>
    %c0_103 = arith.constant 0 : index
    %c0_104 = arith.constant 0 : index
    %159 = vector.load %arg16[%c0_103, %c0_104] : memref<576x256xbf16, #tpu.memory_space<vmem>>, vector<576x256xbf16>
    %cst_105 = arith.constant dense<0.000000e+00> : vector<2x256xf32>
    %160 = tpu.matmul %158, %159, %cst_105 {dimension_numbers = #tpu.dot_dimension_numbers<[1], [0], [0], [1], [0, 0, 1, 1], [], []>} : vector<2x576xbf16>, vector<576x256xbf16>, vector<2x256xf32> -> vector<2x256xf32>
    %c0_106 = arith.constant 0 : index
    %c0_107 = arith.constant 0 : index
    %161 = vector.load %arg17[%c0_106, %c0_107] : memref<1x256xf32, #tpu.memory_space<vmem>>, vector<1x256xf32>
    %162 = vector.broadcast %161 : vector<1x256xf32> to vector<2x256xf32>
    %163 = arith.addf %160, %162 : vector<2x256xf32>
    %164 = arith.truncf %163 : vector<2x256xf32> to vector<2x256xbf16>
    %c0_108 = arith.constant 0 : index
    %c0_109 = arith.constant 0 : index
    %165 = vector.load %arg18[%c0_108, %c0_109] : memref<256x2xbf16, #tpu.memory_space<vmem>>, vector<256x2xbf16>
    %cst_110 = arith.constant dense<0.000000e+00> : vector<2x2xf32>
    %166 = tpu.matmul %164, %165, %cst_110 {dimension_numbers = #tpu.dot_dimension_numbers<[1], [0], [0], [1], [0, 0, 1, 1], [], []>} : vector<2x256xbf16>, vector<256x2xbf16>, vector<2x2xf32> -> vector<2x2xf32>
    %c0_111 = arith.constant 0 : index
    %c0_112 = arith.constant 0 : index
    %167 = vector.load %arg19[%c0_111, %c0_112] : memref<1x2xf32, #tpu.memory_space<vmem>>, vector<1x2xf32>
    %168 = vector.broadcast %167 : vector<1x2xf32> to vector<2x2xf32>
    %169 = arith.addf %166, %168 : vector<2x2xf32>
    %c0_113 = arith.constant 0 : index
    %c0_114 = arith.constant 0 : index
    %170 = vector.load %arg26[%c0_113, %c0_114] : memref<2x2xf32, #tpu.memory_space<vmem>>, vector<2x2xf32>
    tpu.vector_store %arg26[%c0_113, %c0_114], %169 {strides = array<i32>} : memref<2x2xf32, #tpu.memory_space<vmem>>, vector<2x2xf32>,
    %c0_115 = arith.constant 0 : index
    %c0_116 = arith.constant 0 : index
    %171 = vector.load %arg20[%c0_115, %c0_116] : memref<576x256xbf16, #tpu.memory_space<vmem>>, vector<576x256xbf16>
    %cst_117 = arith.constant dense<0.000000e+00> : vector<2x256xf32>
    %172 = tpu.matmul %158, %171, %cst_117 {dimension_numbers = #tpu.dot_dimension_numbers<[1], [0], [0], [1], [0, 0, 1, 1], [], []>} : vector<2x576xbf16>, vector<576x256xbf16>, vector<2x256xf32> -> vector<2x256xf32>
    %c0_118 = arith.constant 0 : index
    %c0_119 = arith.constant 0 : index
    %173 = vector.load %arg5[%c0_118, %c0_119] : memref<2x1xf32, #tpu.memory_space<vmem>>, vector<2x1xf32>
    %c0_120 = arith.constant 0 : index
    %c0_121 = arith.constant 0 : index
    %174 = vector.load %arg21[%c0_120, %c0_121] : memref<1x256xf32, #tpu.memory_space<vmem>>, vector<1x256xf32>
    %175 = vector.broadcast %173 : vector<2x1xf32> to vector<2x256xf32>
    %176 = vector.broadcast %174 : vector<1x256xf32> to vector<2x256xf32>
    %177 = arith.mulf %175, %176 : vector<2x256xf32>
    %178 = arith.addf %172, %177 : vector<2x256xf32>
    %c0_122 = arith.constant 0 : index
    %c0_123 = arith.constant 0 : index
    %179 = vector.load %arg22[%c0_122, %c0_123] : memref<1x256xf32, #tpu.memory_space<vmem>>, vector<1x256xf32>
    %180 = vector.broadcast %179 : vector<1x256xf32> to vector<2x256xf32>
    %181 = arith.addf %178, %180 : vector<2x256xf32>
    %cst_124 = arith.constant 0.000000e+00 : f32
    %182 = vector.broadcast %cst_124 : f32 to vector<2x256xf32>
    %183 = arith.cmpf ogt, %181, %182 : vector<2x256xf32>
    %cst_125 = arith.constant 0.000000e+00 : f32
    %184 = vector.broadcast %cst_125 : f32 to vector<2x256xf32>
    %185 = arith.minimumf %181, %184 : vector<2x256xf32>
    %186 = math.exp %185 : vector<2x256xf32>
    %cst_126 = arith.constant 1.000000e+00 : f32
    %187 = vector.broadcast %cst_126 : f32 to vector<2x256xf32>
    %188 = arith.subf %186, %187 : vector<2x256xf32>
    %189 = arith.select %183, %181, %188 : vector<2x256xi1>, vector<2x256xf32>
    %190 = arith.truncf %189 : vector<2x256xf32> to vector<2x256xbf16>
    %c0_127 = arith.constant 0 : index
    %c0_128 = arith.constant 0 : index
    %191 = vector.load %arg23[%c0_127, %c0_128] : memref<256x288xbf16, #tpu.memory_space<vmem>>, vector<256x288xbf16>
    %cst_129 = arith.constant dense<0.000000e+00> : vector<2x288xf32>
    %192 = tpu.matmul %190, %191, %cst_129 {dimension_numbers = #tpu.dot_dimension_numbers<[1], [0], [0], [1], [0, 0, 1, 1], [], []>} : vector<2x256xbf16>, vector<256x288xbf16>, vector<2x288xf32> -> vector<2x288xf32>
    %c0_130 = arith.constant 0 : index
    %c0_131 = arith.constant 0 : index
    %193 = vector.load %arg24[%c0_130, %c0_131] : memref<1x288xf32, #tpu.memory_space<vmem>>, vector<1x288xf32>
    %194 = vector.broadcast %193 : vector<1x288xf32> to vector<2x288xf32>
    %195 = arith.addf %192, %194 : vector<2x288xf32>
    %c0_132 = arith.constant 0 : index
    %c0_133 = arith.constant 0 : index
    %196 = vector.load %arg27[%c0_132, %c0_133] : memref<2x288xf32, #tpu.memory_space<vmem>>, vector<2x288xf32>
    tpu.vector_store %arg27[%c0_132, %c0_133], %195 {strides = array<i32>} : memref<2x288xf32, #tpu.memory_space<vmem>>, vector<2x288xf32>,
    return
  }
}

</mosaic_0001>

<bundles_post_ra>
// kernel: icm_forward.1
= control target key start
LH: loop header
LB: loop body
LE: loop exit
PB: predicated region body
PF: predicated region fallthrough
CT: control target
= control target key end

     0   :  { %s12684_s0 = inlined_call_operand.vmem [shape: bf16[128,72], index: 0, kind: input, shape index: {}]   ;;  %s12685_s1 = inlined_call_operand.vmem [shape: bf16[32,1152], index: 1, kind: input, shape index: {}]   ;;  %s12686_s2 = inlined_call_operand.vmem [shape: bf16[8,288], index: 2, kind: input, shape index: {}]   ;;  %s12687_s3 = inlined_call_operand.vmem [shape: bf16[2,72], index: 3, kind: input, shape index: {}]   ;;  %s12688_s4 = inlined_call_operand.vmem [shape: bf16[1,2,2], index: 4, kind: input, shape index: {}]   ;;  %s12689_s5 = inlined_call_operand.vmem [shape: f32[2,1], index: 5, kind: input, shape index: {}]   ;;  %s12690_s6 = inlined_call_operand.vmem [shape: bf16[72,128], index: 6, kind: input, shape index: {}]   ;;  %s12691_s7 = inlined_call_operand.vmem [shape: f32[1,128], index: 7, kind: input, shape index: {}]   ;;  %s12692_s8 = inlined_call_operand.vmem [shape: bf16[128,1152], index: 8, kind: input, shape index: {}]   ;;  %s12693_s9 = inlined_call_operand.vmem [shape: f32[1,128], index: 9, kind: input, shape index: {}]   ;;  %s12694_s10 = inlined_call_operand.vmem [shape: bf16[128,1152], index: 10, kind: input, shape index: {}]   ;;  %s12695_s11 = inlined_call_operand.vmem [shape: f32[1,128], index: 11, kind: input, shape index: {}]   ;;  %s12696_s12 = inlined_call_operand.vmem [shape: bf16[128,1152], index: 12, kind: input, shape index: {}]   ;;  %s12697_s13 = inlined_call_operand.vmem [shape: f32[1,128], index: 13, kind: input, shape index: {}]   ;;  %s12698_s14 = inlined_call_operand.vmem [shape: bf16[128,576], index: 14, kind: input, shape index: {}]   ;;  %s12699_s15 = inlined_call_operand.vmem [shape: f32[1,576], index: 15, kind: input, shape index: {}]   ;;  %s12700_s16 = inlined_call_operand.vmem [shape: bf16[576,256], index: 16, kind: input, shape index: {}]   ;;  %s12701_s17 = inlined_call_operand.vmem [shape: f32[1,256], index: 17, kind: input, shape index: {}]   ;;  %s12702_s18 = inlined_call_operand.vmem [shape: bf16[256,2], index: 18, kind: input, shape index: {}]   ;;  %s12703_s19 = inlined_call_operand.vmem [shape: f32[1,2], index: 19, kind: input, shape index: {}]   ;;  %s12704_s20 = inlined_call_operand.vmem [shape: bf16[576,256], index: 20, kind: input, shape index: {}]   ;;  %s12705_s21 = inlined_call_operand.vmem [shape: f32[1,256], index: 21, kind: input, shape index: {}]   ;;  %s12706_s22 = inlined_call_operand.vmem [shape: f32[1,256], index: 22, kind: input, shape index: {}]   ;;  %s12707_s23 = inlined_call_operand.vmem [shape: bf16[256,288], index: 23, kind: input, shape index: {}]   ;;  %s12708_s24 = inlined_call_operand.vmem [shape: f32[1,288], index: 24, kind: input, shape index: {}]   ;;  %s12709_s25 = inlined_call_operand.hbm [shape: f32[2,288], index: 25, kind: output, shape index: {0}]   ;;  %s12710_s26 = inlined_call_operand.hbm [shape: f32[2,2], index: 26, kind: output, shape index: {1}]   ;;  %s12711_s27 = inlined_call_operand.hbm [shape: f32[2,288], index: 27, kind: output, shape index: {2}]  }
   0x1   :  { %12718 = sst [smem:[#allocation11_spill]] %s12684_s0 }
   0x2   :  { %12719 = sst [smem:[#allocation12_spill]] %s12685_s1 }
   0x3   :  { %12720 = sst [smem:[#allocation13_spill]] %s12686_s2 }
   0x4   :  { %12721 = sst [smem:[#allocation14_spill]] %s12687_s3 }
   0x5   :  { %12722 = sst [smem:[#allocation15_spill]] %s12689_s5 }
   0x6   :  { %12723 = sst [smem:[#allocation16_spill]] %s12690_s6 }
   0x7   :  { %12724 = sst [smem:[#allocation17_spill]] %s12691_s7 }
   0x8   :  { %12725 = sst [smem:[#allocation18_spill]] %s12692_s8 }
   0x9   :  { %12726 = sst [smem:[#allocation19_spill]] %s12693_s9 }
   0xa   :  { %12727 = sst [smem:[#allocation20_spill]] %s12694_s10 }
   0xb   :  { %12728 = sst [smem:[#allocation21_spill]] %s12695_s11 }
   0xc   :  { %33 = vsyncpa [#allocation5], 0  ;;  %s12729_s8 = sld [smem:[#allocation16_spill]]  ;;  %vm210_vm0 = vcmask 1043456   ;;  %vm185_vm1 = vcmask 588800   ;;  %v10604_v38 = vmov 0  }
   0xd   :  { %s12730_s29 = sld [smem:[#allocation11_spill]]  ;;  %607 = vmatprep.mubr.bf16.mxu1 %v10604_v38  ;;  %9716 = vset.pattern.permute.xlu0 %v10604_v38 }
   0xe   :  { %s12731_s4 = sld [smem:[#allocation18_spill]] }
   0xf   :  { %s12732_s2 = sld [smem:[#allocation17_spill]] }
  0x12   :  { %v9717_v0 = vld [vmem:[%s12729_s8 + $0x20] ss:$0 sps:$4 sm:$0xff]   ;;  %v9718_v1 = vld [vmem:[%s12729_s8 + $0x18] sm:$0xff]   ;;  %v9719_v3 = vld [vmem:[%s12729_s8 + $0x10] sm:$0xff]  }
  0x13   :  { %9708 = vmatprep.subr.msk.bf16.mxu0 %vm210_vm0, %v9717_v0  ;;  %v212_v2 = vsel %vm210_vm0, %v9717_v0, 0  ;;  %v9722_v4 = vld [vmem:[%s12730_s29] sm:$0xff]   ;;  %v9720_v5 = vld [vmem:[%s12729_s8 + $0x8] sm:$0xff]   ;;  %v9724_v9 = vld [vmem:[%s12730_s29 + $0x10] sm:$0xff]  }
  0x14   :  { %9405 = vmatpush3.bf16.msra.mxu0 %v212_v2  ;;  %9414 = vmatprep.mubr.msk.bf16.mxu0 %vm185_vm1, %v9722_v4  ;;  %v9721_v6 = vld [vmem:[%s12729_s8] sm:$0xff]   ;;  %v9723_v8 = vld [vmem:[%s12730_s29 + $0x8] sm:$0xff]   ;;  %v9725_v10 = vld [vmem:[%s12730_s29 + $0x18] sm:$0xff]  }
  0x15   :  { %9406 = vmatprep.subr.bf16.mxu0 %v9718_v1  ;;  %v9730_v7 = vld [vmem:[%s12731_s4 + $0x1fc] ss:$36 sps:$4 sm:$0xff]   ;;  %v9727_v12 = vld [vmem:[%s12730_s29 + $0x28] sm:$0xff]   ;;  %v9728_v13 = vld [vmem:[%s12730_s29 + $0x30] sm:$0xff]  }
  0x16   :  { %575 = vmatprep.subr.bf16.mxu1 %v9730_v7  ;;  %v9726_v11 = vld [vmem:[%s12730_s29 + $0x20] sm:$0xff]   ;;  %v9729_v14 = vld [vmem:[%s12730_s29 + $0x38] sm:$0xff]   ;;  %v9736_v18 = vld [vmem:[%s12731_s4 + $0x1b0] ss:$36 sps:$4 sm:$0xff]  }
  0x17   :  { %v9732_v15 = vld [vmem:[%s12731_s4 + $0x1f8] ss:$36 sps:$4 sm:$0xff]   ;;  %v9733_v16 = vld [vmem:[%s12731_s4 + $0x200] ss:$36 sps:$4 sm:$0xff]   ;;  %v9738_v20 = vld [vmem:[%s12731_s4 + $0x16c] ss:$36 sps:$4 sm:$0xff]  }
  0x18   :  { %9407 = vmatpush3.bf16.msra.mxu0 %v9718_v1  ;;  %576 = vmatpush1.bf16.msra.mxu1 %v9732_v15  ;;  %v9734_v17 = vld [vmem:[%s12731_s4 + $0x1b4] ss:$36 sps:$4 sm:$0xff]   ;;  %v9740_v21 = vld [vmem:[%s12731_s4 + $0x168] ss:$36 sps:$4 sm:$0xff]   ;;  %v9744_v24 = vld [vmem:[%s12731_s4 + $0x120] ss:$36 sps:$4 sm:$0xff]  }
  0x19   :  { %9408 = vmatprep.subr.bf16.mxu0 %v9719_v3  ;;  %v9737_v19 = vld [vmem:[%s12731_s4 + $0x1b8] ss:$36 sps:$4 sm:$0xff]   ;;  %577 = vmatprep.subr.bf16.mxu1 %v9734_v17  ;;  %v9741_v22 = vld [vmem:[%s12731_s4 + $0x170] ss:$36 sps:$4 sm:$0xff]   ;;  %v9742_v23 = vld [vmem:[%s12731_s4 + $0x124] ss:$36 sps:$4 sm:$0xff]  }
  0x1a   :  { %v9745_v25 = vld [vmem:[%s12731_s4 + $0x128] ss:$36 sps:$4 sm:$0xff]   ;;  %v9746_v26 = vld [vmem:[%s12731_s4 + $0xdc] ss:$36 sps:$4 sm:$0xff]   ;;  %v9750_v29 = vld [vmem:[%s12731_s4 + $0x94] ss:$36 sps:$4 sm:$0xff]  }
  0x1b   :  { %v9748_v27 = vld [vmem:[%s12731_s4 + $0xd8] ss:$36 sps:$4 sm:$0xff]   ;;  %v9749_v28 = vld [vmem:[%s12731_s4 + $0xe0] ss:$36 sps:$4 sm:$0xff]   ;;  %v9752_v30 = vld [vmem:[%s12731_s4 + $0x90] ss:$36 sps:$4 sm:$0xff]  }
  0x1c   :  { %9409 = vmatpush3.bf16.msra.mxu0 %v9719_v3  ;;  %578 = vmatpush1.bf16.msra.mxu1 %v9736_v18  ;;  %v9753_v31 = vld [vmem:[%s12731_s4 + $0x98] ss:$36 sps:$4 sm:$0xff]   ;;  %v9754_v32 = vld [vmem:[%s12731_s4 + $0x4c] ss:$36 sps:$4 sm:$0xff]   ;;  %v9758_v35 = vld [vmem:[%s12731_s4 + $0x4] ss:$36 sps:$4 sm:$0xff]  }
  0x1d   :  { %9410 = vmatprep.subr.bf16.mxu0 %v9720_v5  ;;  %579 = vmatprep.subr.bf16.mxu1 %v9738_v20  ;;  %v9756_v33 = vld [vmem:[%s12731_s4 + $0x48] ss:$36 sps:$4 sm:$0xff]   ;;  %v9757_v34 = vld [vmem:[%s12731_s4 + $0x50] ss:$36 sps:$4 sm:$0xff]   ;;  %v9760_v36 = vld [vmem:[%s12731_s4] ss:$36 sps:$4 sm:$0xff]  }
  0x1e   :  { %v9761_v37 = vld [vmem:[%s12731_s4 + $0x8] ss:$36 sps:$4 sm:$0xff]   ;;  %v10886_v41 = vld [vmem:[%s12732_s2] ss:$0 sm:$0xff] }
  0x1f   :  { %v9765_v39 = vld [vmem:[%s12731_s4 + $0x208] ss:$36 sps:$4 sm:$0xff]  }
  0x20   :  { %9411 = vmatpush3.bf16.msra.mxu0 %v9720_v5  ;;  %580 = vmatpush1.bf16.msra.mxu1 %v9740_v21  ;;  %v10880_v40 = vld [vmem:[%s12731_s4 + $0x20c] ss:$36 sps:$4 sm:$0xff]  }
  0x21   :  { %9412 = vmatprep.subr.bf16.mxu0 %v9721_v6  ;;  %581 = vmatprep.subr.bf16.mxu1 %v9742_v23 }
  0x24   :  { %9413 = vmatpush3.bf16.msra.mxu0 %v9721_v6  ;;  %582 = vmatpush1.bf16.msra.mxu1 %v9744_v24 }
  0x25   :  { %9430 = vmatprep.subr.bf16.mxu0 %v9733_v16  ;;  %583 = vmatprep.subr.bf16.mxu1 %v9746_v26 }
  0x27   :  { %9415 = vmatmul.mubr.msk.bf16.vlgmr.msra.gmra.mxu0 %vm185_vm1, %v9723_v8 }
  0x28   :  { %9418 = vmatprep.mubr.msk.bf16.mxu0 %vm185_vm1, %v9724_v9  ;;  %9431 = vmatpush3.bf16.msra.mxu0 %v9733_v16 }
  0x29   :  { %9432 = vmatprep.subr.bf16.mxu0 %v9737_v19  ;;  %584 = vmatpush1.bf16.msra.mxu1 %v9748_v27 }
  0x2a   :  { %585 = vmatprep.subr.bf16.mxu1 %v9750_v29 }
  0x2c   :  { %9433 = vmatpush3.bf16.msra.mxu0 %v9737_v19 }
  0x2d   :  { %9434 = vmatprep.subr.bf16.mxu0 %v9741_v22  ;;  %586 = vmatpush1.bf16.msra.mxu1 %v9752_v30 }
  0x2e   :  { %587 = vmatprep.subr.bf16.mxu1 %v9754_v32 }
  0x2f   :  { %9419 = vmatmul.mubr.msk.bf16.gmra.mxu0 %vm185_vm1, %v9725_v10 }
  0x30   :  { %9422 = vmatprep.mubr.msk.bf16.mxu0 %vm185_vm1, %v9726_v11  ;;  %9435 = vmatpush3.bf16.msra.mxu0 %v9741_v22 }
  0x31   :  { %9436 = vmatprep.subr.bf16.mxu0 %v9745_v25  ;;  %588 = vmatpush1.bf16.msra.mxu1 %v9756_v33 }
  0x32   :  { %589 = vmatprep.subr.bf16.mxu1 %v9758_v35 }
  0x34   :  { %9437 = vmatpush3.bf16.msra.mxu0 %v9745_v25 }
  0x35   :  { %9438 = vmatprep.subr.bf16.mxu0 %v9749_v28  ;;  %590 = vmatpush1.bf16.msra.mxu1 %v9760_v36 }
  0x36   :  { %9462 = vmatprep.subr.bf16.mxu1 %v10880_v40 }
  0x37   :  { %9423 = vmatmul.mubr.msk.bf16.gmra.mxu0 %vm185_vm1, %v9727_v12 }
  0x38   :  { %9426 = vmatprep.mubr.msk.bf16.mxu0 %vm185_vm1, %v9728_v13  ;;  %9439 = vmatpush3.bf16.msra.mxu0 %v9749_v28 }
  0x39   :  { %9440 = vmatprep.subr.bf16.mxu0 %v9753_v31 }
  0x3c   :  { %9441 = vmatpush3.bf16.msra.mxu0 %v9753_v31 }
  0x3d   :  { %9442 = vmatprep.subr.bf16.mxu0 %v9757_v34 }
  0x3f   :  { %9427 = vmatmul.mubr.msk.bf16.gmra.mxu0 %vm185_vm1, %v9729_v14 }
  0x40   :  { %9443 = vmatpush3.bf16.msra.mxu0 %v9757_v34 }
  0x41   :  { %9444 = vmatprep.subr.bf16.mxu0 %v9761_v37 }
  0x44   :  { %9445 = vmatpush3.bf16.msra.mxu0 %v9761_v37 }
  0x45   :  { %1185 = vmatprep.subr.bf16.mxu0 %v9765_v39 }
  0xe7   :  { %v9416_v42 = vpop.f32.mrf.mxu0 }
  0xe8   :  { %v10889_v43 = vadd.f32 %v9416_v42, %v10886_v41 }
  0xe9   :  { %v248_v44 = vpop.f32.mrf.mxu0 }
  0xea   :  { %v329_v45 = vmin.f32 %v10889_v43, 0.0  ;;  %v10893_v46 = vadd.f32 %v10886_v41, %v248_v44  ;;  %vm313_vm2 = vcmp.gt.f32.partialorder %v10889_v43, 0.0 }
  0xeb   :  { %v9417_v47 = vpop.f32.mrf.mxu0 }
  0xec   :  { %v347_v48 = vmul.f32 1.442695, %v329_v45  ;;  %v327_v49 = vmin.f32 %v10893_v46, 0.0  ;;  %v10897_v50 = vadd.f32 %v9417_v47, %v10886_v41  ;;  %vm311_vm3 = vcmp.gt.f32.partialorder %v10893_v46, 0.0 }
  0xed   :  { %v251_v51 = vpop.f32.mrf.mxu0 }
  0xee   :  { %v343_v52 = vmul.f32 1.442695, %v327_v49  ;;  %v330_v53 = vmin.f32 %v10897_v50, 0.0  ;;  %v10901_v54 = vadd.f32 %v10886_v41, %v251_v51  ;;  %10494 = vpow2.f32 %v347_v48 }
  0xef   :  { %v9420_v55 = vpop.f32.mrf.mxu0  ;;  %vm314_vm4 = vcmp.gt.f32.partialorder %v10897_v50, 0.0 }
  0xf0   :  { %v349_v56 = vmul.f32 1.442695, %v330_v53  ;;  %v10904_v57 = vadd.f32 %v9420_v55, %v10886_v41  ;;  %10496 = vpow2.f32 %v343_v52  ;;  %v328_v58 = vmin.f32 %v10901_v54, 0.0 }
  0xf1   :  { %v264_v59 = vpop.f32.mrf.mxu0 }
  0xf2   :  { %10498 = vpow2.f32 %v349_v56  ;;  %v333_v60 = vmin.f32 %v10904_v57, 0.0  ;;  %v10909_v61 = vadd.f32 %v10886_v41, %v264_v59  ;;  %v345_v62 = vmul.f32 1.442695, %v328_v58 }
  0xf3   :  { %v9421_v63 = vpop.f32.mrf.mxu0 }
  0xf4   :  { %v355_v0 = vmul.f32 1.442695, %v333_v60  ;;  %v331_v1 = vmin.f32 %v10909_v61, 0.0  ;;  %v10913_v2 = vadd.f32 %v9421_v63, %v10886_v41  ;;  %10500 = vpow2.f32 %v345_v62 }
  0xf5   :  { %v267_v3 = vpop.f32.mrf.mxu0 }
  0xf6   :  { %v351_v4 = vmul.f32 1.442695, %v331_v1  ;;  %v334_v5 = vmin.f32 %v10913_v2, 0.0  ;;  %v10917_v6 = vadd.f32 %v10886_v41, %v267_v3  ;;  %10502 = vpow2.f32 %v355_v0 }
  0xf7   :  { %v9424_v7 = vpop.f32.mrf.mxu0 }
  0xf8   :  { %v357_v8 = vmul.f32 1.442695, %v334_v5  ;;  %v10920_v9 = vadd.f32 %v9424_v7, %v10886_v41  ;;  %10504 = vpow2.f32 %v351_v4  ;;  %v332_v10 = vmin.f32 %v10917_v6, 0.0 }
  0xf9   :  { %v280_v11 = vpop.f32.mrf.mxu0 }
  0xfa   :  { %10506 = vpow2.f32 %v357_v8  ;;  %v337_v12 = vmin.f32 %v10920_v9, 0.0  ;;  %v10925_v13 = vadd.f32 %v10886_v41, %v280_v11  ;;  %v353_v14 = vmul.f32 1.442695, %v332_v10 }
  0xfb   :  { %v9425_v15 = vpop.f32.mrf.mxu0  ;;  %v10495_v18 = vpop.eup %10494 }
  0xfc   :  { %v363_v16 = vmul.f32 1.442695, %v337_v12  ;;  %v335_v17 = vmin.f32 %v10925_v13, 0.0  ;;  %10508 = vpow2.f32 %v353_v14  ;;  %v10929_v19 = vadd.f32 %v9425_v15, %v10886_v41 }
  0xfd   :  { %v283_v20 = vpop.f32.mrf.mxu0  ;;  %v10497_v21 = vpop.eup %10496  ;;  %v7556_v34 = vadd.f32 -1.0, %v10495_v18 }
  0xfe   :  { %v359_v22 = vmul.f32 1.442695, %v335_v17  ;;  %v338_v24 = vmin.f32 %v10929_v19, 0.0  ;;  %v10935_v25 = vadd.f32 %v10886_v41, %v283_v20  ;;  %v7554_v29 = vadd.f32 -1.0, %v10497_v21 }
  0xff   :  { %v10499_v23 = vpop.eup %10498  ;;  %v9428_v26 = vpop.f32.mrf.mxu0 }
 0x100   :  { %v7557_v27 = vadd.f32 -1.0, %v10499_v23  ;;  %v10938_v28 = vadd.f32 %v9428_v26, %v10886_v41  ;;  %10510 = vpow2.f32 %v359_v22  ;;  %v365_v30 = vmul.f32 1.442695, %v338_v24 }
 0x101   :  { %v336_v31 = vmin.f32 %v10935_v25, 0.0  ;;  %v296_v32 = vpop.f32.mrf.mxu0  ;;  %v10501_v33 = vpop.eup %10500  ;;  %10512 = vpow2.f32 %v363_v16 }
 0x102   :  { %v341_v35 = vmin.f32 %v10938_v28, 0.0  ;;  %v10943_v36 = vadd.f32 %v10886_v41, %v296_v32  ;;  %v7555_v37 = vadd.f32 -1.0, %v10501_v33  ;;  %10514 = vpow2.f32 %v365_v30 }
 0x103   :  { %v361_v39 = vmul.f32 1.442695, %v336_v31  ;;  %v9429_v42 = vpop.f32.mrf.mxu0 }
 0x104   :  { %34 = vsyncpa [#allocation7], 0  ;;  %v394_v44 = vsel %vm314_vm4, %v10897_v50, %v7557_v27  ;;  %vm312_vm5 = vcmp.gt.f32.partialorder %v10901_v54, 0.0  ;;  %v371_v45 = vmul.f32 1.442695, %v341_v35  ;;  %v339_v47 = vmin.f32 %v10943_v36, 0.0  ;;  %v10503_v48 = vpop.eup %10502 }
 0x105   :  { %v391_v49 = vsel %vm311_vm3, %v10893_v46, %v7554_v29  ;;  %v392_v51 = vsel %vm312_vm5, %v10901_v54, %v7555_v37  ;;  %10516 = vpow2.f32 %v361_v39  ;;  %v10954_v52 = vadd.f32 %v9429_v42, %v10886_v41  ;;  %v299_v53 = vpop.f32.mrf.mxu0  ;;  %v10505_v55 = vpop.eup %10504  ;;  %v9763_v58 = vld [vmem:[%s12731_s4 + $0x204] ss:$36 sps:$4 sm:$0xff]   ;;  %v9766_v7 = vld [vmem:[%s12731_s4 + $0x1bc] ss:$36 sps:$4 sm:$0xff]   ;;  %v9773_v27 = vld [vmem:[%s12731_s4 + $0x12c] ss:$36 sps:$4 sm:$0xff]  }
 0x106   :  { %v393_v50 = vsel %vm313_vm2, %v10889_v43, %v7556_v34  ;;  %v10959_v56 = vpack.c.bf16 %v392_v51, %v391_v49  ;;  %v9768_v46 = vld [vmem:[%s12731_s4 + $0x1c0] ss:$36 sps:$4 sm:$0xff]   ;;  %v367_v60 = vmul.f32 1.442695, %v339_v47  ;;  %v10971_v63 = vadd.f32 %v10886_v41, %v299_v53  ;;  %v9772_v11 = vld [vmem:[%s12731_s4 + $0x178] ss:$36 sps:$4 sm:$0xff]  }
 0x107   :  { %v10507_v54 = vpop.eup %10506  ;;  %v10967_v59 = vpack.c.bf16 %v394_v44, %v393_v50  ;;  %v342_v62 = vmin.f32 %v10954_v52, 0.0  ;;  %v9769_v43 = vld [vmem:[%s12731_s4 + $0x1c4] ss:$36 sps:$4 sm:$0xff]   ;;  %10518 = vpow2.f32 %v371_v45  ;;  %v7558_v1 = vadd.f32 -1.0, %v10505_v55  ;;  %v9776_v8 = vld [vmem:[%s12731_s4 + $0x17c] ss:$36 sps:$4 sm:$0xff]  }
 0x108   :  { %v7561_v0 = vadd.f32 -1.0, %v10507_v54  ;;  %608 = vmatmul.mubr.bf16.vlgmr.msra.gmra.mxu1 %v10959_v56  ;;  %9446 = vmatprep.mubr.bf16.mxu0 %v10959_v56  ;;  %10520 = vpow2.f32 %v367_v60  ;;  %v340_v4 = vmin.f32 %v10971_v63, 0.0  ;;  %v7560_v5 = vadd.f32 -1.0, %v10503_v48  ;;  %v9779_v30 = vld [vmem:[%s12731_s4 + $0xe8] ss:$36 sps:$4 sm:$0xff]   ;;  %s12733_s1 = sld [smem:[#allocation12_spill]] }
 0x109   :  { %v373_v3 = vmul.f32 1.442695, %v342_v62  ;;  %9463 = vmatpush3.bf16.msra.mxu1 %v10880_v40  ;;  %9447 = vmatmul.mubr.bf16.vlgmr.msra.gmra.mxu0 %v10967_v59  ;;  %v10509_v41 = vpop.eup %10508  ;;  %vm318_vm6 = vcmp.gt.f32.partialorder %v10913_v2, 0.0  ;;  %vm315_vm7 = vcmp.gt.f32.partialorder %v10909_v61, 0.0  ;;  %vm316_vm8 = vcmp.gt.f32.partialorder %v10917_v6, 0.0  ;;  %s12734_s5 = sld [smem:[#allocation20_spill]] }
 0x10a   :  { %1186 = vmatpush1.bf16.msra.mxu0 %v9763_v58  ;;  %617 = vmatprep.mubr.bf16.mxu1 %v10604_v38  ;;  %v7559_v10 = vadd.f32 -1.0, %v10509_v41  ;;  %v369_v40 = vmul.f32 1.442695, %v340_v4  ;;  %v398_v12 = vsel %vm318_vm6, %v10913_v2, %v7561_v0  ;;  %vm317_vm9 = vcmp.gt.f32.partialorder %v10904_v57, 0.0  ;;  %v9770_v2 = vld [vmem:[%s12731_s4 + $0x174] ss:$36 sps:$4 sm:$0xff]  }
 0x10b   :  { %10522 = vpow2.f32 %v373_v3  ;;  %1187 = vmatprep.subr.bf16.mxu0 %v9768_v46  ;;  %9464 = vmatprep.subr.bf16.mxu1 %v9769_v43  ;;  %v395_v14 = vsel %vm315_vm7, %v10909_v61, %v7558_v1  ;;  %v397_v17 = vsel %vm317_vm9, %v10904_v57, %v7560_v5  ;;  %v9775_v61 = vld [vmem:[%s12731_s4 + $0x130] ss:$36 sps:$4 sm:$0xff]   ;;  %vm322_vm10 = vcmp.gt.f32.partialorder %v10929_v19, 0.0  ;;  %v9777_v44 = vld [vmem:[%s12731_s4 + $0xe4] ss:$36 sps:$4 sm:$0xff]   ;;  %s12735_s3 = sld [smem:[#allocation19_spill]] }
 0x10c   :  { %v396_v15 = vsel %vm316_vm8, %v10917_v6, %v7559_v10  ;;  %10524 = vpow2.f32 %v369_v40  ;;  %v11004_v21 = vpack.c.bf16 %v398_v12, %v397_v17  ;;  %v9783_v57 = vld [vmem:[%s12731_s4 + $0x134] ss:$36 sps:$4 sm:$0xff]   ;;  %v9790_v31 = vld [vmem:[%s12731_s4 + $0xec] ss:$36 sps:$4 sm:$0xff]   ;;  %vm319_vm11 = vcmp.gt.f32.partialorder %v10925_v13, 0.0  ;;  %s12736_s29 = sld [smem:[#allocation13_spill]] }
 0x10d   :  { %9465 = vmatpush3.bf16.msra.mxu1 %v9769_v43  ;;  %v10511_v16 = vpop.eup %10510  ;;  %v10999_v18 = vpack.c.bf16 %v396_v15, %v395_v14  ;;  %vm320_vm12 = vcmp.gt.f32.partialorder %v10935_v25, 0.0  ;;  %vm321_vm13 = vcmp.gt.f32.partialorder %v10920_v9, 0.0  ;;  %vm325_vm14 = vcmp.gt.f32.partialorder %v10938_v28, 0.0  ;;  %v9780_v51 = vld [vmem:[%s12731_s4 + $0x9c] ss:$36 sps:$4 sm:$0xff]   ;;  %s12737_s0 = sld [smem:[#allocation21_spill]] }
 0x10e   :  { %1188 = vmatpush1.bf16.msra.mxu0 %v9766_v7  ;;  %9466 = vmatprep.subr.bf16.mxu1 %v9776_v8  ;;  %v10513_v20 = vpop.eup %10512  ;;  %v7562_v22 = vadd.f32 -1.0, %v10511_v16  ;;  %vm326_vm15 = vcmp.gt.f32.partialorder %v10954_v52, 0.0  ;;  %vm323_vm2 = vcmp.gt.f32.partialorder %v10943_v36, 0.0  ;;  %vm324_vm3 = vcmp.gt.f32.partialorder %v10971_v63, 0.0  ;;  %v9786_v55 = vld [vmem:[%s12731_s4 + $0x58] ss:$36 sps:$4 sm:$0xff]  }
 0x10f   :  { %1189 = vmatprep.subr.bf16.mxu0 %v9772_v11  ;;  %v10515_v6 = vpop.eup %10514  ;;  %9450 = vmatprep.mubr.bf16.mxu0 %v10999_v18  ;;  %v7564_v26 = vadd.f32 -1.0, %v10513_v20  ;;  %v9792_v50 = vld [vmem:[%s12731_s4 + $0x5c] ss:$36 sps:$4 sm:$0xff]   ;;  %v9784_v43 = vld [vmem:[%s12731_s4 + $0x54] ss:$36 sps:$4 sm:$0xff]   ;;  %vm10606_vm8 = vmmov 0  }
 0x110   :  { %618 = vmatmul.mubr.bf16.gmra.mxu1 %v10967_v59  ;;  %v7565_v23 = vadd.f32 -1.0, %v10515_v6  ;;  %v399_v34 = vsel %vm319_vm11, %v10925_v13, %v7562_v22  ;;  %v9782_v13 = vld [vmem:[%s12731_s4 + $0xa0] ss:$36 sps:$4 sm:$0xff]   ;;  %v9796_v1 = vld [vmem:[%s12731_s4 + $0x214] ss:$36 sps:$4 sm:$0xff]   ;;  %vm4340_vm9 = vcmask 261120  }
 0x111   :  { %9451 = vmatmul.mubr.bf16.gmra.mxu0 %v11004_v21  ;;  %627 = vmatprep.mubr.bf16.mxu1 %v10604_v38  ;;  %v401_v39 = vsel %vm321_vm13, %v10920_v9, %v7564_v26  ;;  %v9791_v9 = vld [vmem:[%s12731_s4 + $0xa4] ss:$36 sps:$4 sm:$0xff]   ;;  %v9801_v3 = vld [vmem:[%s12731_s4 + $0x1d0] ss:$36 sps:$4 sm:$0xff]   ;;  %v9813_v5 = vld [vmem:[%s12731_s4 + $0xf8] ss:$36 sps:$4 sm:$0xff]  }
 0x112   :  { %v10517_v24 = vpop.eup %10516  ;;  %1190 = vmatpush1.bf16.msra.mxu0 %v9770_v2  ;;  %9467 = vmatpush3.bf16.msra.mxu1 %v9776_v8  ;;  %v402_v32 = vsel %vm322_vm10, %v10929_v19, %v7565_v23  ;;  %v9805_v4 = vld [vmem:[%s12731_s4 + $0x188] ss:$36 sps:$4 sm:$0xff]   ;;  %v9809_v41 = vld [vmem:[%s12731_s4 + $0x140] ss:$36 sps:$4 sm:$0xff]   ;;  %v9817_v7 = vld [vmem:[%s12731_s4 + $0xb0] ss:$36 sps:$4 sm:$0xff]  }
 0x113   :  { %v7563_v29 = vadd.f32 -1.0, %v10517_v24  ;;  %1191 = vmatprep.subr.bf16.mxu0 %v9775_v61  ;;  %9468 = vmatprep.subr.bf16.mxu1 %v9783_v57  ;;  %v11038_v19 = vpack.c.bf16 %v402_v32, %v401_v39  ;;  %v9821_v8 = vld [vmem:[%s12731_s4 + $0x68] ss:$36 sps:$4 sm:$0xff]   ;;  %v9825_v10 = vld [vmem:[%s12731_s4 + $0x20] ss:$36 sps:$4 sm:$0xff]  }
 0x114   :  { %v10519_v33 = vpop.eup %10518  ;;  %v9794_v40 = vld [vmem:[%s12731_s4 + $0x210] ss:$36 sps:$4 sm:$0xff]   ;;  %v9798_v12 = vld [vmem:[%s12731_s4 + $0x1c8] ss:$36 sps:$4 sm:$0xff]   ;;  %v9802_v15 = vld [vmem:[%s12731_s4 + $0x180] ss:$36 sps:$4 sm:$0xff]  }
 0x115   :  { %v400_v35 = vsel %vm320_vm12, %v10935_v25, %v7563_v29  ;;  %v10521_v37 = vpop.eup %10520  ;;  %v7568_v45 = vadd.f32 -1.0, %v10519_v33  ;;  %v9800_v11 = vld [vmem:[%s12731_s4 + $0x1cc] ss:$36 sps:$4 sm:$0xff]   ;;  %v9804_v14 = vld [vmem:[%s12731_s4 + $0x184] ss:$36 sps:$4 sm:$0xff]   ;;  %vm5691_vm12 = vcmask 259076  }
 0x116   :  { %v11033_v42 = vpack.c.bf16 %v400_v35, %v399_v34  ;;  %1192 = vmatpush1.bf16.msra.mxu0 %v9773_v27  ;;  %9469 = vmatpush3.bf16.msra.mxu1 %v9783_v57  ;;  %v7566_v47 = vadd.f32 -1.0, %v10521_v37  ;;  %v9808_v16 = vld [vmem:[%s12731_s4 + $0x13c] ss:$36 sps:$4 sm:$0xff]   ;;  %v9812_v2 = vld [vmem:[%s12731_s4 + $0xf4] ss:$36 sps:$4 sm:$0xff]  }
 0x117   :  { %1193 = vmatprep.subr.bf16.mxu0 %v9779_v30  ;;  %9470 = vmatprep.subr.bf16.mxu1 %v9790_v31  ;;  %v405_v58 = vsel %vm325_vm14, %v10938_v28, %v7568_v45  ;;  %v9789_v28 = vld [vmem:[%s12731_s4 + $0x10] ss:$36 sps:$4 sm:$0xff]   ;;  %v9806_v17 = vld [vmem:[%s12731_s4 + $0x138] ss:$36 sps:$4 sm:$0xff]   ;;  %v9814_v57 = vld [vmem:[%s12731_s4 + $0xa8] ss:$36 sps:$4 sm:$0xff]  }
 0x118   :  { %v10523_v25 = vpop.eup %10522  ;;  %628 = vmatmul.mubr.bf16.gmra.mxu1 %v10999_v18  ;;  %9454 = vmatprep.mubr.bf16.mxu0 %v11033_v42  ;;  %v403_v54 = vsel %vm323_vm2, %v10943_v36, %v7566_v47  ;;  %v9793_v36 = vld [vmem:[%s12731_s4 + $0x14] ss:$36 sps:$4 sm:$0xff]   ;;  %v9816_v61 = vld [vmem:[%s12731_s4 + $0xac] ss:$36 sps:$4 sm:$0xff]   ;;  %v9820_v6 = vld [vmem:[%s12731_s4 + $0x64] ss:$36 sps:$4 sm:$0xff]  }
 0x119   :  { %v7569_v48 = vadd.f32 -1.0, %v10523_v25  ;;  %9455 = vmatmul.mubr.bf16.gmra.mxu0 %v11038_v19  ;;  %637 = vmatprep.mubr.bf16.mxu1 %v10604_v38  ;;  %v10525_v49 = vpop.eup %10524  ;;  %v9810_v20 = vld [vmem:[%s12731_s4 + $0xf0] ss:$36 sps:$4 sm:$0xff]   ;;  %v9818_v22 = vld [vmem:[%s12731_s4 + $0x60] ss:$36 sps:$4 sm:$0xff]   ;;  %vm6143_vm14 = vcmask 523264  }
 0x11a   :  { %1194 = vmatpush1.bf16.msra.mxu0 %v9777_v44  ;;  %9471 = vmatpush3.bf16.msra.mxu1 %v9790_v31  ;;  %v7567_v53 = vadd.f32 -1.0, %v10525_v49  ;;  %v9824_v23 = vld [vmem:[%s12731_s4 + $0x1c] ss:$36 sps:$4 sm:$0xff]  }
 0x11b   :  { %1195 = vmatprep.subr.bf16.mxu0 %v9782_v13  ;;  %9472 = vmatprep.subr.bf16.mxu1 %v9791_v9  ;;  %v406_v46 = vsel %vm326_vm15, %v10954_v52, %v7569_v48  ;;  %v9787_v52 = vld [vmem:[%s12731_s4 + $0xc] ss:$36 sps:$4 sm:$0xff]   ;;  %v9822_v24 = vld [vmem:[%s12731_s4 + $0x18] ss:$36 sps:$4 sm:$0xff]   ;;  %vm6447_vm15 = vcmask 9216  }
 0x11c   :  { %v404_v60 = vsel %vm324_vm3, %v10971_v63, %v7567_v53  ;;  %v11076_v0 = vpack.c.bf16 %v406_v46, %v405_v58  ;;  %v9797_v63 = vld [vmem:[%s12731_s4 + $0x218] ss:$36 sps:$4 sm:$0xff]  }
 0x11d   :  { %v11071_v62 = vpack.c.bf16 %v404_v60, %v403_v54 }
 0x11e   :  { %1196 = vmatpush1.bf16.msra.mxu0 %v9780_v51  ;;  %9473 = vmatpush3.bf16.msra.mxu1 %v9791_v9 }
 0x11f   :  { %1197 = vmatprep.subr.bf16.mxu0 %v9786_v55  ;;  %9474 = vmatprep.subr.bf16.mxu1 %v9792_v50 }
 0x120   :  { %638 = vmatmul.mubr.bf16.gmra.mxu1 %v11004_v21  ;;  %9458 = vmatprep.mubr.bf16.mxu0 %v11071_v62 }
 0x121   :  { %9459 = vmatmul.mubr.bf16.gmra.mxu0 %v11076_v0  ;;  %647 = vmatprep.mubr.bf16.mxu1 %v10604_v38 }
 0x122   :  { %1198 = vmatpush1.bf16.msra.mxu0 %v9784_v43  ;;  %1217 = vmatprep.mubr.bf16.mxu0 %v10604_v38 }
 0x123   :  { %1199 = vmatprep.subr.bf16.mxu0 %v9789_v28  ;;  %9475 = vmatpush3.bf16.msra.mxu1 %v9792_v50 }
 0x124   :  { %9476 = vmatprep.subr.bf16.mxu1 %v9793_v36 }
 0x126   :  { %1200 = vmatpush1.bf16.msra.mxu0 %v9787_v52 }
 0x127   :  { %9477 = vmatpush3.bf16.msra.mxu1 %v9793_v36  ;;  %9494 = vmatprep.subr.bf16.mxu0 %v9797_v63 }
 0x128   :  { %648 = vmatmul.mubr.bf16.gmra.mxu1 %v11033_v42  ;;  %1795 = vmatprep.subr.bf16.mxu1 %v9796_v1 }
 0x129   :  { %1218 = vmatmul.mubr.bf16.vlgmr.msra.gmra.mxu0 %v10959_v56  ;;  %657 = vmatprep.mubr.bf16.mxu1 %v10604_v38 }
 0x12a   :  { %1227 = vmatprep.mubr.bf16.mxu0 %v10604_v38  ;;  %9495 = vmatpush3.bf16.msra.mxu0 %v9797_v63 }
 0x12b   :  { %9496 = vmatprep.subr.bf16.mxu0 %v9801_v3 }
 0x12e   :  { %9497 = vmatpush3.bf16.msra.mxu0 %v9801_v3 }
 0x12f   :  { %9498 = vmatprep.subr.bf16.mxu0 %v9805_v4 }
 0x130   :  { %658 = vmatmul.mubr.bf16.gmra.mxu1 %v11038_v19 }
 0x131   :  { %1228 = vmatmul.mubr.bf16.gmra.mxu0 %v10967_v59  ;;  %667 = vmatprep.mubr.bf16.mxu1 %v10604_v38 }
 0x132   :  { %1237 = vmatprep.mubr.bf16.mxu0 %v10604_v38  ;;  %9499 = vmatpush3.bf16.msra.mxu0 %v9805_v4 }
 0x133   :  { %9500 = vmatprep.subr.bf16.mxu0 %v9809_v41 }
 0x136   :  { %9501 = vmatpush3.bf16.msra.mxu0 %v9809_v41 }
 0x137   :  { %9502 = vmatprep.subr.bf16.mxu0 %v9813_v5 }
 0x138   :  { %668 = vmatmul.mubr.bf16.gmra.mxu1 %v11071_v62 }
 0x139   :  { %1238 = vmatmul.mubr.bf16.gmra.mxu0 %v10999_v18  ;;  %677 = vmatprep.mubr.bf16.mxu1 %v10604_v38 }
 0x13a   :  { %1247 = vmatprep.mubr.bf16.mxu0 %v10604_v38  ;;  %9503 = vmatpush3.bf16.msra.mxu0 %v9813_v5 }
 0x13b   :  { %9504 = vmatprep.subr.bf16.mxu0 %v9817_v7 }
 0x13e   :  { %9505 = vmatpush3.bf16.msra.mxu0 %v9817_v7 }
 0x13f   :  { %9506 = vmatprep.subr.bf16.mxu0 %v9821_v8 }
 0x140   :  { %678 = vmatmul.mubr.bf16.gmra.mxu1 %v11076_v0 }
 0x141   :  { %1248 = vmatmul.mubr.bf16.gmra.mxu0 %v11004_v21  ;;  %9478 = vmatprep.mubr.bf16.mxu1 %v10959_v56 }
 0x142   :  { %1257 = vmatprep.mubr.bf16.mxu0 %v10604_v38  ;;  %9507 = vmatpush3.bf16.msra.mxu0 %v9821_v8 }
 0x143   :  { %9508 = vmatprep.subr.bf16.mxu0 %v9825_v10 }
 0x146   :  { %9509 = vmatpush3.bf16.msra.mxu0 %v9825_v10 }
 0x148   :  { %9479 = vmatmul.mubr.bf16.vlgmr.msra.gmra.mxu1 %v10967_v59 }
 0x149   :  { %1796 = vmatpush1.bf16.msra.mxu1 %v9794_v40  ;;  %1258 = vmatmul.mubr.bf16.gmra.mxu0 %v11033_v42 }
 0x14a   :  { %9482 = vmatprep.mubr.bf16.mxu1 %v10999_v18  ;;  %1797 = vmatprep.subr.bf16.mxu1 %v9800_v11 }
 0x14b   :  { %1267 = vmatprep.mubr.bf16.mxu0 %v10604_v38 }
 0x14d   :  { %1798 = vmatpush1.bf16.msra.mxu1 %v9798_v12 }
 0x14e   :  { %1799 = vmatprep.subr.bf16.mxu1 %v9804_v14 }
 0x150   :  { %9483 = vmatmul.mubr.bf16.gmra.mxu1 %v11004_v21 }
 0x151   :  { %1800 = vmatpush1.bf16.msra.mxu1 %v9802_v15  ;;  %1268 = vmatmul.mubr.bf16.gmra.mxu0 %v11038_v19 }
 0x152   :  { %9486 = vmatprep.mubr.bf16.mxu1 %v11033_v42  ;;  %1801 = vmatprep.subr.bf16.mxu1 %v9808_v16 }
 0x153   :  { %1277 = vmatprep.mubr.bf16.mxu0 %v10604_v38 }
 0x155   :  { %1802 = vmatpush1.bf16.msra.mxu1 %v9806_v17 }
 0x156   :  { %1803 = vmatprep.subr.bf16.mxu1 %v9812_v2 }
 0x158   :  { %9487 = vmatmul.mubr.bf16.gmra.mxu1 %v11038_v19 }
 0x159   :  { %1804 = vmatpush1.bf16.msra.mxu1 %v9810_v20  ;;  %1278 = vmatmul.mubr.bf16.gmra.mxu0 %v11071_v62 }
 0x15a   :  { %9490 = vmatprep.mubr.bf16.mxu1 %v11071_v62  ;;  %1805 = vmatprep.subr.bf16.mxu1 %v9816_v61 }
 0x15b   :  { %1287 = vmatprep.mubr.bf16.mxu0 %v10604_v38 }
 0x15d   :  { %1806 = vmatpush1.bf16.msra.mxu1 %v9814_v57 }
 0x15e   :  { %1807 = vmatprep.subr.bf16.mxu1 %v9820_v6 }
 0x160   :  { %9491 = vmatmul.mubr.bf16.gmra.mxu1 %v11076_v0 }
 0x161   :  { %1808 = vmatpush1.bf16.msra.mxu1 %v9818_v22  ;;  %1288 = vmatmul.mubr.bf16.gmra.mxu0 %v11076_v0 }
 0x162   :  { %9510 = vmatprep.mubr.bf16.mxu0 %v10959_v56  ;;  %1809 = vmatprep.subr.bf16.mxu1 %v9824_v23 }
 0x163   :  { %1827 = vmatprep.mubr.bf16.mxu1 %v10604_v38 }
 0x165   :  { %1810 = vmatpush1.bf16.msra.mxu1 %v9822_v24 }
 0x168   :  { %1828 = vmatmul.mubr.bf16.vlgmr.msra.gmra.mxu1 %v10959_v56  ;;  %v9846_v56 = vld [vmem:[%s12733_s1 + $0x4] ss:$36 sps:$4 sm:$0xff]  }
 0x169   :  { %9511 = vmatmul.mubr.bf16.vlgmr.msra.gmra.mxu0 %v10967_v59  ;;  %1837 = vmatprep.mubr.bf16.mxu1 %v10604_v38 }
 0x16a   :  { %9514 = vmatprep.mubr.bf16.mxu0 %v10999_v18 }
 0x170   :  { %1838 = vmatmul.mubr.bf16.gmra.mxu1 %v10967_v59 }
 0x171   :  { %9515 = vmatmul.mubr.bf16.gmra.mxu0 %v11004_v21  ;;  %1847 = vmatprep.mubr.bf16.mxu1 %v10604_v38 }
 0x172   :  { %9518 = vmatprep.mubr.bf16.mxu0 %v11033_v42 }
 0x178   :  { %1848 = vmatmul.mubr.bf16.gmra.mxu1 %v10999_v18 }
 0x179   :  { %9519 = vmatmul.mubr.bf16.gmra.mxu0 %v11038_v19  ;;  %1857 = vmatprep.mubr.bf16.mxu1 %v10604_v38 }
 0x17a   :  { %9522 = vmatprep.mubr.bf16.mxu0 %v11071_v62 }
 0x180   :  { %1858 = vmatmul.mubr.bf16.gmra.mxu1 %v11004_v21 }
 0x181   :  { %9523 = vmatmul.mubr.bf16.gmra.mxu0 %v11076_v0  ;;  %1867 = vmatprep.mubr.bf16.mxu1 %v10604_v38 }
 0x182   :  { %2972 = vmatprep.mubr.bf16.mxu0 %v9846_v56 }
 0x188   :  { %1868 = vmatmul.mubr.bf16.gmra.mxu1 %v11033_v42  ;;  %v9883_v42 = vld [vmem:[%s12733_s1 + $0xc] ss:$36 sps:$4 sm:$0xff]  }
 0x189   :  { %1877 = vmatprep.mubr.bf16.mxu1 %v10604_v38 }
 0x190   :  { %1878 = vmatmul.mubr.bf16.gmra.mxu1 %v11038_v19 }
 0x191   :  { %1887 = vmatprep.mubr.bf16.mxu1 %v10604_v38 }
 0x198   :  { %1888 = vmatmul.mubr.bf16.gmra.mxu1 %v11071_v62 }
 0x199   :  { %1897 = vmatprep.mubr.bf16.mxu1 %v10604_v38 }
 0x1a0   :  { %1898 = vmatmul.mubr.bf16.gmra.mxu1 %v11076_v0 }
 0x1a1   :  { %3021 = vmatprep.mubr.bf16.mxu1 %v9883_v42 }
 0x1c8   :  { %v609_v59 = vpop.f32.mrf.mxu1 }
 0x1c9   :  { %v9448_v18 = vpop.f32.mrf.mxu0 }
 0x1ca   :  { %v611_v21 = vpop.f32.mrf.mxu1 }
 0x1cb   :  { %v722_v26 = vpop.f32.mrf.mxu0 }
 0x1cc   :  { %v613_v27 = vpop.f32.mrf.mxu1 }
 0x1cd   :  { %v8528_v29 = vpack.c.bf16 %v613_v27, %v609_v59  ;;  %v9449_v30 = vpop.f32.mrf.mxu0 }
 0x1ce   :  { %v8613_v31 = vpack.c.bf16 %v9449_v30, %v9448_v18  ;;  %v615_v32 = vpop.f32.mrf.mxu1 }
 0x1cf   :  { %8529 = vst [vmem:[#allocation2] sm:$0xff] %v8528_v29   ;;  %v8568_v33 = vpack.c.bf16 %v615_v32, %v611_v21  ;;  %v725_v34 = vpop.f32.mrf.mxu0 }
 0x1d0   :  { %9006 = vst [vmem:[#allocation2 + $0x88] sm:$0xff] %v8613_v31   ;;  %v8608_v35 = vpack.c.bf16 %v725_v34, %v722_v26  ;;  %v619_v37 = vpop.f32.mrf.mxu1 }
 0x1d1   :  { %8997 = vst [vmem:[#allocation2 + $0x40] sm:$0xff] %v8568_v33   ;;  %v9452_v39 = vpop.f32.mrf.mxu0 }
 0x1d2   :  { %9005 = vst [vmem:[#allocation2 + $0x80] sm:$0xff] %v8608_v35   ;;  %v621_v44 = vpop.f32.mrf.mxu1 }
 0x1d3   :  { %v738_v19 = vpop.f32.mrf.mxu0 }
 0x1d4   :  { %v623_v13 = vpop.f32.mrf.mxu1 }
 0x1d5   :  { %v8533_v9 = vpack.c.bf16 %v623_v13, %v619_v37  ;;  %v9453_v25 = vpop.f32.mrf.mxu0 }
 0x1d6   :  { %v8623_v45 = vpack.c.bf16 %v9453_v25, %v9452_v39  ;;  %v625_v47 = vpop.f32.mrf.mxu1 }
 0x1d7   :  { %8990 = vst [vmem:[#allocation2 + $0x8] sm:$0xff] %v8533_v9   ;;  %v8573_v48 = vpack.c.bf16 %v625_v47, %v621_v44  ;;  %v741_v49 = vpop.f32.mrf.mxu0 }
 0x1d8   :  { %9008 = vst [vmem:[#allocation2 + $0x98] sm:$0xff] %v8623_v45   ;;  %v8618_v51 = vpack.c.bf16 %v741_v49, %v738_v19  ;;  %v629_v53 = vpop.f32.mrf.mxu1 }
 0x1d9   :  { %8998 = vst [vmem:[#allocation2 + $0x48] sm:$0xff] %v8573_v48   ;;  %v9456_v55 = vpop.f32.mrf.mxu0 }
 0x1da   :  { %9007 = vst [vmem:[#allocation2 + $0x90] sm:$0xff] %v8618_v51   ;;  %v631_v50 = vpop.f32.mrf.mxu1 }
 0x1db   :  { %v754_v58 = vpop.f32.mrf.mxu0 }
 0x1dc   :  { %v633_v46 = vpop.f32.mrf.mxu1 }
 0x1dd   :  { %v8538_v54 = vpack.c.bf16 %v633_v46, %v629_v53  ;;  %v9457_v60 = vpop.f32.mrf.mxu0 }
 0x1de   :  { %v8633_v62 = vpack.c.bf16 %v9457_v60, %v9456_v55  ;;  %v635_v43 = vpop.f32.mrf.mxu1 }
 0x1df   :  { %8991 = vst [vmem:[#allocation2 + $0x10] sm:$0xff] %v8538_v54   ;;  %v8578_v0 = vpack.c.bf16 %v635_v43, %v631_v50  ;;  %v757_v28 = vpop.f32.mrf.mxu0 }
 0x1e0   :  { %9010 = vst [vmem:[#allocation2 + $0xa8] sm:$0xff] %v8633_v62   ;;  %v8628_v36 = vpack.c.bf16 %v757_v28, %v754_v58  ;;  %v639_v52 = vpop.f32.mrf.mxu1 }
 0x1e1   :  { %8999 = vst [vmem:[#allocation2 + $0x50] sm:$0xff] %v8578_v0   ;;  %v9460_v63 = vpop.f32.mrf.mxu0 }
 0x1e2   :  { %9009 = vst [vmem:[#allocation2 + $0xa0] sm:$0xff] %v8628_v36   ;;  %v641_v1 = vpop.f32.mrf.mxu1 }
 0x1e3   :  { %v770_v3 = vpop.f32.mrf.mxu0 }
 0x1e4   :  { %v643_v4 = vpop.f32.mrf.mxu1 }
 0x1e5   :  { %v8543_v41 = vpack.c.bf16 %v643_v4, %v639_v52  ;;  %v9461_v5 = vpop.f32.mrf.mxu0 }
 0x1e6   :  { %v8643_v7 = vpack.c.bf16 %v9461_v5, %v9460_v63  ;;  %v645_v8 = vpop.f32.mrf.mxu1 }
 0x1e7   :  { %8992 = vst [vmem:[#allocation2 + $0x18] sm:$0xff] %v8543_v41   ;;  %v8583_v10 = vpack.c.bf16 %v645_v8, %v641_v1  ;;  %v773_v40 = vpop.f32.mrf.mxu0 }
 0x1e8   :  { %9012 = vst [vmem:[#allocation2 + $0xb8] sm:$0xff] %v8643_v7   ;;  %v8638_v11 = vpack.c.bf16 %v773_v40, %v770_v3  ;;  %v649_v12 = vpop.f32.mrf.mxu1 }
 0x1e9   :  { %9000 = vst [vmem:[#allocation2 + $0x58] sm:$0xff] %v8583_v10   ;;  %v1219_v14 = vpop.f32.mrf.mxu0 }
 0x1ea   :  { %9011 = vst [vmem:[#allocation2 + $0xb0] sm:$0xff] %v8638_v11   ;;  %v651_v15 = vpop.f32.mrf.mxu1 }
 0x1eb   :  { %v1221_v16 = vpop.f32.mrf.mxu0 }
 0x1ec   :  { %v653_v17 = vpop.f32.mrf.mxu1 }
 0x1ed   :  { %v8548_v2 = vpack.c.bf16 %v653_v17, %v649_v12  ;;  %v1223_v20 = vpop.f32.mrf.mxu0 }
 0x1ee   :  { %v8648_v61 = vpack.c.bf16 %v1223_v20, %v1219_v14  ;;  %v655_v57 = vpop.f32.mrf.mxu1 }
 0x1ef   :  { %8993 = vst [vmem:[#allocation2 + $0x20] sm:$0xff] %v8548_v2   ;;  %v8588_v6 = vpack.c.bf16 %v655_v57, %v651_v15  ;;  %v1225_v22 = vpop.f32.mrf.mxu0 }
 0x1f0   :  { %9013 = vst [vmem:[#allocation2 + $0xc0] sm:$0xff] %v8648_v61   ;;  %v8688_v23 = vpack.c.bf16 %v1225_v22, %v1221_v16  ;;  %v659_v24 = vpop.f32.mrf.mxu1 }
 0x1f1   :  { %9001 = vst [vmem:[#allocation2 + $0x60] sm:$0xff] %v8588_v6   ;;  %v1229_v56 = vpop.f32.mrf.mxu0 }
 0x1f2   :  { %9021 = vst [vmem:[#allocation2 + $0x100] sm:$0xff] %v8688_v23   ;;  %v661_v59 = vpop.f32.mrf.mxu1 }
 0x1f3   :  { %v1231_v18 = vpop.f32.mrf.mxu0 }
 0x1f4   :  { %v663_v21 = vpop.f32.mrf.mxu1 }
 0x1f5   :  { %v8553_v26 = vpack.c.bf16 %v663_v21, %v659_v24  ;;  %v1233_v27 = vpop.f32.mrf.mxu0 }
 0x1f6   :  { %v8653_v29 = vpack.c.bf16 %v1233_v27, %v1229_v56  ;;  %v665_v30 = vpop.f32.mrf.mxu1 }
 0x1f7   :  { %8994 = vst [vmem:[#allocation2 + $0x28] sm:$0xff] %v8553_v26   ;;  %v8593_v31 = vpack.c.bf16 %v665_v30, %v661_v59  ;;  %v1235_v32 = vpop.f32.mrf.mxu0 }
 0x1f8   :  { %9014 = vst [vmem:[#allocation2 + $0xc8] sm:$0xff] %v8653_v29   ;;  %v8693_v33 = vpack.c.bf16 %v1235_v32, %v1231_v18  ;;  %v669_v34 = vpop.f32.mrf.mxu1  ;;  %v9832_v27 = vld [vmem:[#allocation2 + $0x60] sm:$0xff]  }
 0x1f9   :  { %9002 = vst [vmem:[#allocation2 + $0x68] sm:$0xff] %v8593_v31   ;;  %v1239_v35 = vpop.f32.mrf.mxu0 }
 0x1fa   :  { %9022 = vst [vmem:[#allocation2 + $0x108] sm:$0xff] %v8693_v33   ;;  %v671_v37 = vpop.f32.mrf.mxu1  ;;  %v9833_v33 = vld [vmem:[#allocation2 + $0x20] sm:$0xff]  }
 0x1fb   :  { %v1241_v39 = vpop.f32.mrf.mxu0 }
 0x1fc   :  { %v673_v42 = vpop.f32.mrf.mxu1 }
 0x1fd   :  { %v8558_v44 = vpack.c.bf16 %v673_v42, %v669_v34  ;;  %v1243_v19 = vpop.f32.mrf.mxu0 }
 0x1fe   :  { %v8658_v13 = vpack.c.bf16 %v1243_v19, %v1239_v35  ;;  %v675_v9 = vpop.f32.mrf.mxu1  ;;  %v9831_v21 = vld [vmem:[#allocation2 + $0x28] sm:$0xff]  }
 0x1ff   :  { %8995 = vst [vmem:[#allocation2 + $0x30] sm:$0xff] %v8558_v44   ;;  %v8598_v25 = vpack.c.bf16 %v675_v9, %v671_v37  ;;  %v1245_v45 = vpop.f32.mrf.mxu0  ;;  %v9834_v37 = vld [vmem:[#allocation2 + $0x58] sm:$0xff]  }
 0x200   :  { %9015 = vst [vmem:[#allocation2 + $0xd0] sm:$0xff] %v8658_v13   ;;  %v8698_v47 = vpack.c.bf16 %v1245_v45, %v1241_v39  ;;  %v679_v48 = vpop.f32.mrf.mxu1  ;;  %v9830_v22 = vld [vmem:[#allocation2 + $0x68] sm:$0xff]   ;;  %v9835_v9 = vld [vmem:[#allocation2 + $0x18] sm:$0xff]   ;;  %v9836_v45 = vld [vmem:[#allocation2 + $0x50] sm:$0xff]  }
 0x201   :  { %9003 = vst [vmem:[#allocation2 + $0x70] sm:$0xff] %v8598_v25   ;;  %v1249_v49 = vpop.f32.mrf.mxu0 }
 0x202   :  { %9023 = vst [vmem:[#allocation2 + $0x110] sm:$0xff] %v8698_v47   ;;  %v681_v51 = vpop.f32.mrf.mxu1 }
 0x203   :  { %v1251_v53 = vpop.f32.mrf.mxu0 }
 0x204   :  { %v683_v55 = vpop.f32.mrf.mxu1 }
 0x205   :  { %v8563_v50 = vpack.c.bf16 %v683_v55, %v679_v48  ;;  %v1253_v58 = vpop.f32.mrf.mxu0 }
 0x206   :  { %v8663_v46 = vpack.c.bf16 %v1253_v58, %v1249_v49  ;;  %v685_v54 = vpop.f32.mrf.mxu1  ;;  %v9829_v61 = vld [vmem:[#allocation2 + $0x30] sm:$0xff]   ;;  %v9838_v58 = vld [vmem:[#allocation2 + $0x48] sm:$0xff]  }
 0x207   :  { %8996 = vst [vmem:[#allocation2 + $0x38] sm:$0xff] %v8563_v50   ;;  %v8603_v60 = vpack.c.bf16 %v685_v54, %v681_v51  ;;  %v1255_v62 = vpop.f32.mrf.mxu0 }
 0x208   :  { %9016 = vst [vmem:[#allocation2 + $0xd8] sm:$0xff] %v8663_v46   ;;  %v8703_v43 = vpack.c.bf16 %v1255_v62, %v1251_v53  ;;  %v9480_v0 = vpop.f32.mrf.mxu1  ;;  %v9828_v15 = vld [vmem:[#allocation2 + $0x70] sm:$0xff]  }
 0x209   :  { %9004 = vst [vmem:[#allocation2 + $0x78] sm:$0xff] %v8603_v60   ;;  %v1259_v28 = vpop.f32.mrf.mxu0  ;;  %v9837_v53 = vld [vmem:[#allocation2 + $0x10] sm:$0xff]  }
 0x20a   :  { %9024 = vst [vmem:[#allocation2 + $0x118] sm:$0xff] %v8703_v43   ;;  %v1332_v36 = vpop.f32.mrf.mxu1 }
 0x20b   :  { %v1261_v52 = vpop.f32.mrf.mxu0 }
 0x20c   :  { %v9481_v63 = vpop.f32.mrf.mxu1 }
 0x20d   :  { %v8733_v1 = vpack.c.bf16 %v9481_v63, %v9480_v0  ;;  %v1263_v3 = vpop.f32.mrf.mxu0  ;;  %v9839_v0 = vld [vmem:[#allocation2 + $0x8] sm:$0xff]  }
 0x20e   :  { %v8668_v4 = vpack.c.bf16 %v1263_v3, %v1259_v28  ;;  %v1335_v41 = vpop.f32.mrf.mxu1  ;;  %v9827_v12 = vld [vmem:[#allocation2 + $0x38] sm:$0xff]  }
 0x20f   :  { %9030 = vst [vmem:[#allocation2 + $0x148] sm:$0xff] %v8733_v1   ;;  %v8728_v5 = vpack.c.bf16 %v1335_v41, %v1332_v36  ;;  %v1265_v7 = vpop.f32.mrf.mxu0  ;;  %v9840_v36 = vld [vmem:[#allocation2 + $0x40] sm:$0xff]  }
 0x210   :  { %9017 = vst [vmem:[#allocation2 + $0xe0] sm:$0xff] %v8668_v4   ;;  %v8708_v8 = vpack.c.bf16 %v1265_v7, %v1261_v52  ;;  %v9484_v10 = vpop.f32.mrf.mxu1  ;;  %v9826_v40 = vld [vmem:[#allocation2 + $0x78] sm:$0xff]   ;;  %v9841_v4 = vld [vmem:[#allocation2] sm:$0xff]  }
 0x211   :  { %9029 = vst [vmem:[#allocation2 + $0x140] sm:$0xff] %v8728_v5   ;;  %v1269_v11 = vpop.f32.mrf.mxu0  ;;  %9141 = vmatprep.subr.bf16.mxu0 %v9826_v40  ;;  %v9844_v41 = vld [vmem:[%s12733_s1] ss:$36 sps:$4 sm:$0xff]   ;;  %v9871_v40 = vld [vmem:[%s12733_s1 + $0x4c] ss:$36 sps:$4 sm:$0xff]  }
 0x212   :  { %9025 = vst [vmem:[#allocation2 + $0x120] sm:$0xff] %v8708_v8   ;;  %v1348_v14 = vpop.f32.mrf.mxu1  ;;  %9142 = vmatpush3.bf16.msra.mxu0 %v9827_v12 }
 0x213   :  { %v1271_v16 = vpop.f32.mrf.mxu0  ;;  %9143 = vmatprep.subr.bf16.mxu0 %v9828_v15 }
 0x214   :  { %v9485_v17 = vpop.f32.mrf.mxu1 }
 0x215   :  { %v8743_v2 = vpack.c.bf16 %v9485_v17, %v9484_v10  ;;  %v1273_v20 = vpop.f32.mrf.mxu0  ;;  %v9847_v10 = vld [vmem:[#allocation2 + $0xb8] sm:$0xff]  }
 0x216   :  { %v8673_v57 = vpack.c.bf16 %v1273_v20, %v1269_v11  ;;  %v1351_v6 = vpop.f32.mrf.mxu1  ;;  %9144 = vmatpush3.bf16.msra.mxu0 %v9829_v61 }
 0x217   :  { %9032 = vst [vmem:[#allocation2 + $0x158] sm:$0xff] %v8743_v2   ;;  %v8738_v23 = vpack.c.bf16 %v1351_v6, %v1348_v14  ;;  %v1275_v24 = vpop.f32.mrf.mxu0  ;;  %9145 = vmatprep.subr.bf16.mxu0 %v9830_v22 }
 0x218   :  { %9018 = vst [vmem:[#allocation2 + $0xe8] sm:$0xff] %v8673_v57   ;;  %v8713_v56 = vpack.c.bf16 %v1275_v24, %v1271_v16  ;;  %v9488_v59 = vpop.f32.mrf.mxu1 }
 0x219   :  { %9031 = vst [vmem:[#allocation2 + $0x150] sm:$0xff] %v8738_v23   ;;  %v1279_v18 = vpop.f32.mrf.mxu0  ;;  %v9851_v23 = vld [vmem:[#allocation2 + $0xb0] sm:$0xff]  }
 0x21a   :  { %9026 = vst [vmem:[#allocation2 + $0x128] sm:$0xff] %v8713_v56   ;;  %v1364_v26 = vpop.f32.mrf.mxu1  ;;  %9146 = vmatpush3.bf16.msra.mxu0 %v9831_v21  ;;  %v9874_v21 = vld [vmem:[%s12733_s1 + $0x48] ss:$36 sps:$4 sm:$0xff]  }
 0x21b   :  { %v1281_v29 = vpop.f32.mrf.mxu0  ;;  %9147 = vmatprep.subr.bf16.mxu0 %v9832_v27 }
 0x21c   :  { %v9489_v30 = vpop.f32.mrf.mxu1 }
 0x21d   :  { %v8753_v31 = vpack.c.bf16 %v9489_v30, %v9488_v59  ;;  %v1283_v32 = vpop.f32.mrf.mxu0  ;;  %v9886_v30 = vld [vmem:[%s12733_s1 + $0x14] ss:$36 sps:$4 sm:$0xff]  }
 0x21e   :  { %v8678_v34 = vpack.c.bf16 %v1283_v32, %v1279_v18  ;;  %v1367_v35 = vpop.f32.mrf.mxu1  ;;  %9148 = vmatpush3.bf16.msra.mxu0 %v9833_v33  ;;  %v9855_v33 = vld [vmem:[#allocation2 + $0xa8] sm:$0xff]  }
 0x21f   :  { %9034 = vst [vmem:[#allocation2 + $0x168] sm:$0xff] %v8753_v31   ;;  %v8748_v39 = vpack.c.bf16 %v1367_v35, %v1364_v26  ;;  %v1285_v42 = vpop.f32.mrf.mxu0  ;;  %9149 = vmatprep.subr.bf16.mxu0 %v9834_v37  ;;  %v9852_v59 = vld [vmem:[#allocation2 + $0xe8] sm:$0xff]   ;;  %v9856_v37 = vld [vmem:[#allocation2 + $0xe0] sm:$0xff]  }
 0x220   :  { %9019 = vst [vmem:[#allocation2 + $0xf0] sm:$0xff] %v8678_v34   ;;  %v8718_v44 = vpack.c.bf16 %v1285_v42, %v1281_v29  ;;  %v9492_v19 = vpop.f32.mrf.mxu1 }
 0x221   :  { %9033 = vst [vmem:[#allocation2 + $0x160] sm:$0xff] %v8748_v39   ;;  %v1289_v13 = vpop.f32.mrf.mxu0  ;;  %v9857_v42 = vld [vmem:[#allocation2 + $0x128] sm:$0xff]  }
 0x222   :  { %9027 = vst [vmem:[#allocation2 + $0x130] sm:$0xff] %v8718_v44   ;;  %v1380_v25 = vpop.f32.mrf.mxu1  ;;  %9150 = vmatpush3.bf16.msra.mxu0 %v9835_v9 }
 0x223   :  { %v1291_v47 = vpop.f32.mrf.mxu0  ;;  %9151 = vmatprep.subr.bf16.mxu0 %v9836_v45 }
 0x224   :  { %v9493_v48 = vpop.f32.mrf.mxu1 }
 0x225   :  { %v8763_v49 = vpack.c.bf16 %v9493_v48, %v9492_v19  ;;  %v1293_v51 = vpop.f32.mrf.mxu0  ;;  %v9860_v48 = vld [vmem:[#allocation2 + $0xd8] sm:$0xff]  }
 0x226   :  { %v8683_v55 = vpack.c.bf16 %v1293_v51, %v1289_v13  ;;  %v1383_v50 = vpop.f32.mrf.mxu1  ;;  %9152 = vmatpush3.bf16.msra.mxu0 %v9837_v53  ;;  %v9854_v29 = vld [vmem:[#allocation2 + $0x168] sm:$0xff]  }
 0x227   :  { %9036 = vst [vmem:[#allocation2 + $0x178] sm:$0xff] %v8763_v49   ;;  %v8758_v46 = vpack.c.bf16 %v1383_v50, %v1380_v25  ;;  %v1295_v54 = vpop.f32.mrf.mxu0  ;;  %9153 = vmatprep.subr.bf16.mxu0 %v9838_v58  ;;  %v9848_v17 = vld [vmem:[#allocation2 + $0xf0] sm:$0xff]   ;;  %v9859_v25 = vld [vmem:[#allocation2 + $0xa0] sm:$0xff]  }
 0x228   :  { %9020 = vst [vmem:[#allocation2 + $0xf8] sm:$0xff] %v8683_v55   ;;  %v8723_v60 = vpack.c.bf16 %v1295_v54, %v1291_v47  ;;  %v1829_v62 = vpop.f32.mrf.mxu1  ;;  %v9858_v19 = vld [vmem:[#allocation2 + $0x160] sm:$0xff]   ;;  %v9862_v55 = vld [vmem:[#allocation2 + $0x158] sm:$0xff]  }
 0x229   :  { %9035 = vst [vmem:[#allocation2 + $0x170] sm:$0xff] %v8758_v46   ;;  %v9512_v43 = vpop.f32.mrf.mxu0  ;;  %v9853_v18 = vld [vmem:[#allocation2 + $0x130] sm:$0xff]   ;;  %v9861_v49 = vld [vmem:[#allocation2 + $0x120] sm:$0xff]   ;;  %v9863_v46 = vld [vmem:[#allocation2 + $0x98] sm:$0xff]  }
 0x22a   :  { %9028 = vst [vmem:[#allocation2 + $0x138] sm:$0xff] %v8723_v60   ;;  %v1831_v28 = vpop.f32.mrf.mxu1  ;;  %9154 = vmatpush3.bf16.msra.mxu0 %v9839_v0  ;;  %v9865_v0 = vld [vmem:[#allocation2 + $0x118] sm:$0xff]  }
 0x22b   :  { %v1942_v52 = vpop.f32.mrf.mxu0  ;;  %9155 = vmatprep.subr.bf16.mxu0 %v9840_v36  ;;  %v9866_v36 = vld [vmem:[#allocation2 + $0x150] sm:$0xff]  }
 0x22c   :  { %v1833_v63 = vpop.f32.mrf.mxu1 }
 0x22d   :  { %v8768_v1 = vpack.c.bf16 %v1833_v63, %v1829_v62  ;;  %v9513_v3 = vpop.f32.mrf.mxu0  ;;  %v9864_v62 = vld [vmem:[#allocation2 + $0xd0] sm:$0xff]  }
 0x22e   :  { %v8853_v5 = vpack.c.bf16 %v9513_v3, %v9512_v43  ;;  %v1835_v7 = vpop.f32.mrf.mxu1  ;;  %v9842_v8 = vld [vmem:[#allocation2 + $0x178] sm:$0xff]   ;;  %9156 = vmatpush3.bf16.msra.mxu0 %v9841_v4 }
 0x22f   :  { %9037 = vst [vmem:[#allocation2 + $0x180] sm:$0xff] %v8768_v1   ;;  %v8808_v11 = vpack.c.bf16 %v1835_v7, %v1831_v28  ;;  %v1945_v12 = vpop.f32.mrf.mxu0  ;;  %v9843_v14 = vld [vmem:[#allocation2 + $0xf8] sm:$0xff]   ;;  %9197 = vmatprep.subr.bf16.mxu0 %v9842_v8  ;;  %v9867_v1 = vld [vmem:[#allocation2 + $0x90] sm:$0xff]  }
 0x230   :  { %9054 = vst [vmem:[#allocation2 + $0x208] sm:$0xff] %v8853_v5   ;;  %v8848_v15 = vpack.c.bf16 %v1945_v12, %v1942_v52  ;;  %v1839_v16 = vpop.f32.mrf.mxu1  ;;  %9169 = vmatprep.subr.bf16.mxu1 %v9843_v14  ;;  %v9850_v57 = vld [vmem:[#allocation2 + $0x170] sm:$0xff]   ;;  %v9873_v12 = vld [vmem:[#allocation2 + $0x88] sm:$0xff]  }
 0x231   :  { %9045 = vst [vmem:[#allocation2 + $0x1c0] sm:$0xff] %v8808_v11   ;;  %v9516_v2 = vpop.f32.mrf.mxu0  ;;  %v9849_v20 = vld [vmem:[#allocation2 + $0x138] sm:$0xff]   ;;  %9170 = vmatpush3.bf16.msra.mxu1 %v9847_v10  ;;  %2973 = vmatmul.mubr.bf16.vlgmr.msra.gmra.mxu0 %v9844_v41  ;;  %v9868_v41 = vld [vmem:[#allocation2 + $0xc8] sm:$0xff]   ;;  %v9869_v5 = vld [vmem:[#allocation2 + $0x110] sm:$0xff]  }
 0x232   :  { %9053 = vst [vmem:[#allocation2 + $0x200] sm:$0xff] %v8848_v15   ;;  %v1841_v61 = vpop.f32.mrf.mxu1  ;;  %9171 = vmatprep.subr.bf16.mxu1 %v9848_v17  ;;  %9198 = vmatpush3.bf16.msra.mxu0 %v9849_v20  ;;  %v9870_v10 = vld [vmem:[#allocation2 + $0x148] sm:$0xff]   ;;  %v9877_v20 = vld [vmem:[#allocation2 + $0x140] sm:$0xff]  }
 0x233   :  { %v1958_v6 = vpop.f32.mrf.mxu0  ;;  %9199 = vmatprep.subr.bf16.mxu0 %v9850_v57  ;;  %2980 = vmatprep.mubr.bf16.mxu0 %v9871_v40  ;;  %v9876_v17 = vld [vmem:[#allocation2 + $0x108] sm:$0xff]   ;;  %v9878_v57 = vld [vmem:[#allocation2 + $0x80] sm:$0xff]  }
 0x234   :  { %v1843_v22 = vpop.f32.mrf.mxu1 }
 0x235   :  { %v8773_v24 = vpack.c.bf16 %v1843_v22, %v1839_v16  ;;  %v9517_v56 = vpop.f32.mrf.mxu0  ;;  %9172 = vmatpush3.bf16.msra.mxu1 %v9851_v23  ;;  %v9875_v16 = vld [vmem:[#allocation2 + $0xc0] sm:$0xff]  }
 0x236   :  { %v8863_v26 = vpack.c.bf16 %v9517_v56, %v9516_v2  ;;  %v1845_v27 = vpop.f32.mrf.mxu1  ;;  %9173 = vmatprep.subr.bf16.mxu1 %v9852_v59  ;;  %9200 = vmatpush3.bf16.msra.mxu0 %v9853_v18  ;;  %v9879_v23 = vld [vmem:[#allocation2 + $0x100] sm:$0xff]   ;;  %v9893_v56 = vld [vmem:[%s12733_s1 + $0x54] ss:$36 sps:$4 sm:$0xff]  }
 0x237   :  { %9038 = vst [vmem:[#allocation2 + $0x188] sm:$0xff] %v8773_v24   ;;  %v8813_v31 = vpack.c.bf16 %v1845_v27, %v1841_v61  ;;  %v1961_v32 = vpop.f32.mrf.mxu0  ;;  %9201 = vmatprep.subr.bf16.mxu0 %v9854_v29  ;;  %v9884_v24 = vld [vmem:[%s12733_s1 + $0x10] ss:$36 sps:$4 sm:$0xff]   ;;  %v9896_v18 = vld [vmem:[%s12733_s1 + $0x5c] ss:$36 sps:$4 sm:$0xff]  }
 0x238   :  { %9056 = vst [vmem:[#allocation2 + $0x218] sm:$0xff] %v8863_v26   ;;  %v8858_v34 = vpack.c.bf16 %v1961_v32, %v1958_v6  ;;  %v1849_v35 = vpop.f32.mrf.mxu1  ;;  %v9881_v6 = vld [vmem:[%s12733_s1 + $0x8] ss:$36 sps:$4 sm:$0xff]  }
 0x239   :  { %9046 = vst [vmem:[#allocation2 + $0x1c8] sm:$0xff] %v8813_v31   ;;  %v9520_v39 = vpop.f32.mrf.mxu0  ;;  %9174 = vmatpush3.bf16.msra.mxu1 %v9855_v33  ;;  %2981 = vmatmul.mubr.bf16.gmra.mxu0 %v9874_v21  ;;  %v9895_v33 = vld [vmem:[%s12733_s1 + $0x50] ss:$36 sps:$4 sm:$0xff]  }
 0x23a   :  { %9055 = vst [vmem:[#allocation2 + $0x210] sm:$0xff] %v8858_v34   ;;  %v1851_v44 = vpop.f32.mrf.mxu1  ;;  %9175 = vmatprep.subr.bf16.mxu1 %v9856_v37  ;;  %9202 = vmatpush3.bf16.msra.mxu0 %v9857_v42  ;;  %v9899_v34 = vld [vmem:[%s12733_s1 + $0x58] ss:$36 sps:$4 sm:$0xff]  }
 0x23b   :  { %v1974_v13 = vpop.f32.mrf.mxu0  ;;  %9203 = vmatprep.subr.bf16.mxu0 %v9858_v19  ;;  %3070 = vmatprep.mubr.bf16.mxu0 %v9886_v30 }
 0x23c   :  { %v1853_v9 = vpop.f32.mrf.mxu1 }
 0x23d   :  { %v8778_v45 = vpack.c.bf16 %v1853_v9, %v1849_v35  ;;  %v9521_v47 = vpop.f32.mrf.mxu0  ;;  %9176 = vmatpush3.bf16.msra.mxu1 %v9859_v25  ;;  %v9920_v35 = vld [vmem:[%s12733_s1 + $0x1c] ss:$36 sps:$4 sm:$0xff]  }
 0x23e   :  { %v8873_v51 = vpack.c.bf16 %v9521_v47, %v9520_v39  ;;  %v1855_v53 = vpop.f32.mrf.mxu1  ;;  %9177 = vmatprep.subr.bf16.mxu1 %v9860_v48  ;;  %9204 = vmatpush3.bf16.msra.mxu0 %v9861_v49 }
 0x23f   :  { %9039 = vst [vmem:[#allocation2 + $0x190] sm:$0xff] %v8778_v45   ;;  %v8818_v50 = vpack.c.bf16 %v1855_v53, %v1851_v44  ;;  %v1977_v58 = vpop.f32.mrf.mxu0  ;;  %9205 = vmatprep.subr.bf16.mxu0 %v9862_v55  ;;  %v9916_v44 = vld [vmem:[%s12733_s1 + $0x20] ss:$36 sps:$4 sm:$0xff]   ;;  %v9890_v48 = vld [vmem:[#allocation2 + $0x218] sm:$0xff]  }
 0x240   :  { %9058 = vst [vmem:[#allocation2 + $0x228] sm:$0xff] %v8873_v51   ;;  %v8868_v54 = vpack.c.bf16 %v1977_v58, %v1974_v13  ;;  %v1859_v60 = vpop.f32.mrf.mxu1 }
 0x241   :  { %9047 = vst [vmem:[#allocation2 + $0x1d0] sm:$0xff] %v8818_v50   ;;  %v9524_v43 = vpop.f32.mrf.mxu0  ;;  %9178 = vmatpush3.bf16.msra.mxu1 %v9863_v46  ;;  %v9891_v55 = vld [vmem:[#allocation2 + $0x210] sm:$0xff]  }
 0x242   :  { %9057 = vst [vmem:[#allocation2 + $0x220] sm:$0xff] %v8868_v54   ;;  %v1861_v28 = vpop.f32.mrf.mxu1  ;;  %9179 = vmatprep.subr.bf16.mxu1 %v9864_v62  ;;  %9206 = vmatpush3.bf16.msra.mxu0 %v9865_v0  ;;  %v9892_v54 = vld [vmem:[#allocation2 + $0x208] sm:$0xff]   ;;  %v9898_v62 = vld [vmem:[#allocation2 + $0x200] sm:$0xff]  }
 0x243   :  { %v1990_v52 = vpop.f32.mrf.mxu0  ;;  %9207 = vmatprep.subr.bf16.mxu0 %v9866_v36 }
 0x244   :  { %v1863_v63 = vpop.f32.mrf.mxu1 }
 0x245   :  { %v8783_v3 = vpack.c.bf16 %v1863_v63, %v1859_v60  ;;  %v9525_v4 = vpop.f32.mrf.mxu0  ;;  %9180 = vmatpush3.bf16.msra.mxu1 %v9867_v1 }
 0x246   :  { %v8883_v7 = vpack.c.bf16 %v9525_v4, %v9524_v43  ;;  %v1865_v8 = vpop.f32.mrf.mxu1  ;;  %9181 = vmatprep.subr.bf16.mxu1 %v9868_v41  ;;  %9208 = vmatpush3.bf16.msra.mxu0 %v9869_v5  ;;  %v9917_v43 = vld [vmem:[%s12733_s1 + $0x68] ss:$36 sps:$4 sm:$0xff]  }
 0x247   :  { %9040 = vst [vmem:[#allocation2 + $0x198] sm:$0xff] %v8783_v3   ;;  %v8823_v40 = vpack.c.bf16 %v1865_v8, %v1861_v28  ;;  %v1993_v11 = vpop.f32.mrf.mxu0  ;;  %9209 = vmatprep.subr.bf16.mxu0 %v9870_v10  ;;  %v9888_v39 = vld [vmem:[#allocation2 + $0x228] sm:$0xff]   ;;  %v9911_v8 = vld [vmem:[#allocation2 + $0x190] sm:$0xff]  }
 0x248   :  { %9060 = vst [vmem:[#allocation2 + $0x238] sm:$0xff] %v8883_v7   ;;  %v8878_v14 = vpack.c.bf16 %v1993_v11, %v1990_v52  ;;  %v1869_v15 = vpop.f32.mrf.mxu1  ;;  %v9910_v7 = vld [vmem:[#allocation2 + $0x1d0] sm:$0xff]   ;;  %v9912_v10 = vld [vmem:[#allocation2 + $0x1c8] sm:$0xff]   ;;  %v9914_v11 = vld [vmem:[#allocation2 + $0x1c0] sm:$0xff]  }
 0x249   :  { %9048 = vst [vmem:[#allocation2 + $0x1d8] sm:$0xff] %v8823_v40   ;;  %9182 = vmatpush3.bf16.msra.mxu1 %v9873_v12  ;;  %v9889_v9 = vld [vmem:[#allocation2 + $0x220] sm:$0xff]   ;;  %v9913_v40 = vld [vmem:[#allocation2 + $0x188] sm:$0xff]  }
 0x24a   :  { %9059 = vst [vmem:[#allocation2 + $0x230] sm:$0xff] %v8878_v14   ;;  %v1871_v2 = vpop.f32.mrf.mxu1  ;;  %9183 = vmatprep.subr.bf16.mxu1 %v9875_v16  ;;  %9210 = vmatpush3.bf16.msra.mxu0 %v9876_v17  ;;  %v9915_v12 = vld [vmem:[#allocation2 + $0x180] sm:$0xff]   ;;  %v9918_v14 = vld [vmem:[%s12733_s1 + $0x18] ss:$36 sps:$4 sm:$0xff]  }
 0x24b   :  { %9211 = vmatprep.subr.bf16.mxu0 %v9877_v20  ;;  %v9923_v16 = vld [vmem:[%s12733_s1 + $0x60] ss:$36 sps:$4 sm:$0xff]   ;;  %v9929_v20 = vld [vmem:[%s12734_s5 + $0x1b4] ss:$36 sps:$4 sm:$0xff]  }
 0x24c   :  { %v1873_v61 = vpop.f32.mrf.mxu1  ;;  %v9926_v17 = vld [vmem:[%s12734_s5 + $0x1fc] ss:$36 sps:$4 sm:$0xff]  }
 0x24d   :  { %v8788_v22 = vpack.c.bf16 %v1873_v61, %v1869_v15  ;;  %9184 = vmatpush3.bf16.msra.mxu1 %v9878_v57  ;;  %v9921_v15 = vld [vmem:[%s12733_s1 + $0x64] ss:$36 sps:$4 sm:$0xff]   ;;  %v9927_v61 = vld [vmem:[%s12734_s5 + $0x1b0] ss:$36 sps:$4 sm:$0xff]  }
 0x24e   :  { %v1875_v59 = vpop.f32.mrf.mxu1  ;;  %9212 = vmatpush3.bf16.msra.mxu0 %v9879_v23  ;;  %v9909_v5 = vld [vmem:[#allocation2 + $0x198] sm:$0xff]   ;;  %v9932_v57 = vld [vmem:[%s12734_s5 + $0x16c] ss:$36 sps:$4 sm:$0xff]   ;;  %v9936_v23 = vld [vmem:[%s12734_s5 + $0x124] ss:$36 sps:$4 sm:$0xff]  }
 0x24f   :  { %9041 = vst [vmem:[#allocation2 + $0x1a0] sm:$0xff] %v8788_v22   ;;  %v8828_v21 = vpack.c.bf16 %v1875_v59, %v1871_v2  ;;  %v9880_v26 = vld [vmem:[#allocation2 + $0x238] sm:$0xff]   ;;  %v9930_v22 = vld [vmem:[%s12734_s5 + $0x168] ss:$36 sps:$4 sm:$0xff]  }
 0x250   :  { %v1879_v27 = vpop.f32.mrf.mxu1  ;;  %9526 = vmatprep.subr.bf16.mxu0 %v9880_v26  ;;  %3022 = vmatmul.mubr.bf16.vlgmr.msra.gmra.mxu1 %v9881_v6  ;;  %v9908_v41 = vld [vmem:[#allocation2 + $0x1d8] sm:$0xff]   ;;  %v9933_v6 = vld [vmem:[%s12734_s5 + $0x200] ss:$36 sps:$4 sm:$0xff]  }
 0x251   :  { %9049 = vst [vmem:[#allocation2 + $0x1e0] sm:$0xff] %v8828_v21   ;;  %v9887_v29 = vld [vmem:[#allocation2 + $0x230] sm:$0xff]   ;;  %3071 = vmatmul.mubr.bf16.vlgmr.msra.gmra.mxu0 %v9884_v24  ;;  %3029 = vmatprep.mubr.bf16.mxu1 %v9893_v56  ;;  %v9924_v2 = vld [vmem:[%s12734_s5 + $0x1f8] ss:$36 sps:$4 sm:$0xff]   ;;  %v9934_v56 = vld [vmem:[%s12734_s5 + $0x120] ss:$36 sps:$4 sm:$0xff]  }
 0x252   :  { %v1881_v30 = vpop.f32.mrf.mxu1  ;;  %9527 = vmatpush3.bf16.msra.mxu0 %v9880_v26  ;;  %3078 = vmatprep.mubr.bf16.mxu0 %v9896_v18  ;;  %v9937_v24 = vld [vmem:[%s12734_s5 + $0x1b8] ss:$36 sps:$4 sm:$0xff]   ;;  %v9941_v18 = vld [vmem:[%s12734_s5 + $0x170] ss:$36 sps:$4 sm:$0xff]  }
 0x253   :  { %9528 = vmatprep.subr.bf16.mxu0 %v9887_v29  ;;  %v9940_v59 = vld [vmem:[%s12734_s5 + $0xdc] ss:$36 sps:$4 sm:$0xff]   ;;  %v9944_v26 = vld [vmem:[%s12734_s5 + $0x94] ss:$36 sps:$4 sm:$0xff]  }
 0x254   :  { %v1883_v31 = vpop.f32.mrf.mxu1  ;;  %v9938_v21 = vld [vmem:[%s12734_s5 + $0xd8] ss:$36 sps:$4 sm:$0xff]  }
 0x255   :  { %v8793_v32 = vpack.c.bf16 %v1883_v31, %v1879_v27  ;;  %v9945_v27 = vld [vmem:[%s12734_s5 + $0x128] ss:$36 sps:$4 sm:$0xff]   ;;  %v9949_v31 = vld [vmem:[%s12734_s5 + $0xe0] ss:$36 sps:$4 sm:$0xff]  }
 0x256   :  { %v1885_v37 = vpop.f32.mrf.mxu1  ;;  %9529 = vmatpush3.bf16.msra.mxu0 %v9887_v29  ;;  %v9907_v4 = vld [vmem:[#allocation2 + $0x1a0] sm:$0xff]   ;;  %v9942_v29 = vld [vmem:[%s12734_s5 + $0x90] ss:$36 sps:$4 sm:$0xff]  }
 0x257   :  { %9042 = vst [vmem:[#allocation2 + $0x1a8] sm:$0xff] %v8793_v32   ;;  %v8833_v42 = vpack.c.bf16 %v1885_v37, %v1881_v30  ;;  %9530 = vmatprep.subr.bf16.mxu0 %v9888_v39  ;;  %v9948_v30 = vld [vmem:[%s12734_s5 + $0x4c] ss:$36 sps:$4 sm:$0xff]  }
 0x258   :  { %v1889_v19 = vpop.f32.mrf.mxu1  ;;  %3030 = vmatmul.mubr.bf16.gmra.mxu1 %v9895_v33  ;;  %v9906_v3 = vld [vmem:[#allocation2 + $0x1e0] sm:$0xff]   ;;  %v9946_v32 = vld [vmem:[%s12734_s5 + $0x48] ss:$36 sps:$4 sm:$0xff]   ;;  %v9954_v37 = vld [vmem:[%s12734_s5 + $0x50] ss:$36 sps:$4 sm:$0xff]  }
 0x259   :  { %9050 = vst [vmem:[#allocation2 + $0x1e8] sm:$0xff] %v8833_v42   ;;  %3079 = vmatmul.mubr.bf16.gmra.mxu0 %v9899_v34  ;;  %3119 = vmatprep.mubr.bf16.mxu1 %v9920_v35  ;;  %v9952_v33 = vld [vmem:[%s12734_s5 + $0x4] ss:$36 sps:$4 sm:$0xff]   ;;  %v9953_v34 = vld [vmem:[%s12734_s5 + $0x98] ss:$36 sps:$4 sm:$0xff]  }
 0x25a   :  { %v1891_v13 = vpop.f32.mrf.mxu1  ;;  %9531 = vmatpush3.bf16.msra.mxu0 %v9888_v39  ;;  %9542 = vmatprep.mubr.bf16.mxu0 %v9916_v44  ;;  %v9950_v35 = vld [vmem:[%s12734_s5] ss:$36 sps:$4 sm:$0xff]   ;;  %v9957_v39 = vld [vmem:[%s12734_s5 + $0x208] ss:$36 sps:$4 sm:$0xff]  }
 0x25b   :  { %9532 = vmatprep.subr.bf16.mxu0 %v9889_v9  ;;  %v9958_v42 = vld [vmem:[%s12734_s5 + $0x8] ss:$36 sps:$4 sm:$0xff]  }
 0x25c   :  { %v1893_v25 = vpop.f32.mrf.mxu1  ;;  %v11351_v44 = vld [vmem:[%s12734_s5 + $0x20c] ss:$36 sps:$4 sm:$0xff]  }
 0x25d   :  { %v8798_v45 = vpack.c.bf16 %v1893_v25, %v1889_v19 }
 0x25e   :  { %v1895_v47 = vpop.f32.mrf.mxu1  ;;  %9533 = vmatpush3.bf16.msra.mxu0 %v9889_v9  ;;  %v9905_v1 = vld [vmem:[#allocation2 + $0x1a8] sm:$0xff]  }
 0x25f   :  { %9043 = vst [vmem:[#allocation2 + $0x1b0] sm:$0xff] %v8798_v45   ;;  %v8838_v49 = vpack.c.bf16 %v1895_v47, %v1891_v13  ;;  %9534 = vmatprep.subr.bf16.mxu0 %v9890_v48 }
 0x260   :  { %v1899_v51 = vpop.f32.mrf.mxu1  ;;  %v9904_v63 = vld [vmem:[#allocation2 + $0x1e8] sm:$0xff]  }
 0x261   :  { %9051 = vst [vmem:[#allocation2 + $0x1f0] sm:$0xff] %v8838_v49  }
 0x262   :  { %v1901_v53 = vpop.f32.mrf.mxu1  ;;  %9535 = vmatpush3.bf16.msra.mxu0 %v9890_v48 }
 0x263   :  { %9536 = vmatprep.subr.bf16.mxu0 %v9891_v55 }
 0x264   :  { %v1903_v50 = vpop.f32.mrf.mxu1 }
 0x265   :  { %v8803_v58 = vpack.c.bf16 %v1903_v50, %v1899_v51 }
 0x266   :  { %v1905_v46 = vpop.f32.mrf.mxu1  ;;  %9537 = vmatpush3.bf16.msra.mxu0 %v9891_v55  ;;  %v9903_v52 = vld [vmem:[#allocation2 + $0x1b0] sm:$0xff]  }
 0x267   :  { %9044 = vst [vmem:[#allocation2 + $0x1b8] sm:$0xff] %v8803_v58   ;;  %v8843_v60 = vpack.c.bf16 %v1905_v46, %v1901_v53  ;;  %9538 = vmatprep.subr.bf16.mxu0 %v9892_v54 }
 0x268   :  { %v9902_v36 = vld [vmem:[#allocation2 + $0x1f0] sm:$0xff]  }
 0x269   :  { %9052 = vst [vmem:[#allocation2 + $0x1f8] sm:$0xff] %v8843_v60  }
 0x26a   :  { %9539 = vmatpush3.bf16.msra.mxu0 %v9892_v54 }
 0x26b   :  { %9540 = vmatprep.subr.bf16.mxu0 %v9898_v62 }
 0x26e   :  { %9541 = vmatpush3.bf16.msra.mxu0 %v9898_v62  ;;  %v9901_v28 = vld [vmem:[#allocation2 + $0x1b8] sm:$0xff]  }
 0x26f   :  { %9546 = vmatprep.subr.bf16.mxu0 %v9933_v6 }
 0x270   :  { %v9900_v0 = vld [vmem:[#allocation2 + $0x1f8] sm:$0xff]  }
 0x271   :  { %9225 = vmatprep.subr.bf16.mxu1 %v9900_v0  ;;  %9543 = vmatmul.mubr.bf16.vlgmr.msra.gmra.mxu0 %v9917_v43 }
 0x272   :  { %9226 = vmatpush3.bf16.msra.mxu1 %v9901_v28  ;;  %9547 = vmatpush3.bf16.msra.mxu0 %v9933_v6 }
 0x273   :  { %9227 = vmatprep.subr.bf16.mxu1 %v9902_v36  ;;  %9548 = vmatprep.subr.bf16.mxu0 %v9937_v24 }
 0x276   :  { %9228 = vmatpush3.bf16.msra.mxu1 %v9903_v52  ;;  %9549 = vmatpush3.bf16.msra.mxu0 %v9937_v24  ;;  %v7786_v52 = vld [vmem:[%s12735_s3] ss:$0 sm:$0xff] }
 0x277   :  { %9229 = vmatprep.subr.bf16.mxu1 %v9904_v63  ;;  %9550 = vmatprep.subr.bf16.mxu0 %v9941_v18 }
 0x27a   :  { %9230 = vmatpush3.bf16.msra.mxu1 %v9905_v1  ;;  %9551 = vmatpush3.bf16.msra.mxu0 %v9941_v18 }
 0x27b   :  { %9231 = vmatprep.subr.bf16.mxu1 %v9906_v3  ;;  %9552 = vmatprep.subr.bf16.mxu0 %v9945_v27 }
 0x27e   :  { %9232 = vmatpush3.bf16.msra.mxu1 %v9907_v4  ;;  %9553 = vmatpush3.bf16.msra.mxu0 %v9945_v27 }
 0x27f   :  { %9233 = vmatprep.subr.bf16.mxu1 %v9908_v41  ;;  %9554 = vmatprep.subr.bf16.mxu0 %v9949_v31 }
 0x282   :  { %9234 = vmatpush3.bf16.msra.mxu1 %v9909_v5  ;;  %9555 = vmatpush3.bf16.msra.mxu0 %v9949_v31 }
 0x283   :  { %9235 = vmatprep.subr.bf16.mxu1 %v9910_v7  ;;  %9556 = vmatprep.subr.bf16.mxu0 %v9953_v34 }
 0x286   :  { %9236 = vmatpush3.bf16.msra.mxu1 %v9911_v8  ;;  %9557 = vmatpush3.bf16.msra.mxu0 %v9953_v34 }
 0x287   :  { %9237 = vmatprep.subr.bf16.mxu1 %v9912_v10  ;;  %9558 = vmatprep.subr.bf16.mxu0 %v9954_v37 }
 0x28a   :  { %9238 = vmatpush3.bf16.msra.mxu1 %v9913_v40  ;;  %9559 = vmatpush3.bf16.msra.mxu0 %v9954_v37 }
 0x28b   :  { %9239 = vmatprep.subr.bf16.mxu1 %v9914_v11  ;;  %9560 = vmatprep.subr.bf16.mxu0 %v9958_v42 }
 0x28e   :  { %9240 = vmatpush3.bf16.msra.mxu1 %v9915_v12  ;;  %9561 = vmatpush3.bf16.msra.mxu0 %v9958_v42 }
 0x28f   :  { %3371 = vmatprep.subr.bf16.mxu1 %v9926_v17  ;;  %9566 = vmatprep.subr.bf16.mxu0 %v11351_v44 }
 0x291   :  { %3120 = vmatmul.mubr.bf16.vlgmr.msra.gmra.mxu1 %v9918_v14 }
 0x292   :  { %3127 = vmatprep.mubr.bf16.mxu1 %v9921_v15  ;;  %3372 = vmatpush1.bf16.msra.mxu1 %v9924_v2 }
 0x293   :  { %3373 = vmatprep.subr.bf16.mxu1 %v9929_v20 }
 0x296   :  { %3374 = vmatpush1.bf16.msra.mxu1 %v9927_v61 }
 0x297   :  { %3375 = vmatprep.subr.bf16.mxu1 %v9932_v57 }
 0x299   :  { %3128 = vmatmul.mubr.bf16.gmra.mxu1 %v9923_v16 }
 0x29a   :  { %3403 = vmatprep.mubr.bf16.mxu1 %v10604_v38  ;;  %3376 = vmatpush1.bf16.msra.mxu1 %v9930_v22 }
 0x29b   :  { %3377 = vmatprep.subr.bf16.mxu1 %v9936_v23 }
 0x29e   :  { %3378 = vmatpush1.bf16.msra.mxu1 %v9934_v56 }
 0x29f   :  { %3379 = vmatprep.subr.bf16.mxu1 %v9940_v59 }
 0x2a2   :  { %3380 = vmatpush1.bf16.msra.mxu1 %v9938_v21 }
 0x2a3   :  { %3381 = vmatprep.subr.bf16.mxu1 %v9944_v26 }
 0x2a6   :  { %3382 = vmatpush1.bf16.msra.mxu1 %v9942_v29 }
 0x2a7   :  { %3383 = vmatprep.subr.bf16.mxu1 %v9948_v30 }
 0x2aa   :  { %3384 = vmatpush1.bf16.msra.mxu1 %v9946_v32 }
 0x2ab   :  { %3385 = vmatprep.subr.bf16.mxu1 %v9952_v33 }
 0x2ae   :  { %3386 = vmatpush1.bf16.msra.mxu1 %v9950_v35 }
 0x2af   :  { %3693 = vmatprep.subr.bf16.mxu1 %v9957_v39 }
 0x2f1   :  { %v9157_v19 = vpop.f32.mrf.mxu0 }
 0x2f3   :  { %v9158_v13 = vpop.f32.mrf.mxu0 }
 0x2f4   :  { %v9159_v36 = vadd.f32 %v9158_v13, %v9157_v19 }
 0x2f5   :  { %v9160_v9 = vpop.f32.mrf.mxu0 }
 0x2f6   :  { %v2975_v3 = vadd.f32 %v9159_v36, %v7786_v52 }
 0x2f7   :  { %v9161_v25 = vpop.f32.mrf.mxu0 }
 0x2f8   :  { %v9162_v4 = vadd.f32 %v9161_v25, %v9160_v9 }
 0x2f9   :  { %v9163_v45 = vpop.f32.mrf.mxu0 }
 0x2fa   :  { %v2978_v40 = vadd.f32 %v9162_v4, %v7786_v52  ;;  %v9955_v4 = vld [vmem:[%s12734_s5 + $0x204] ss:$36 sps:$4 sm:$0xff]  }
 0x2fb   :  { %v9164_v47 = vpop.f32.mrf.mxu0 }
 0x2fc   :  { %v9165_v7 = vadd.f32 %v9164_v47, %v9163_v45 }
 0x2fd   :  { %v9166_v48 = vpop.f32.mrf.mxu0 }
 0x2fe   :  { %v2983_v16 = vadd.f32 %v9165_v7, %v7786_v52  ;;  %v9961_v7 = vld [vmem:[%s12734_s5 + $0x1c0] ss:$36 sps:$4 sm:$0xff]  }
 0x2ff   :  { %v9167_v49 = vpop.f32.mrf.mxu0 }
 0x300   :  { %v9168_v17 = vadd.f32 %v9167_v49, %v9166_v48 }
 0x302   :  { %v2986_v59 = vadd.f32 %v9168_v17, %v7786_v52 }
 0x310   :  { %v9185_v53 = vpop.f32.mrf.mxu1 }
 0x311   :  { %v9213_v51 = vpop.f32.mrf.mxu0 }
 0x312   :  { %v9186_v50 = vpop.f32.mrf.mxu1 }
 0x313   :  { %v9214_v55 = vpop.f32.mrf.mxu0  ;;  %v9187_v41 = vadd.f32 %v9186_v50, %v9185_v53 }
 0x314   :  { %v9188_v46 = vpop.f32.mrf.mxu1  ;;  %v9215_v12 = vadd.f32 %v9214_v55, %v9213_v51 }
 0x315   :  { %v9216_v58 = vpop.f32.mrf.mxu0  ;;  %v3024_v11 = vadd.f32 %v9187_v41, %v2975_v3 }
 0x316   :  { %v9189_v60 = vpop.f32.mrf.mxu1 }
 0x317   :  { %v9217_v54 = vpop.f32.mrf.mxu0  ;;  %v9190_v14 = vadd.f32 %v9189_v60, %v9188_v46  ;;  %v3073_v57 = vadd.f32 %v9215_v12, %v3024_v11  ;;  %v9964_v11 = vld [vmem:[%s12734_s5 + $0x178] ss:$36 sps:$4 sm:$0xff]  }
 0x318   :  { %v9191_v43 = vpop.f32.mrf.mxu1  ;;  %v9218_v22 = vadd.f32 %v9217_v54, %v9216_v58 }
 0x319   :  { %v9219_v62 = vpop.f32.mrf.mxu0  ;;  %v3027_v6 = vadd.f32 %v9190_v14, %v2978_v40 }
 0x31a   :  { %v9192_v28 = vpop.f32.mrf.mxu1 }
 0x31b   :  { %v9220_v0 = vpop.f32.mrf.mxu0  ;;  %v9193_v2 = vadd.f32 %v9192_v28, %v9191_v43  ;;  %v3076_v29 = vadd.f32 %v9218_v22, %v3027_v6  ;;  %v9973_v6 = vld [vmem:[%s12734_s5 + $0x17c] ss:$36 sps:$4 sm:$0xff]  }
 0x31c   :  { %v9194_v1 = vpop.f32.mrf.mxu1  ;;  %v9221_v21 = vadd.f32 %v9220_v0, %v9219_v62  ;;  %v9976_v22 = vld [vmem:[%s12734_s5 + $0xa0] ss:$36 sps:$4 sm:$0xff]  }
 0x31d   :  { %v9222_v63 = vpop.f32.mrf.mxu0  ;;  %v3032_v18 = vadd.f32 %v9193_v2, %v2983_v16  ;;  %v9962_v16 = vld [vmem:[%s12734_s5 + $0x174] ss:$36 sps:$4 sm:$0xff]  }
 0x31e   :  { %v9195_v8 = vpop.f32.mrf.mxu1  ;;  %v9968_v2 = vld [vmem:[%s12734_s5 + $0x130] ss:$36 sps:$4 sm:$0xff]  }
 0x31f   :  { %v9223_v5 = vpop.f32.mrf.mxu0  ;;  %v9196_v30 = vadd.f32 %v9195_v8, %v9194_v1  ;;  %v3081_v37 = vadd.f32 %v9221_v21, %v3032_v18  ;;  %v9978_v18 = vld [vmem:[%s12734_s5 + $0x54] ss:$36 sps:$4 sm:$0xff]  }
 0x320   :  { %v9224_v39 = vadd.f32 %v9223_v5, %v9222_v63  ;;  %v9984_v21 = vld [vmem:[%s12734_s5 + $0x10] ss:$36 sps:$4 sm:$0xff]  }
 0x321   :  { %v3035_v13 = vadd.f32 %v9196_v30, %v2986_v59  ;;  %v9981_v59 = vld [vmem:[%s12734_s5 + $0xec] ss:$36 sps:$4 sm:$0xff]   ;;  %v9989_v30 = vld [vmem:[%s12734_s5 + $0x214] ss:$36 sps:$4 sm:$0xff]  }
 0x323   :  { %v3084_v53 = vadd.f32 %v9224_v39, %v3035_v13  ;;  %v9994_v39 = vld [vmem:[%s12734_s5 + $0x180] ss:$36 sps:$4 sm:$0xff]   ;;  %v9998_v13 = vld [vmem:[%s12734_s5 + $0x138] ss:$36 sps:$4 sm:$0xff]  }
 0x331   :  { %v9544_v10 = vpop.f32.mrf.mxu0 }
 0x333   :  { %v3170_v20 = vpop.f32.mrf.mxu0 }
 0x335   :  { %v9545_v26 = vpop.f32.mrf.mxu0 }
 0x337   :  { %v3173_v42 = vpop.f32.mrf.mxu0 }
 0x351   :  { %v9241_v15 = vpop.f32.mrf.mxu1 }
 0x353   :  { %v9242_v61 = vpop.f32.mrf.mxu1 }
 0x354   :  { %v9243_v23 = vadd.f32 %v9242_v61, %v9241_v15  ;;  %v9966_v61 = vld [vmem:[%s12734_s5 + $0x12c] ss:$36 sps:$4 sm:$0xff]  }
 0x355   :  { %v9244_v24 = vpop.f32.mrf.mxu1 }
 0x356   :  { %v3122_v56 = vadd.f32 %v9243_v23, %v3073_v57  ;;  %v9972_v57 = vld [vmem:[%s12734_s5 + $0xe8] ss:$36 sps:$4 sm:$0xff]   ;;  %v9977_v23 = vld [vmem:[%s12734_s5 + $0x134] ss:$36 sps:$4 sm:$0xff]  }
 0x357   :  { %v9245_v27 = vpop.f32.mrf.mxu1 }
 0x358   :  { %v3171_v31 = vadd.f32 %v3170_v20, %v3122_v56  ;;  %v9246_v32 = vadd.f32 %v9245_v27, %v9244_v24  ;;  %v9969_v20 = vld [vmem:[%s12734_s5 + $0x1c4] ss:$36 sps:$4 sm:$0xff]   ;;  %v9974_v24 = vld [vmem:[%s12734_s5 + $0x9c] ss:$36 sps:$4 sm:$0xff]   ;;  %v9982_v27 = vld [vmem:[%s12734_s5 + $0xc] ss:$36 sps:$4 sm:$0xff]  }
 0x359   :  { %v9247_v33 = vpop.f32.mrf.mxu1  ;;  %v9980_v56 = vld [vmem:[%s12734_s5 + $0x58] ss:$36 sps:$4 sm:$0xff]  }
 0x35a   :  { %v3189_v34 = vmin.f32 %v3171_v31, 0.0  ;;  %v3125_v35 = vadd.f32 %v9246_v32, %v3076_v29  ;;  %vm3185_vm4 = vcmp.gt.f32.partialorder %v3171_v31, 0.0  ;;  %v9986_v29 = vld [vmem:[%s12734_s5 + $0x5c] ss:$36 sps:$4 sm:$0xff]   ;;  %v9990_v32 = vld [vmem:[%s12734_s5 + $0x14] ss:$36 sps:$4 sm:$0xff]  }
 0x35b   :  { %v9248_v19 = vpop.f32.mrf.mxu1 }
 0x35c   :  { %v3193_v9 = vmul.f32 1.442695, %v3189_v34  ;;  %v3174_v25 = vadd.f32 %v3173_v42, %v3125_v35  ;;  %v9249_v45 = vadd.f32 %v9248_v19, %v9247_v33  ;;  %v9993_v33 = vld [vmem:[%s12734_s5 + $0x1cc] ss:$36 sps:$4 sm:$0xff]   ;;  %v9996_v35 = vld [vmem:[%s12734_s5 + $0x184] ss:$36 sps:$4 sm:$0xff]  }
 0x35d   :  { %v9250_v47 = vpop.f32.mrf.mxu1  ;;  %v9991_v34 = vld [vmem:[%s12734_s5 + $0x1c8] ss:$36 sps:$4 sm:$0xff]   ;;  %v10000_v42 = vld [vmem:[%s12734_s5 + $0x13c] ss:$36 sps:$4 sm:$0xff]   ;;  %v10001_v19 = vld [vmem:[%s12734_s5 + $0x1d0] ss:$36 sps:$4 sm:$0xff]  }
 0x35e   :  { %10526 = vpow2.f32 %v3193_v9  ;;  %v3190_v48 = vmin.f32 %v3174_v25, 0.0  ;;  %v3130_v49 = vadd.f32 %v9249_v45, %v3081_v37  ;;  %vm3186_vm5 = vcmp.gt.f32.partialorder %v3174_v25, 0.0  ;;  %v9997_v37 = vld [vmem:[%s12734_s5 + $0x218] ss:$36 sps:$4 sm:$0xff]   ;;  %v10002_v45 = vld [vmem:[%s12734_s5 + $0xf0] ss:$36 sps:$4 sm:$0xff]  }
 0x35f   :  { %v9251_v51 = vpop.f32.mrf.mxu1  ;;  %v10004_v9 = vld [vmem:[%s12734_s5 + $0xf4] ss:$36 sps:$4 sm:$0xff]  }
 0x360   :  { %v3195_v55 = vmul.f32 1.442695, %v3190_v48  ;;  %v3179_v50 = vadd.f32 %v9544_v10, %v3130_v49  ;;  %v9252_v58 = vadd.f32 %v9251_v51, %v9250_v47  ;;  %v9959_v10 = vld [vmem:[%s12734_s5 + $0x1bc] ss:$36 sps:$4 sm:$0xff]   ;;  %v10008_v47 = vld [vmem:[%s12734_s5 + $0xac] ss:$36 sps:$4 sm:$0xff]  }
 0x361   :  { %v10009_v48 = vld [vmem:[%s12734_s5 + $0x140] ss:$36 sps:$4 sm:$0xff]   ;;  %v10006_v49 = vld [vmem:[%s12734_s5 + $0xa8] ss:$36 sps:$4 sm:$0xff]  }
 0x362   :  { %10528 = vpow2.f32 %v3195_v55  ;;  %v3191_v46 = vmin.f32 %v3179_v50, 0.0  ;;  %v3133_v54 = vadd.f32 %v9252_v58, %v3084_v53  ;;  %vm3187_vm6 = vcmp.gt.f32.partialorder %v3179_v50, 0.0  ;;  %v10012_v51 = vld [vmem:[%s12734_s5 + $0x64] ss:$36 sps:$4 sm:$0xff]   ;;  %v10013_v53 = vld [vmem:[%s12734_s5 + $0xf8] ss:$36 sps:$4 sm:$0xff]  }
 0x363   :  { %v10010_v55 = vld [vmem:[%s12734_s5 + $0x60] ss:$36 sps:$4 sm:$0xff]   ;;  %v10017_v58 = vld [vmem:[%s12734_s5 + $0xb0] ss:$36 sps:$4 sm:$0xff]  }
 0x364   :  { %v3197_v60 = vmul.f32 1.442695, %v3191_v46  ;;  %v3182_v62 = vadd.f32 %v9545_v26, %v3133_v54  ;;  %v9985_v26 = vld [vmem:[%s12734_s5 + $0xa4] ss:$36 sps:$4 sm:$0xff]   ;;  %v10014_v46 = vld [vmem:[%s12734_s5 + $0x18] ss:$36 sps:$4 sm:$0xff]  }
 0x365   :  { %v10018_v54 = vld [vmem:[%s12734_s5 + $0x68] ss:$36 sps:$4 sm:$0xff]  }
 0x366   :  { %10530 = vpow2.f32 %v3197_v60  ;;  %v3192_v43 = vmin.f32 %v3182_v62, 0.0  ;;  %vm3188_vm7 = vcmp.gt.f32.partialorder %v3182_v62, 0.0  ;;  %v10019_v60 = vld [vmem:[%s12734_s5 + $0x20] ss:$36 sps:$4 sm:$0xff]  }
 0x368   :  { %v3199_v0 = vmul.f32 1.442695, %v3192_v43  ;;  %v11521_v43 = vld [vmem:[%s12736_s29] sm:$0xff] }
 0x36a   :  { %10532 = vpow2.f32 %v3199_v0  ;;  %v7991_v0 = vcombine.high %v11521_v43, %v11521_v43 }
 0x36b   :  { %v10527_v28 = vpop.eup %10526 }
 0x36c   :  { %v7877_v36 = vadd.f32 -1.0, %v10527_v28 }
 0x36e   :  { %v3205_v1 = vsel %vm3185_vm4, %v3171_v31, %v7877_v36  ;;  %v9987_v31 = vld [vmem:[%s12734_s5 + $0x210] ss:$36 sps:$4 sm:$0xff]  }
 0x36f   :  { %v10529_v52 = vpop.eup %10528 }
 0x370   :  { %v7878_v63 = vadd.f32 -1.0, %v10529_v52 }
 0x372   :  { %v3206_v3 = vsel %vm3186_vm5, %v3174_v25, %v7878_v63  ;;  %v10005_v25 = vld [vmem:[%s12734_s5 + $0x188] ss:$36 sps:$4 sm:$0xff]  }
 0x373   :  { %v10531_v41 = vpop.eup %10530  ;;  %v11360_v5 = vpack.c.bf16 %v3206_v3, %v3205_v1 }
 0x374   :  { %v7879_v8 = vadd.f32 -1.0, %v10531_v41 }
 0x375   :  { %3404 = vmatmul.mubr.bf16.vlgmr.msra.gmra.mxu1 %v11360_v5  ;;  %9562 = vmatprep.mubr.bf16.mxu0 %v11360_v5 }
 0x376   :  { %3694 = vmatpush1.bf16.msra.mxu1 %v9955_v4  ;;  %3413 = vmatprep.mubr.bf16.mxu1 %v10604_v38  ;;  %v3207_v14 = vsel %vm3187_vm6, %v3179_v50, %v7879_v8  ;;  %v10016_v50 = vld [vmem:[%s12734_s5 + $0x1c] ss:$36 sps:$4 sm:$0xff]  }
 0x377   :  { %v10533_v40 = vpop.eup %10532  ;;  %3695 = vmatprep.subr.bf16.mxu1 %v9961_v7 }
 0x378   :  { %v7880_v12 = vadd.f32 -1.0, %v10533_v40 }
 0x37a   :  { %v3208_v15 = vsel %vm3188_vm7, %v3182_v62, %v7880_v12  ;;  %3696 = vmatpush1.bf16.msra.mxu1 %v9959_v10  ;;  %v10605_v62 = vmov 0.0  }
 0x37b   :  { %v11377_v17 = vpack.c.bf16 %v3208_v15, %v3207_v14  ;;  %3697 = vmatprep.subr.bf16.mxu1 %v9964_v11 }
 0x37d   :  { %3414 = vmatmul.mubr.bf16.gmra.mxu1 %v11377_v17  ;;  %9563 = vmatmul.mubr.bf16.vlgmr.msra.gmra.mxu0 %v11377_v17 }
 0x37e   :  { %3698 = vmatpush1.bf16.msra.mxu1 %v9962_v16  ;;  %9567 = vmatpush3.bf16.msra.mxu0 %v11351_v44  ;;  %v9970_v44 = vld [vmem:[%s12734_s5 + $0xe4] ss:$36 sps:$4 sm:$0xff]  }
 0x37f   :  { %9582 = vmatprep.mubr.bf16.mxu0 %v11360_v5  ;;  %3699 = vmatprep.subr.bf16.mxu1 %v9968_v2 }
 0x380   :  { %9568 = vmatprep.subr.bf16.mxu0 %v9969_v20  ;;  %3725 = vmatprep.mubr.bf16.mxu1 %v10604_v38 }
 0x382   :  { %3700 = vmatpush1.bf16.msra.mxu1 %v9966_v61  ;;  %9569 = vmatpush3.bf16.msra.mxu0 %v9969_v20 }
 0x383   :  { %3701 = vmatprep.subr.bf16.mxu1 %v9972_v57  ;;  %9570 = vmatprep.subr.bf16.mxu0 %v9973_v6 }
 0x386   :  { %3702 = vmatpush1.bf16.msra.mxu1 %v9970_v44  ;;  %9571 = vmatpush3.bf16.msra.mxu0 %v9973_v6 }
 0x387   :  { %3703 = vmatprep.subr.bf16.mxu1 %v9976_v22  ;;  %9572 = vmatprep.subr.bf16.mxu0 %v9977_v23 }
 0x38a   :  { %3704 = vmatpush1.bf16.msra.mxu1 %v9974_v24  ;;  %9573 = vmatpush3.bf16.msra.mxu0 %v9977_v23 }
 0x38b   :  { %3705 = vmatprep.subr.bf16.mxu1 %v9980_v56  ;;  %9574 = vmatprep.subr.bf16.mxu0 %v9981_v59 }
 0x38e   :  { %3706 = vmatpush1.bf16.msra.mxu1 %v9978_v18  ;;  %9575 = vmatpush3.bf16.msra.mxu0 %v9981_v59 }
 0x38f   :  { %3707 = vmatprep.subr.bf16.mxu1 %v9984_v21  ;;  %9576 = vmatprep.subr.bf16.mxu0 %v9985_v26 }
 0x392   :  { %3708 = vmatpush1.bf16.msra.mxu1 %v9982_v27  ;;  %9577 = vmatpush3.bf16.msra.mxu0 %v9985_v26 }
 0x393   :  { %9578 = vmatprep.subr.bf16.mxu0 %v9986_v29  ;;  %4015 = vmatprep.subr.bf16.mxu1 %v9989_v30 }
 0x395   :  { %3726 = vmatmul.mubr.bf16.vlgmr.msra.gmra.mxu1 %v11360_v5 }
 0x396   :  { %9579 = vmatpush3.bf16.msra.mxu0 %v9986_v29  ;;  %4016 = vmatpush1.bf16.msra.mxu1 %v9987_v31 }
 0x397   :  { %9580 = vmatprep.subr.bf16.mxu0 %v9990_v32  ;;  %4017 = vmatprep.subr.bf16.mxu1 %v9993_v33 }
 0x398   :  { %3735 = vmatprep.mubr.bf16.mxu1 %v10604_v38 }
 0x39a   :  { %9581 = vmatpush3.bf16.msra.mxu0 %v9990_v32  ;;  %4018 = vmatpush1.bf16.msra.mxu1 %v9991_v34 }
 0x39b   :  { %4019 = vmatprep.subr.bf16.mxu1 %v9996_v35  ;;  %9586 = vmatprep.subr.bf16.mxu0 %v9997_v37 }
 0x39d   :  { %3736 = vmatmul.mubr.bf16.gmra.mxu1 %v11377_v17  ;;  %9583 = vmatmul.mubr.bf16.vlgmr.msra.gmra.mxu0 %v11377_v17 }
 0x39e   :  { %4020 = vmatpush1.bf16.msra.mxu1 %v9994_v39  ;;  %9587 = vmatpush3.bf16.msra.mxu0 %v9997_v37 }
 0x39f   :  { %9602 = vmatprep.mubr.bf16.mxu0 %v11360_v5  ;;  %4021 = vmatprep.subr.bf16.mxu1 %v10000_v42 }
 0x3a0   :  { %9588 = vmatprep.subr.bf16.mxu0 %v10001_v19  ;;  %4047 = vmatprep.mubr.bf16.mxu1 %v10604_v38 }
 0x3a2   :  { %4022 = vmatpush1.bf16.msra.mxu1 %v9998_v13  ;;  %9589 = vmatpush3.bf16.msra.mxu0 %v10001_v19 }
 0x3a3   :  { %4023 = vmatprep.subr.bf16.mxu1 %v10004_v9  ;;  %9590 = vmatprep.subr.bf16.mxu0 %v10005_v25 }
 0x3a6   :  { %4024 = vmatpush1.bf16.msra.mxu1 %v10002_v45  ;;  %9591 = vmatpush3.bf16.msra.mxu0 %v10005_v25 }
 0x3a7   :  { %4025 = vmatprep.subr.bf16.mxu1 %v10008_v47  ;;  %9592 = vmatprep.subr.bf16.mxu0 %v10009_v48 }
 0x3aa   :  { %4026 = vmatpush1.bf16.msra.mxu1 %v10006_v49  ;;  %9593 = vmatpush3.bf16.msra.mxu0 %v10009_v48 }
 0x3ab   :  { %4027 = vmatprep.subr.bf16.mxu1 %v10012_v51  ;;  %9594 = vmatprep.subr.bf16.mxu0 %v10013_v53 }
 0x3ae   :  { %4028 = vmatpush1.bf16.msra.mxu1 %v10010_v55  ;;  %9595 = vmatpush3.bf16.msra.mxu0 %v10013_v53 }
 0x3af   :  { %4029 = vmatprep.subr.bf16.mxu1 %v10016_v50  ;;  %9596 = vmatprep.subr.bf16.mxu0 %v10017_v58  ;;  %v10043_v50 = vld [vmem:[%s12696_s12 + $0x1fc] ss:$36 sps:$4 sm:$0xff]  }
 0x3b2   :  { %4030 = vmatpush1.bf16.msra.mxu1 %v10014_v46  ;;  %9597 = vmatpush3.bf16.msra.mxu0 %v10017_v58 }
 0x3b3   :  { %9598 = vmatprep.subr.bf16.mxu0 %v10018_v54 }
 0x3b5   :  { %4048 = vmatmul.mubr.bf16.vlgmr.msra.gmra.mxu1 %v11360_v5 }
 0x3b6   :  { %9599 = vmatpush3.bf16.msra.mxu0 %v10018_v54  ;;  %4057 = vmatprep.mubr.bf16.mxu1 %v10604_v38 }
 0x3b7   :  { %9600 = vmatprep.subr.bf16.mxu0 %v10019_v60 }
 0x3ba   :  { %9601 = vmatpush3.bf16.msra.mxu0 %v10019_v60 }
 0x3bb   :  { %9606 = vmatprep.subr.bf16.mxu0 %v10605_v62 }
 0x3bd   :  { %4058 = vmatmul.mubr.bf16.gmra.mxu1 %v11377_v17  ;;  %9603 = vmatmul.mubr.bf16.vlgmr.msra.gmra.mxu0 %v11377_v17 }
 0x3be   :  { %9610 = vmatprep.mubr.msk.bf16.mxu0 %vm10606_vm8, %v10605_v62  ;;  %4376 = vmatprep.mubr.bf16.mxu1 %v7991_v0  ;;  %v10040_v0 = vld [vmem:[%s12736_s29 + $0x8] ss:$0 sps:$4 sm:$0xff]   ;;  %s12738_s29 = sld [smem:[#allocation14_spill]] }
 0x435   :  { %v3405_v28 = vpop.f32.mrf.mxu1 }
 0x437   :  { %v3407_v36 = vpop.f32.mrf.mxu1 }
 0x439   :  { %v3409_v52 = vpop.f32.mrf.mxu1 }
 0x43a   :  { %v8888_v63 = vpack.c.bf16 %v3409_v52, %v3405_v28  ;;  %v10041_v28 = vld [vmem:[%s12696_s12 + $0x1f8] ss:$36 sps:$4 sm:$0xff]  }
 0x43b   :  { %v3411_v1 = vpop.f32.mrf.mxu1 }
 0x43c   :  { %8889 = vst [vmem:[#allocation2] sm:$0xff] %v8888_v63   ;;  %v8898_v3 = vpack.c.bf16 %v3411_v1, %v3407_v36 }
 0x43d   :  { %v3415_v4 = vpop.f32.mrf.mxu1  ;;  %v9564_v41 = vpop.f32.mrf.mxu0 }
 0x43e   :  { %9062 = vst [vmem:[#allocation2 + $0x10] sm:$0xff] %v8898_v3  }
 0x43f   :  { %v3417_v5 = vpop.f32.mrf.mxu1  ;;  %v3458_v7 = vpop.f32.mrf.mxu0 }
 0x441   :  { %v3419_v8 = vpop.f32.mrf.mxu1  ;;  %v9565_v10 = vpop.f32.mrf.mxu0 }
 0x442   :  { %v8893_v40 = vpack.c.bf16 %v3419_v8, %v3415_v4  ;;  %v8913_v11 = vpack.c.bf16 %v9565_v10, %v9564_v41 }
 0x443   :  { %v3421_v12 = vpop.f32.mrf.mxu1  ;;  %v3461_v14 = vpop.f32.mrf.mxu0 }
 0x444   :  { %9061 = vst [vmem:[#allocation2 + $0x8] sm:$0xff] %v8893_v40   ;;  %9065 = vst [vmem:[#allocation2 + $0x28] sm:$0xff] %v8913_v11   ;;  %v8903_v15 = vpack.c.bf16 %v3421_v12, %v3417_v5  ;;  %v8908_v16 = vpack.c.bf16 %v3461_v14, %v3458_v7  ;;  %v10037_v11 = vld [vmem:[#allocation2] sm:$0xff]   ;;  %v7990_v12 = vcombine.low %v11521_v43, %v11521_v43  ;;  %v10045_v43 = vld [vmem:[%s12696_s12 + $0x1b0] ss:$36 sps:$4 sm:$0xff]  }
 0x445   :  { %v10033_v7 = vld [vmem:[#allocation2 + $0x10] sm:$0xff]   ;;  %v10044_v14 = vld [vmem:[%s12696_s12 + $0x200] ss:$36 sps:$4 sm:$0xff]  }
 0x446   :  { %9063 = vst [vmem:[#allocation2 + $0x18] sm:$0xff] %v8903_v15   ;;  %9064 = vst [vmem:[#allocation2 + $0x20] sm:$0xff] %v8908_v16   ;;  %v10047_v15 = vld [vmem:[%s12696_s12 + $0x1b4] ss:$36 sps:$4 sm:$0xff]  }
 0x447   :  { %v10048_v16 = vld [vmem:[%s12696_s12 + $0x1b8] ss:$36 sps:$4 sm:$0xff]  }
 0x44b   :  { %v10027_v63 = vld [vmem:[#allocation2 + $0x28] sm:$0xff]  }
 0x44c   :  { %v10035_v10 = vld [vmem:[#allocation2 + $0x8] sm:$0xff]  }
 0x44d   :  { %v10029_v3 = vld [vmem:[#allocation2 + $0x20] sm:$0xff]   ;;  %v10031_v41 = vld [vmem:[#allocation2 + $0x18] sm:$0xff]  }
 0x455   :  { %v3727_v17 = vpop.f32.mrf.mxu1 }
 0x457   :  { %v3729_v2 = vpop.f32.mrf.mxu1 }
 0x459   :  { %v3731_v20 = vpop.f32.mrf.mxu1 }
 0x45a   :  { %v8918_v61 = vpack.c.bf16 %v3731_v20, %v3727_v17  ;;  %v10051_v17 = vld [vmem:[%s12696_s12 + $0x16c] ss:$36 sps:$4 sm:$0xff]  }
 0x45b   :  { %v3733_v57 = vpop.f32.mrf.mxu1  ;;  %v10052_v20 = vld [vmem:[%s12696_s12 + $0x170] ss:$36 sps:$4 sm:$0xff]  }
 0x45c   :  { %9066 = vst [vmem:[#allocation2 + $0x30] sm:$0xff] %v8918_v61   ;;  %v8928_v6 = vpack.c.bf16 %v3733_v57, %v3729_v2  ;;  %v10049_v2 = vld [vmem:[%s12696_s12 + $0x168] ss:$36 sps:$4 sm:$0xff]   ;;  %v10053_v57 = vld [vmem:[%s12696_s12 + $0x120] ss:$36 sps:$4 sm:$0xff]  }
 0x45d   :  { %v3737_v44 = vpop.f32.mrf.mxu1  ;;  %v9584_v22 = vpop.f32.mrf.mxu0  ;;  %v10055_v61 = vld [vmem:[%s12696_s12 + $0x124] ss:$36 sps:$4 sm:$0xff]  }
 0x45e   :  { %9068 = vst [vmem:[#allocation2 + $0x40] sm:$0xff] %v8928_v6   ;;  %v10056_v6 = vld [vmem:[%s12696_s12 + $0x128] ss:$36 sps:$4 sm:$0xff]  }
 0x45f   :  { %v3739_v23 = vpop.f32.mrf.mxu1  ;;  %v3780_v24 = vpop.f32.mrf.mxu0 }
 0x461   :  { %v3741_v56 = vpop.f32.mrf.mxu1  ;;  %v9585_v59 = vpop.f32.mrf.mxu0 }
 0x462   :  { %v8923_v18 = vpack.c.bf16 %v3741_v56, %v3737_v44  ;;  %v8943_v21 = vpack.c.bf16 %v9585_v59, %v9584_v22  ;;  %v10059_v44 = vld [vmem:[%s12696_s12 + $0xdc] ss:$36 sps:$4 sm:$0xff]   ;;  %v10061_v56 = vld [vmem:[%s12696_s12 + $0x90] ss:$36 sps:$4 sm:$0xff]  }
 0x463   :  { %v3743_v26 = vpop.f32.mrf.mxu1  ;;  %v3783_v27 = vpop.f32.mrf.mxu0  ;;  %v10025_v36 = vld [vmem:[#allocation2 + $0x30] sm:$0xff]   ;;  %v10057_v22 = vld [vmem:[%s12696_s12 + $0xd8] ss:$36 sps:$4 sm:$0xff]  }
 0x464   :  { %9067 = vst [vmem:[#allocation2 + $0x38] sm:$0xff] %v8923_v18   ;;  %9071 = vst [vmem:[#allocation2 + $0x58] sm:$0xff] %v8943_v21   ;;  %v8933_v29 = vpack.c.bf16 %v3743_v26, %v3739_v23  ;;  %v8938_v30 = vpack.c.bf16 %v3783_v27, %v3780_v24  ;;  %v10060_v23 = vld [vmem:[%s12696_s12 + $0xe0] ss:$36 sps:$4 sm:$0xff]   ;;  %v10063_v24 = vld [vmem:[%s12696_s12 + $0x94] ss:$36 sps:$4 sm:$0xff]  }
 0x465   :  { %v10036_v40 = vld [vmem:[#allocation2 + $0x40] sm:$0xff]   ;;  %v10064_v59 = vld [vmem:[%s12696_s12 + $0x98] ss:$36 sps:$4 sm:$0xff]   ;;  %v10067_v18 = vld [vmem:[%s12696_s12 + $0x4c] ss:$36 sps:$4 sm:$0xff]  }
 0x466   :  { %9069 = vst [vmem:[#allocation2 + $0x48] sm:$0xff] %v8933_v29   ;;  %9070 = vst [vmem:[#allocation2 + $0x50] sm:$0xff] %v8938_v30   ;;  %v10065_v21 = vld [vmem:[%s12696_s12 + $0x48] ss:$36 sps:$4 sm:$0xff]   ;;  %v10068_v26 = vld [vmem:[%s12696_s12 + $0x50] ss:$36 sps:$4 sm:$0xff]  }
 0x467   :  { %v10071_v27 = vld [vmem:[%s12696_s12 + $0x4] ss:$36 sps:$4 sm:$0xff]  }
 0x468   :  { %v10069_v29 = vld [vmem:[%s12696_s12] ss:$36 sps:$4 sm:$0xff]   ;;  %v10072_v30 = vld [vmem:[%s12696_s12 + $0x8] ss:$36 sps:$4 sm:$0xff]  }
 0x46b   :  { %v10022_v46 = vld [vmem:[#allocation2 + $0x38] sm:$0xff]  }
 0x46c   :  { %v10030_v4 = vld [vmem:[#allocation2 + $0x58] sm:$0xff]  }
 0x46d   :  { %v10032_v5 = vld [vmem:[#allocation2 + $0x50] sm:$0xff]   ;;  %v10034_v8 = vld [vmem:[#allocation2 + $0x48] sm:$0xff]  }
 0x475   :  { %v4049_v31 = vpop.f32.mrf.mxu1 }
 0x477   :  { %v4051_v32 = vpop.f32.mrf.mxu1 }
 0x479   :  { %v4053_v33 = vpop.f32.mrf.mxu1 }
 0x47a   :  { %v8948_v34 = vpack.c.bf16 %v4053_v33, %v4049_v31  ;;  %v10075_v31 = vld [vmem:[%s12696_s12 + $0x208] ss:$36 sps:$4 sm:$0xff]  }
 0x47b   :  { %v4055_v35 = vpop.f32.mrf.mxu1 }
 0x47c   :  { %9072 = vst [vmem:[#allocation2 + $0x60] sm:$0xff] %v8948_v34   ;;  %v8958_v37 = vpack.c.bf16 %v4055_v35, %v4051_v32 }
 0x47d   :  { %v4059_v39 = vpop.f32.mrf.mxu1  ;;  %v9604_v42 = vpop.f32.mrf.mxu0 }
 0x47e   :  { %9074 = vst [vmem:[#allocation2 + $0x70] sm:$0xff] %v8958_v37  }
 0x47f   :  { %v4061_v19 = vpop.f32.mrf.mxu1  ;;  %v4102_v13 = vpop.f32.mrf.mxu0 }
 0x481   :  { %v4063_v9 = vpop.f32.mrf.mxu1  ;;  %v9605_v25 = vpop.f32.mrf.mxu0 }
 0x482   :  { %v8953_v45 = vpack.c.bf16 %v4063_v9, %v4059_v39  ;;  %v8973_v47 = vpack.c.bf16 %v9605_v25, %v9604_v42  ;;  %v7989_v39 = vld [vmem:[%s12737_s0] ss:$0 sm:$0xff] }
 0x483   :  { %v4065_v48 = vpop.f32.mrf.mxu1  ;;  %v4105_v49 = vpop.f32.mrf.mxu0  ;;  %v10028_v1 = vld [vmem:[#allocation2 + $0x60] sm:$0xff]  }
 0x484   :  { %9073 = vst [vmem:[#allocation2 + $0x68] sm:$0xff] %v8953_v45   ;;  %9077 = vst [vmem:[#allocation2 + $0x88] sm:$0xff] %v8973_v47   ;;  %v8963_v51 = vpack.c.bf16 %v4065_v48, %v4061_v19  ;;  %v8968_v53 = vpack.c.bf16 %v4105_v49, %v4102_v13 }
 0x485   :  { %v10023_v54 = vld [vmem:[#allocation2 + $0x70] sm:$0xff]  }
 0x486   :  { %9075 = vst [vmem:[#allocation2 + $0x78] sm:$0xff] %v8963_v51   ;;  %9076 = vst [vmem:[#allocation2 + $0x80] sm:$0xff] %v8968_v53  }
 0x48b   :  { %v10020_v55 = vld [vmem:[#allocation2 + $0x88] sm:$0xff]  }
 0x48c   :  { %9607 = vmatpush3.bf16.msra.mxu0 %v10020_v55  ;;  %v10026_v52 = vld [vmem:[#allocation2 + $0x68] sm:$0xff]  }
 0x48d   :  { %v10021_v58 = vld [vmem:[#allocation2 + $0x78] sm:$0xff]   ;;  %9608 = vmatprep.subr.bf16.mxu0 %v10605_v62  ;;  %v10024_v60 = vld [vmem:[#allocation2 + $0x80] sm:$0xff]  }
 0x48e   :  { %9293 = vmatprep.subr.bf16.mxu1 %v10021_v58  ;;  %v10073_v55 = vld [vmem:[%s12696_s12 + $0x204] ss:$36 sps:$4 sm:$0xff]  }
 0x48f   :  { %9294 = vmatpush3.bf16.msra.mxu1 %v10022_v46  ;;  %v10079_v46 = vld [vmem:[%s12696_s12 + $0x1c0] ss:$36 sps:$4 sm:$0xff]  }
 0x490   :  { %9295 = vmatprep.subr.bf16.mxu1 %v10023_v54  ;;  %9609 = vmatpush3.bf16.msra.mxu0 %v10024_v60  ;;  %v10077_v54 = vld [vmem:[%s12696_s12 + $0x1bc] ss:$36 sps:$4 sm:$0xff]   ;;  %v10080_v60 = vld [vmem:[%s12696_s12 + $0x1c4] ss:$36 sps:$4 sm:$0xff]  }
 0x491   :  { %4591 = vmatprep.subr.bf16.mxu0 %v10043_v50  ;;  %v10076_v50 = vld [vmem:[%s12696_s12 + $0x20c] ss:$36 sps:$4 sm:$0xff]  }
 0x493   :  { %9296 = vmatpush3.bf16.msra.mxu1 %v10025_v36  ;;  %9611 = vmatmul.mubr.msk.bf16.vlgmr.msra.gmra.mxu0 %vm4340_vm9, %v10040_v0  ;;  %v10083_v0 = vld [vmem:[%s12696_s12 + $0x178] ss:$36 sps:$4 sm:$0xff]  }
 0x494   :  { %9297 = vmatprep.subr.bf16.mxu1 %v10026_v52  ;;  %4592 = vmatpush1.bf16.msra.mxu0 %v10041_v28  ;;  %v10081_v28 = vld [vmem:[%s12696_s12 + $0x174] ss:$36 sps:$4 sm:$0xff]   ;;  %v10084_v36 = vld [vmem:[%s12696_s12 + $0x17c] ss:$36 sps:$4 sm:$0xff]  }
 0x495   :  { %4623 = vmatprep.mubr.bf16.mxu0 %v10604_v38  ;;  %4593 = vmatprep.subr.bf16.mxu0 %v10047_v15  ;;  %v10087_v52 = vld [vmem:[%s12696_s12 + $0x130] ss:$36 sps:$4 sm:$0xff]  }
 0x496   :  { %v10104_v15 = vld [vmem:[%s12696_s12 + $0x14] ss:$36 sps:$4 sm:$0xff]  }
 0x497   :  { %9298 = vmatpush3.bf16.msra.mxu1 %v10027_v63  ;;  %v10085_v63 = vld [vmem:[%s12696_s12 + $0x12c] ss:$36 sps:$4 sm:$0xff]  }
 0x498   :  { %9299 = vmatprep.subr.bf16.mxu1 %v10028_v1  ;;  %4594 = vmatpush1.bf16.msra.mxu0 %v10045_v43  ;;  %v10088_v1 = vld [vmem:[%s12696_s12 + $0x134] ss:$36 sps:$4 sm:$0xff]  }
 0x499   :  { %4595 = vmatprep.subr.bf16.mxu0 %v10051_v17  ;;  %v10107_v43 = vld [vmem:[%s12696_s12 + $0x214] ss:$36 sps:$4 sm:$0xff]  }
 0x49a   :  { %v10108_v17 = vld [vmem:[%s12696_s12 + $0x218] ss:$36 sps:$4 sm:$0xff]  }
 0x49b   :  { %9300 = vmatpush3.bf16.msra.mxu1 %v10029_v3  ;;  %v10091_v3 = vld [vmem:[%s12696_s12 + $0xe8] ss:$36 sps:$4 sm:$0xff]  }
 0x49c   :  { %9301 = vmatprep.subr.bf16.mxu1 %v10030_v4  ;;  %4596 = vmatpush1.bf16.msra.mxu0 %v10049_v2  ;;  %v10089_v4 = vld [vmem:[%s12696_s12 + $0xe4] ss:$36 sps:$4 sm:$0xff]   ;;  %v10111_v2 = vld [vmem:[%s12696_s12 + $0x1cc] ss:$36 sps:$4 sm:$0xff]  }
 0x49d   :  { %4597 = vmatprep.subr.bf16.mxu0 %v10055_v61  ;;  %v10112_v61 = vld [vmem:[%s12696_s12 + $0x1d0] ss:$36 sps:$4 sm:$0xff]  }
 0x49f   :  { %9302 = vmatpush3.bf16.msra.mxu1 %v10031_v41  ;;  %v10092_v41 = vld [vmem:[%s12696_s12 + $0xec] ss:$36 sps:$4 sm:$0xff]  }
 0x4a0   :  { %9303 = vmatprep.subr.bf16.mxu1 %v10032_v5  ;;  %4598 = vmatpush1.bf16.msra.mxu0 %v10053_v57  ;;  %v10095_v5 = vld [vmem:[%s12696_s12 + $0xa0] ss:$36 sps:$4 sm:$0xff]  }
 0x4a1   :  { %4599 = vmatprep.subr.bf16.mxu0 %v10059_v44  ;;  %v10115_v57 = vld [vmem:[%s12696_s12 + $0x184] ss:$36 sps:$4 sm:$0xff]  }
 0x4a2   :  { %v10116_v44 = vld [vmem:[%s12696_s12 + $0x188] ss:$36 sps:$4 sm:$0xff]  }
 0x4a3   :  { %9304 = vmatpush3.bf16.msra.mxu1 %v10033_v7  ;;  %v10093_v7 = vld [vmem:[%s12696_s12 + $0x9c] ss:$36 sps:$4 sm:$0xff]  }
 0x4a4   :  { %9305 = vmatprep.subr.bf16.mxu1 %v10034_v8  ;;  %4600 = vmatpush1.bf16.msra.mxu0 %v10057_v22  ;;  %v10096_v8 = vld [vmem:[%s12696_s12 + $0xa4] ss:$36 sps:$4 sm:$0xff]   ;;  %v10119_v22 = vld [vmem:[%s12696_s12 + $0x13c] ss:$36 sps:$4 sm:$0xff]  }
 0x4a5   :  { %4601 = vmatprep.subr.bf16.mxu0 %v10063_v24  ;;  %v10120_v24 = vld [vmem:[%s12696_s12 + $0x140] ss:$36 sps:$4 sm:$0xff]  }
 0x4a7   :  { %9306 = vmatpush3.bf16.msra.mxu1 %v10035_v10  ;;  %v10099_v10 = vld [vmem:[%s12696_s12 + $0x58] ss:$36 sps:$4 sm:$0xff]  }
 0x4a8   :  { %9307 = vmatprep.subr.bf16.mxu1 %v10036_v40  ;;  %4602 = vmatpush1.bf16.msra.mxu0 %v10061_v56  ;;  %v10097_v40 = vld [vmem:[%s12696_s12 + $0x54] ss:$36 sps:$4 sm:$0xff]  }
 0x4a9   :  { %4603 = vmatprep.subr.bf16.mxu0 %v10067_v18  ;;  %v10123_v56 = vld [vmem:[%s12696_s12 + $0xf4] ss:$36 sps:$4 sm:$0xff]  }
 0x4aa   :  { %v10124_v18 = vld [vmem:[%s12696_s12 + $0xf8] ss:$36 sps:$4 sm:$0xff]  }
 0x4ab   :  { %9308 = vmatpush3.bf16.msra.mxu1 %v10037_v11  ;;  %v10100_v11 = vld [vmem:[%s12696_s12 + $0x5c] ss:$36 sps:$4 sm:$0xff]  }
 0x4ac   :  { %9614 = vmatprep.subr.bf16.mxu1 %v10605_v62  ;;  %4604 = vmatpush1.bf16.msra.mxu0 %v10065_v21  ;;  %v10127_v21 = vld [vmem:[%s12696_s12 + $0xac] ss:$36 sps:$4 sm:$0xff]  }
 0x4ad   :  { %4605 = vmatprep.subr.bf16.mxu0 %v10071_v27  ;;  %v10128_v27 = vld [vmem:[%s12696_s12 + $0xb0] ss:$36 sps:$4 sm:$0xff]  }
 0x4ae   :  { %4377 = vmatmul.mubr.bf16.vlgmr.msra.gmra.mxu1 %v7990_v12  ;;  %v10103_v12 = vld [vmem:[%s12696_s12 + $0x10] ss:$36 sps:$4 sm:$0xff]  }
 0x4af   :  { %9630 = vmatprep.mubr.msk.bf16.mxu1 %vm10606_vm8, %v10605_v62  ;;  %9615 = vmatpush3.bf16.msra.mxu1 %v10044_v14  ;;  %v10101_v14 = vld [vmem:[%s12696_s12 + $0xc] ss:$36 sps:$4 sm:$0xff]  }
 0x4b0   :  { %9616 = vmatprep.subr.bf16.mxu1 %v10605_v62  ;;  %4606 = vmatpush1.bf16.msra.mxu0 %v10069_v29  ;;  %v10131_v29 = vld [vmem:[%s12696_s12 + $0x64] ss:$36 sps:$4 sm:$0xff]  }
 0x4b1   :  { %4838 = vmatprep.subr.bf16.mxu0 %v10075_v31  ;;  %v10132_v31 = vld [vmem:[%s12696_s12 + $0x68] ss:$36 sps:$4 sm:$0xff]  }
 0x4b3   :  { %9617 = vmatpush3.bf16.msra.mxu1 %v10048_v16  ;;  %v10105_v16 = vld [vmem:[%s12696_s12 + $0x210] ss:$36 sps:$4 sm:$0xff]  }
 0x4b4   :  { %9618 = vmatprep.subr.bf16.mxu1 %v10605_v62 }
 0x4b7   :  { %9619 = vmatpush3.bf16.msra.mxu1 %v10052_v20  ;;  %v10109_v20 = vld [vmem:[%s12696_s12 + $0x1c8] ss:$36 sps:$4 sm:$0xff]  }
 0x4b8   :  { %9620 = vmatprep.subr.bf16.mxu1 %v10605_v62 }
 0x4bb   :  { %9621 = vmatpush3.bf16.msra.mxu1 %v10056_v6  ;;  %v10113_v6 = vld [vmem:[%s12696_s12 + $0x180] ss:$36 sps:$4 sm:$0xff]  }
 0x4bc   :  { %9622 = vmatprep.subr.bf16.mxu1 %v10605_v62 }
 0x4bf   :  { %9623 = vmatpush3.bf16.msra.mxu1 %v10060_v23  ;;  %v10117_v23 = vld [vmem:[%s12696_s12 + $0x138] ss:$36 sps:$4 sm:$0xff]  }
 0x4c0   :  { %9624 = vmatprep.subr.bf16.mxu1 %v10605_v62 }
 0x4c3   :  { %9625 = vmatpush3.bf16.msra.mxu1 %v10064_v59  ;;  %v10121_v59 = vld [vmem:[%s12696_s12 + $0xf0] ss:$36 sps:$4 sm:$0xff]  }
 0x4c4   :  { %9626 = vmatprep.subr.bf16.mxu1 %v10605_v62 }
 0x4c7   :  { %9627 = vmatpush3.bf16.msra.mxu1 %v10068_v26  ;;  %v10125_v26 = vld [vmem:[%s12696_s12 + $0xa8] ss:$36 sps:$4 sm:$0xff]  }
 0x4c8   :  { %9628 = vmatprep.subr.bf16.mxu1 %v10605_v62 }
 0x4cb   :  { %9629 = vmatpush3.bf16.msra.mxu1 %v10072_v30  ;;  %v10129_v30 = vld [vmem:[%s12696_s12 + $0x60] ss:$36 sps:$4 sm:$0xff]  }
 0x4cc   :  { %9634 = vmatprep.subr.bf16.mxu1 %v10605_v62 }
 0x553   :  { %v4418_v32 = vpop.f32.mrf.mxu0 }
 0x555   :  { %v9612_v33 = vpop.f32.mrf.mxu0 }
 0x556   :  { %v10133_v33 = vld [vmem:[%s12696_s12 + $0x18] ss:$36 sps:$4 sm:$0xff]  }
 0x557   :  { %v4421_v34 = vpop.f32.mrf.mxu0 }
 0x558   :  { %v10136_v34 = vld [vmem:[%s12696_s12 + $0x20] ss:$36 sps:$4 sm:$0xff]  }
 0x559   :  { %v9613_v35 = vpop.f32.mrf.mxu0 }
 0x55a   :  { %v10142_v35 = vld [vmem:[%s12698_s14 + $0x118] ss:$20 sps:$4 sm:$0xff]  }
 0x56e   :  { %v9309_v37 = vpop.f32.mrf.mxu1 }
 0x570   :  { %v9310_v42 = vpop.f32.mrf.mxu1 }
 0x571   :  { %v9311_v19 = vadd.f32 %v9310_v42, %v9309_v37  ;;  %v10144_v37 = vld [vmem:[%s12698_s14 + $0x11c] ss:$20 sps:$4 sm:$0xff]  }
 0x572   :  { %v9312_v13 = vpop.f32.mrf.mxu1  ;;  %v10148_v42 = vld [vmem:[%s12698_s14 + $0xf0] ss:$20 sps:$4 sm:$0xff]  }
 0x573   :  { %v4379_v9 = vadd.f32 %v9311_v19, %v7989_v39  ;;  %v10150_v39 = vld [vmem:[%s12698_s14 + $0xf4] ss:$20 sps:$4 sm:$0xff]   ;;  %v10156_v19 = vld [vmem:[%s12698_s14 + $0xcc] ss:$20 sps:$4 sm:$0xff]  }
 0x574   :  { %v9313_v25 = vpop.f32.mrf.mxu1  ;;  %v10154_v13 = vld [vmem:[%s12698_s14 + $0xc8] ss:$20 sps:$4 sm:$0xff]  }
 0x575   :  { %v4419_v45 = vadd.f32 %v4418_v32, %v4379_v9  ;;  %v10135_v32 = vld [vmem:[%s12696_s12 + $0x1c] ss:$36 sps:$4 sm:$0xff]   ;;  %v10162_v9 = vld [vmem:[%s12698_s14 + $0xa4] ss:$20 sps:$4 sm:$0xff]  }
 0x576   :  { %v10160_v25 = vld [vmem:[%s12698_s14 + $0xa0] ss:$20 sps:$4 sm:$0xff]  }
 0x577   :  { %v4425_v47 = vmin.f32 %v4419_v45, 0.0  ;;  %vm4424_vm10 = vcmp.gt.f32.partialorder %v4419_v45, 0.0 }
 0x579   :  { %v4426_v48 = vmul.f32 1.442695, %v4425_v47  ;;  %v10166_v47 = vld [vmem:[%s12698_s14 + $0x78] ss:$20 sps:$4 sm:$0xff]  }
 0x57b   :  { %10534 = vpow2.f32 %v4426_v48  ;;  %v10174_v48 = vld [vmem:[%s12698_s14 + $0x54] ss:$20 sps:$4 sm:$0xff]  }
 0x588   :  { %v10535_v49 = vpop.eup %10534 }
 0x589   :  { %v8012_v51 = vadd.f32 -1.0, %v10535_v49  ;;  %v10172_v49 = vld [vmem:[%s12698_s14 + $0x50] ss:$20 sps:$4 sm:$0xff]  }
 0x58b   :  { %v4429_v53 = vsel %vm4424_vm10, %v4419_v45, %v8012_v51  ;;  %v10168_v45 = vld [vmem:[%s12698_s14 + $0x7c] ss:$20 sps:$4 sm:$0xff]   ;;  %v10180_v51 = vld [vmem:[%s12698_s14 + $0x2c] ss:$20 sps:$4 sm:$0xff]  }
 0x58c   :  { %v11629_v58 = vpack.c.bf16 %v4429_v53, %v4429_v53  ;;  %v10178_v53 = vld [vmem:[%s12698_s14 + $0x28] ss:$20 sps:$4 sm:$0xff]  }
 0x58e   :  { %4624 = vmatmul.mubr.bf16.vlgmr.msra.gmra.mxu0 %v11629_v58  ;;  %9631 = vmatmul.mubr.bf16.vlgmr.msra.gmra.mxu1 %v11629_v58 }
 0x58f   :  { %4839 = vmatpush1.bf16.msra.mxu0 %v10073_v55  ;;  %9635 = vmatpush3.bf16.msra.mxu1 %v10076_v50 }
 0x590   :  { %4840 = vmatprep.subr.bf16.mxu0 %v10079_v46  ;;  %9636 = vmatprep.subr.bf16.mxu1 %v10605_v62 }
 0x591   :  { %4870 = vmatprep.mubr.bf16.mxu0 %v10604_v38  ;;  %9650 = vmatprep.mubr.msk.bf16.mxu1 %vm10606_vm8, %v10605_v62 }
 0x593   :  { %4841 = vmatpush1.bf16.msra.mxu0 %v10077_v54  ;;  %9637 = vmatpush3.bf16.msra.mxu1 %v10080_v60 }
 0x594   :  { %4842 = vmatprep.subr.bf16.mxu0 %v10083_v0  ;;  %9638 = vmatprep.subr.bf16.mxu1 %v10605_v62 }
 0x597   :  { %4843 = vmatpush1.bf16.msra.mxu0 %v10081_v28  ;;  %9639 = vmatpush3.bf16.msra.mxu1 %v10084_v36 }
 0x598   :  { %4844 = vmatprep.subr.bf16.mxu0 %v10087_v52  ;;  %9640 = vmatprep.subr.bf16.mxu1 %v10605_v62 }
 0x59b   :  { %4845 = vmatpush1.bf16.msra.mxu0 %v10085_v63  ;;  %9641 = vmatpush3.bf16.msra.mxu1 %v10088_v1 }
 0x59c   :  { %4846 = vmatprep.subr.bf16.mxu0 %v10091_v3  ;;  %9642 = vmatprep.subr.bf16.mxu1 %v10605_v62 }
 0x59f   :  { %4847 = vmatpush1.bf16.msra.mxu0 %v10089_v4  ;;  %9643 = vmatpush3.bf16.msra.mxu1 %v10092_v41 }
 0x5a0   :  { %4848 = vmatprep.subr.bf16.mxu0 %v10095_v5  ;;  %9644 = vmatprep.subr.bf16.mxu1 %v10605_v62 }
 0x5a3   :  { %4849 = vmatpush1.bf16.msra.mxu0 %v10093_v7  ;;  %9645 = vmatpush3.bf16.msra.mxu1 %v10096_v8 }
 0x5a4   :  { %4850 = vmatprep.subr.bf16.mxu0 %v10099_v10  ;;  %9646 = vmatprep.subr.bf16.mxu1 %v10605_v62 }
 0x5a7   :  { %4851 = vmatpush1.bf16.msra.mxu0 %v10097_v40  ;;  %9647 = vmatpush3.bf16.msra.mxu1 %v10100_v11 }
 0x5a8   :  { %4852 = vmatprep.subr.bf16.mxu0 %v10103_v12  ;;  %9648 = vmatprep.subr.bf16.mxu1 %v10605_v62 }
 0x5ab   :  { %4853 = vmatpush1.bf16.msra.mxu0 %v10101_v14  ;;  %9649 = vmatpush3.bf16.msra.mxu1 %v10104_v15 }
 0x5ac   :  { %5085 = vmatprep.subr.bf16.mxu0 %v10107_v43  ;;  %9654 = vmatprep.subr.bf16.mxu1 %v10605_v62 }
 0x5ae   :  { %4871 = vmatmul.mubr.bf16.vlgmr.msra.gmra.mxu0 %v11629_v58  ;;  %9651 = vmatmul.mubr.bf16.vlgmr.msra.gmra.mxu1 %v11629_v58 }
 0x5af   :  { %5086 = vmatpush1.bf16.msra.mxu0 %v10105_v16  ;;  %9655 = vmatpush3.bf16.msra.mxu1 %v10108_v17 }
 0x5b0   :  { %5087 = vmatprep.subr.bf16.mxu0 %v10111_v2  ;;  %9656 = vmatprep.subr.bf16.mxu1 %v10605_v62 }
 0x5b1   :  { %5117 = vmatprep.mubr.bf16.mxu0 %v10604_v38  ;;  %9670 = vmatprep.mubr.msk.bf16.mxu1 %vm10606_vm8, %v10605_v62 }
 0x5b3   :  { %5088 = vmatpush1.bf16.msra.mxu0 %v10109_v20  ;;  %9657 = vmatpush3.bf16.msra.mxu1 %v10112_v61 }
 0x5b4   :  { %5089 = vmatprep.subr.bf16.mxu0 %v10115_v57  ;;  %9658 = vmatprep.subr.bf16.mxu1 %v10605_v62 }
 0x5b7   :  { %5090 = vmatpush1.bf16.msra.mxu0 %v10113_v6  ;;  %9659 = vmatpush3.bf16.msra.mxu1 %v10116_v44 }
 0x5b8   :  { %5091 = vmatprep.subr.bf16.mxu0 %v10119_v22  ;;  %9660 = vmatprep.subr.bf16.mxu1 %v10605_v62 }
 0x5bb   :  { %5092 = vmatpush1.bf16.msra.mxu0 %v10117_v23  ;;  %9661 = vmatpush3.bf16.msra.mxu1 %v10120_v24  ;;  %v10147_v24 = vld [vmem:[%s12698_s14 + $0x124] ss:$20 sps:$4 sm:$0xff]  }
 0x5bc   :  { %5093 = vmatprep.subr.bf16.mxu0 %v10123_v56  ;;  %9662 = vmatprep.subr.bf16.mxu1 %v10605_v62 }
 0x5bf   :  { %5094 = vmatpush1.bf16.msra.mxu0 %v10121_v59  ;;  %9663 = vmatpush3.bf16.msra.mxu1 %v10124_v18  ;;  %v5172_v59 = vld [vmem:[%s12738_s29] sm:$0x1] }
 0x5c0   :  { %5095 = vmatprep.subr.bf16.mxu0 %v10127_v21  ;;  %9664 = vmatprep.subr.bf16.mxu1 %v10605_v62  ;;  %v10145_v18 = vld [vmem:[%s12698_s14 + $0x120] ss:$20 sps:$4 sm:$0xff]   ;;  %v10153_v21 = vld [vmem:[%s12698_s14 + $0xfc] ss:$20 sps:$4 sm:$0xff]  }
 0x5c3   :  { %5096 = vmatpush1.bf16.msra.mxu0 %v10125_v26  ;;  %9665 = vmatpush3.bf16.msra.mxu1 %v10128_v27  ;;  %v10151_v26 = vld [vmem:[%s12698_s14 + $0xf8] ss:$20 sps:$4 sm:$0xff]   ;;  %v10159_v27 = vld [vmem:[%s12698_s14 + $0xd4] ss:$20 sps:$4 sm:$0xff]  }
 0x5c4   :  { %5097 = vmatprep.subr.bf16.mxu0 %v10131_v29  ;;  %9666 = vmatprep.subr.bf16.mxu1 %v10605_v62  ;;  %v10157_v29 = vld [vmem:[%s12698_s14 + $0xd0] ss:$20 sps:$4 sm:$0xff]  }
 0x5c7   :  { %5098 = vmatpush1.bf16.msra.mxu0 %v10129_v30  ;;  %9667 = vmatpush3.bf16.msra.mxu1 %v10132_v31  ;;  %v10165_v30 = vld [vmem:[%s12698_s14 + $0xac] ss:$20 sps:$4 sm:$0xff]   ;;  %v10163_v31 = vld [vmem:[%s12698_s14 + $0xa8] ss:$20 sps:$4 sm:$0xff]  }
 0x5c8   :  { %5099 = vmatprep.subr.bf16.mxu0 %v10135_v32  ;;  %9668 = vmatprep.subr.bf16.mxu1 %v10605_v62  ;;  %v10171_v32 = vld [vmem:[%s12698_s14 + $0x84] ss:$20 sps:$4 sm:$0xff]  }
 0x5cb   :  { %5100 = vmatpush1.bf16.msra.mxu0 %v10133_v33  ;;  %9669 = vmatpush3.bf16.msra.mxu1 %v10136_v34  ;;  %v10169_v33 = vld [vmem:[%s12698_s14 + $0x80] ss:$20 sps:$4 sm:$0xff]   ;;  %v10177_v34 = vld [vmem:[%s12698_s14 + $0x5c] ss:$20 sps:$4 sm:$0xff]  }
 0x5cc   :  { %9674 = vmatprep.subr.bf16.mxu0 %v10605_v62  ;;  %5546 = vmatprep.subr.bf16.mxu1 %v10144_v37  ;;  %v10183_v37 = vld [vmem:[%s12698_s14 + $0x34] ss:$20 sps:$4 sm:$0xff]  }
 0x5ce   :  { %5118 = vmatmul.mubr.bf16.vlgmr.msra.gmra.mxu0 %v11629_v58  ;;  %9671 = vmatmul.mubr.bf16.vlgmr.msra.gmra.mxu1 %v11629_v58 }
 0x5cf   :  { %9684 = vmatprep.mubr.msk.bf16.mxu0 %vm10606_vm8, %v10605_v62  ;;  %5578 = vmatprep.mubr.bf16.mxu1 %v10604_v38 }
 0x5d0   :  { %5547 = vmatpush1.bf16.msra.mxu1 %v10142_v35  ;;  %v10175_v35 = vld [vmem:[%s12698_s14 + $0x58] ss:$20 sps:$4 sm:$0xff]  }
 0x5d1   :  { %5548 = vmatprep.subr.bf16.mxu1 %v10150_v39  ;;  %v10181_v39 = vld [vmem:[%s12698_s14 + $0x30] ss:$20 sps:$4 sm:$0xff]  }
 0x5d4   :  { %5549 = vmatpush1.bf16.msra.mxu1 %v10148_v42  ;;  %v10186_v42 = vld [vmem:[%s12698_s14 + $0x4] ss:$20 sps:$4 sm:$0xff]  }
 0x5d5   :  { %5550 = vmatprep.subr.bf16.mxu1 %v10156_v19  ;;  %v10184_v19 = vld [vmem:[%s12698_s14] ss:$20 sps:$4 sm:$0xff]  }
 0x5d8   :  { %5551 = vmatpush1.bf16.msra.mxu1 %v10154_v13  ;;  %v10189_v13 = vld [vmem:[%s12698_s14 + $0xc] ss:$20 sps:$4 sm:$0xff]  }
 0x5d9   :  { %5552 = vmatprep.subr.bf16.mxu1 %v10162_v9  ;;  %v10187_v9 = vld [vmem:[%s12698_s14 + $0x8] ss:$20 sps:$4 sm:$0xff]  }
 0x5dc   :  { %5553 = vmatpush1.bf16.msra.mxu1 %v10160_v25  ;;  %v10203_v25 = vld [vmem:[%s12700_s16 + $0x74] ss:$8 sps:$4 sm:$0xff]  }
 0x5dd   :  { %5554 = vmatprep.subr.bf16.mxu1 %v10168_v45  ;;  %v8085_v45 = vld [vmem:[%s12697_s13] ss:$0 sm:$0xff]  ;;  %s12739_s13 = sld [smem:[#allocation15_spill]] }
 0x5e0   :  { %5555 = vmatpush1.bf16.msra.mxu1 %v10166_v47 }
 0x5e1   :  { %5556 = vmatprep.subr.bf16.mxu1 %v10174_v48 }
 0x5e4   :  { %5557 = vmatpush1.bf16.msra.mxu1 %v10172_v49 }
 0x5e5   :  { %5558 = vmatprep.subr.bf16.mxu1 %v10180_v51  ;;  %v10190_v51 = vld [vmem:[%s12698_s14 + $0x128] ss:$20 sps:$4 sm:$0xff]  }
 0x5e8   :  { %5559 = vmatpush1.bf16.msra.mxu1 %v10178_v53 }
 0x5e9   :  { %5560 = vmatprep.subr.bf16.mxu1 %v10186_v42  ;;  %v10248_v42 = vld [vmem:[%s12700_s16 + $0x1f4] ss:$8 sps:$4 sm:$0xff]  }
 0x5ec   :  { %5561 = vmatpush1.bf16.msra.mxu1 %v10184_v19  ;;  %v10246_v19 = vld [vmem:[%s12700_s16 + $0x1f0] ss:$8 sps:$4 sm:$0xff]  }
 0x5ed   :  { %9688 = vmatprep.subr.bf16.mxu1 %v10605_v62 }
 0x64e   :  { %v4625_v55 = vpop.f32.mrf.mxu0  ;;  %v4666_v50 = vpop.f32.mrf.mxu1 }
 0x64f   :  { %v4676_v58 = vpack.c.bf16 %v4666_v50, %v4666_v50 }
 0x650   :  { %v4627_v46 = vpop.f32.mrf.mxu0  ;;  %v9632_v54 = vpop.f32.mrf.mxu1 }
 0x651   :  { %4677 = vst [vmem:[#allocation2 + $0x8] sm:$0xf] %v4676_v58  ;;  %v8978_v60 = vpack.c.bf16 %v4627_v46, %v4625_v55  ;;  %v10201_v55 = vld [vmem:[%s12700_s16 + $0x70] ss:$8 sps:$4 sm:$0xff]   ;;  %v10209_v58 = vld [vmem:[%s12700_s16 + $0x64] ss:$8 sps:$4 sm:$0xff]  }
 0x652   :  { %v4629_v0 = vpop.f32.mrf.mxu0  ;;  %v4669_v28 = vpop.f32.mrf.mxu1  ;;  %v10191_v54 = vld [vmem:[%s12698_s14 + $0x100] ss:$20 sps:$4 sm:$0xff]  }
 0x653   :  { %8979 = vst [vmem:[#allocation2] sm:$0xff] %v8978_v60   ;;  %v10207_v60 = vld [vmem:[%s12700_s16 + $0x60] ss:$8 sps:$4 sm:$0xff]   ;;  %v10215_v0 = vld [vmem:[%s12700_s16 + $0x54] ss:$8 sps:$4 sm:$0xff]  }
 0x654   :  { %v4630_v36 = vpop.f32.mrf.mxu0  ;;  %v9633_v52 = vpop.f32.mrf.mxu1  ;;  %v10192_v28 = vld [vmem:[%s12698_s14 + $0xd8] ss:$20 sps:$4 sm:$0xff]  }
 0x655   :  { %v10213_v36 = vld [vmem:[%s12700_s16 + $0x50] ss:$8 sps:$4 sm:$0xff]   ;;  %v10221_v52 = vld [vmem:[%s12700_s16 + $0x44] ss:$8 sps:$4 sm:$0xff]  }
 0x65a   :  { %v10141_v56 = vld [vmem:[#allocation2] sm:$0xff]  }
 0x66e   :  { %v4872_v63 = vpop.f32.mrf.mxu0  ;;  %v4913_v1 = vpop.f32.mrf.mxu1 }
 0x66f   :  { %v4919_v3 = vpack.c.bf16 %v4872_v63, %v4872_v63  ;;  %v10193_v63 = vld [vmem:[%s12698_s14 + $0xb0] ss:$20 sps:$4 sm:$0xff]  }
 0x670   :  { %v4874_v4 = vpop.f32.mrf.mxu0  ;;  %v9652_v41 = vpop.f32.mrf.mxu1 }
 0x671   :  { %4920 = vst [vmem:[#allocation2 + $0xc] sm:$0xf] %v4919_v3  ;;  %v8983_v5 = vpack.c.bf16 %v4913_v1, %v4874_v4  ;;  %v10219_v1 = vld [vmem:[%s12700_s16 + $0x40] ss:$8 sps:$4 sm:$0xff]   ;;  %v10227_v3 = vld [vmem:[%s12700_s16 + $0x34] ss:$8 sps:$4 sm:$0xff]  }
 0x672   :  { %v4876_v7 = vpop.f32.mrf.mxu0  ;;  %v4916_v8 = vpop.f32.mrf.mxu1  ;;  %v10194_v4 = vld [vmem:[%s12698_s14 + $0x88] ss:$20 sps:$4 sm:$0xff]   ;;  %v10225_v41 = vld [vmem:[%s12700_s16 + $0x30] ss:$8 sps:$4 sm:$0xff]  }
 0x673   :  { %9078 = vst [vmem:[#allocation2 + $0x10] sm:$0xff] %v8983_v5   ;;  %v10233_v5 = vld [vmem:[%s12700_s16 + $0x24] ss:$8 sps:$4 sm:$0xff]   ;;  %v10195_v7 = vld [vmem:[%s12698_s14 + $0x60] ss:$20 sps:$4 sm:$0xff]  }
 0x674   :  { %v4877_v10 = vpop.f32.mrf.mxu0  ;;  %v9653_v40 = vpop.f32.mrf.mxu1  ;;  %v10231_v8 = vld [vmem:[%s12700_s16 + $0x20] ss:$8 sps:$4 sm:$0xff]  }
 0x675   :  { %v10239_v10 = vld [vmem:[%s12700_s16 + $0x14] ss:$8 sps:$4 sm:$0xff]   ;;  %v10196_v40 = vld [vmem:[%s12698_s14 + $0x38] ss:$20 sps:$4 sm:$0xff]  }
 0x678   :  { %v10140_v23 = vld [vmem:[#allocation2 + $0x8] sm:$0xff]  }
 0x67a   :  { %v10139_v22 = vld [vmem:[#allocation2 + $0x10] sm:$0xff]  }
 0x68e   :  { %v5119_v11 = vpop.f32.mrf.mxu0  ;;  %v5160_v12 = vpop.f32.mrf.mxu1 }
 0x68f   :  { %v5170_v14 = vpack.c.bf16 %v5160_v12, %v5160_v12  ;;  %v10245_v12 = vld [vmem:[%s12700_s16 + $0x4] ss:$8 sps:$4 sm:$0xff]  }
 0x690   :  { %v5121_v15 = vpop.f32.mrf.mxu0  ;;  %v9672_v43 = vpop.f32.mrf.mxu1 }
 0x691   :  { %5171 = vst [vmem:[#allocation2 + $0x20] sm:$0xf] %v5170_v14  ;;  %v8988_v16 = vpack.c.bf16 %v5121_v15, %v5119_v11  ;;  %v10237_v11 = vld [vmem:[%s12700_s16 + $0x10] ss:$8 sps:$4 sm:$0xff]   ;;  %v10200_v15 = vld [vmem:[%s12700_s16 + $0x174] ss:$8 sps:$4 sm:$0xff]  }
 0x692   :  { %v5123_v17 = vpop.f32.mrf.mxu0  ;;  %v5163_v2 = vpop.f32.mrf.mxu1  ;;  %v10197_v14 = vld [vmem:[%s12698_s14 + $0x10] ss:$20 sps:$4 sm:$0xff]   ;;  %v10243_v43 = vld [vmem:[%s12700_s16] ss:$8 sps:$4 sm:$0xff]   ;;  %s10609_s14 = smov [#allocation4]  }
 0x693   :  { %9079 = vst [vmem:[#allocation2 + $0x18] sm:$0xff] %v8988_v16   ;;  %v10251_v16 = vld [vmem:[%s12700_s16 + $0xf4] ss:$8 sps:$4 sm:$0xff]   ;;  %v10198_v17 = vld [vmem:[%s12700_s16 + $0x170] ss:$8 sps:$4 sm:$0xff]   ;;  %s7497_s9 = sshll.u32 %s10609_s14, 4  ;;  %s7498_s9 = int_to_ptr.vmem [resolvable:$true] %s7497_s9 }
 0x694   :  { %v5124_v20 = vpop.f32.mrf.mxu0  ;;  %v9673_v61 = vpop.f32.mrf.mxu1  ;;  %v10249_v2 = vld [vmem:[%s12700_s16 + $0xf0] ss:$8 sps:$4 sm:$0xff]  }
 0x695   :  { %v10257_v20 = vld [vmem:[%s12700_s16 + $0xe4] ss:$8 sps:$4 sm:$0xff]   ;;  %v10204_v61 = vld [vmem:[%s12700_s16 + $0x160] ss:$8 sps:$4 sm:$0xff]  }
 0x698   :  { %v10137_v57 = vld [vmem:[#allocation2 + $0x20] ss:$0 sps:$4 sm:$0xff]  }
 0x699   :  { %v5220_v6 = vsel %vm210_vm0, %v10137_v57, 0  ;;  %v10212_v57 = vld [vmem:[%s12700_s16 + $0x154] ss:$8 sps:$4 sm:$0xff]   ;;  %vm5688_vm0 = vcmask 1041408  }
 0x69a   :  { %9675 = vmatpush3.bf16.msra.mxu0 %v5220_v6  ;;  %v10138_v44 = vld [vmem:[#allocation2 + $0x18] sm:$0xff]   ;;  %v10255_v6 = vld [vmem:[%s12700_s16 + $0xe0] ss:$8 sps:$4 sm:$0xff]  }
 0x69b   :  { %9676 = vmatprep.subr.bf16.mxu0 %v10605_v62 }
 0x69e   :  { %9677 = vmatpush3.bf16.msra.mxu0 %v10138_v44  ;;  %v10263_v44 = vld [vmem:[%s12700_s16 + $0xd4] ss:$8 sps:$4 sm:$0xff]  }
 0x69f   :  { %9678 = vmatprep.subr.bf16.mxu0 %v10605_v62 }
 0x6a2   :  { %9679 = vmatpush3.bf16.msra.mxu0 %v10139_v22  ;;  %v10210_v22 = vld [vmem:[%s12700_s16 + $0x150] ss:$8 sps:$4 sm:$0xff]  }
 0x6a3   :  { %9680 = vmatprep.subr.bf16.mxu0 %v10605_v62 }
 0x6a6   :  { %9681 = vmatpush3.bf16.msra.mxu0 %v10140_v23  ;;  %v10218_v23 = vld [vmem:[%s12700_s16 + $0x144] ss:$8 sps:$4 sm:$0xff]  }
 0x6a7   :  { %9682 = vmatprep.subr.bf16.mxu0 %v10605_v62 }
 0x6aa   :  { %9683 = vmatpush3.bf16.msra.mxu0 %v10141_v56  ;;  %v10269_v56 = vld [vmem:[%s12700_s16 + $0xc4] ss:$8 sps:$4 sm:$0xff]  }
 0x6ab   :  { %5587 = vmatprep.subr.bf16.mxu0 %v10147_v24  ;;  %v10261_v24 = vld [vmem:[%s12700_s16 + $0xd0] ss:$8 sps:$4 sm:$0xff]  }
 0x6ad   :  { %9685 = vmatmul.mubr.msk.bf16.vlgmr.msra.gmra.mxu0 %vm185_vm1, %v5172_v59  ;;  %v10216_v59 = vld [vmem:[%s12700_s16 + $0x140] ss:$8 sps:$4 sm:$0xff]   ;;  %vm5689_vm1 = vcmask 1043458  }
 0x6ae   :  { %5588 = vmatpush1.bf16.msra.mxu0 %v10145_v18  ;;  %5619 = vmatprep.mubr.bf16.mxu0 %v10604_v38  ;;  %v10224_v18 = vld [vmem:[%s12700_s16 + $0x134] ss:$8 sps:$4 sm:$0xff]   ;;  %vm12175_vm11 = vmor %vm5689_vm1, %vm5688_vm0 }
 0x6af   :  { %5589 = vmatprep.subr.bf16.mxu0 %v10153_v21  ;;  %v10267_v21 = vld [vmem:[%s12700_s16 + $0xc0] ss:$8 sps:$4 sm:$0xff]   ;;  %vm12200_vm13 = vmor %vm5691_vm12, %vm12175_vm11 }
 0x6b2   :  { %5590 = vmatpush1.bf16.msra.mxu0 %v10151_v26  ;;  %v10275_v26 = vld [vmem:[%s12700_s16 + $0xb4] ss:$8 sps:$4 sm:$0xff]  }
 0x6b3   :  { %5591 = vmatprep.subr.bf16.mxu0 %v10159_v27  ;;  %v10222_v27 = vld [vmem:[%s12700_s16 + $0x130] ss:$8 sps:$4 sm:$0xff]  }
 0x6b6   :  { %5592 = vmatpush1.bf16.msra.mxu0 %v10157_v29  ;;  %v10230_v29 = vld [vmem:[%s12700_s16 + $0x124] ss:$8 sps:$4 sm:$0xff]  }
 0x6b7   :  { %5593 = vmatprep.subr.bf16.mxu0 %v10165_v30  ;;  %v10273_v30 = vld [vmem:[%s12700_s16 + $0xb0] ss:$8 sps:$4 sm:$0xff]  }
 0x6ba   :  { %5594 = vmatpush1.bf16.msra.mxu0 %v10163_v31  ;;  %v10281_v31 = vld [vmem:[%s12700_s16 + $0xa4] ss:$8 sps:$4 sm:$0xff]  }
 0x6bb   :  { %5595 = vmatprep.subr.bf16.mxu0 %v10171_v32  ;;  %v10228_v32 = vld [vmem:[%s12700_s16 + $0x120] ss:$8 sps:$4 sm:$0xff]  }
 0x6be   :  { %5596 = vmatpush1.bf16.msra.mxu0 %v10169_v33  ;;  %v10236_v33 = vld [vmem:[%s12700_s16 + $0x114] ss:$8 sps:$4 sm:$0xff]  }
 0x6bf   :  { %5597 = vmatprep.subr.bf16.mxu0 %v10177_v34  ;;  %v10279_v34 = vld [vmem:[%s12700_s16 + $0xa0] ss:$8 sps:$4 sm:$0xff]  }
 0x6c2   :  { %5598 = vmatpush1.bf16.msra.mxu0 %v10175_v35  ;;  %v10234_v35 = vld [vmem:[%s12700_s16 + $0x110] ss:$8 sps:$4 sm:$0xff]  }
 0x6c3   :  { %5599 = vmatprep.subr.bf16.mxu0 %v10183_v37  ;;  %v10242_v37 = vld [vmem:[%s12700_s16 + $0x104] ss:$8 sps:$4 sm:$0xff]  }
 0x6c6   :  { %5600 = vmatpush1.bf16.msra.mxu0 %v10181_v39  ;;  %v10240_v39 = vld [vmem:[%s12700_s16 + $0x100] ss:$8 sps:$4 sm:$0xff]  }
 0x6c7   :  { %5601 = vmatprep.subr.bf16.mxu0 %v10189_v13  ;;  %v10254_v13 = vld [vmem:[%s12700_s16 + $0x1e4] ss:$8 sps:$4 sm:$0xff]  }
 0x6ca   :  { %5602 = vmatpush1.bf16.msra.mxu0 %v10187_v9  ;;  %v10287_v9 = vld [vmem:[%s12700_s16 + $0x94] ss:$8 sps:$4 sm:$0xff]  }
 0x6cb   :  { %6147 = vmatprep.subr.bf16.mxu0 %v10203_v25  ;;  %v10285_v25 = vld [vmem:[%s12700_s16 + $0x90] ss:$8 sps:$4 sm:$0xff]  }
 0x76d   :  { %v5256_v47 = vpop.f32.mrf.mxu0 }
 0x76e   :  { %v5257_v48 = vadd.f32 %v8085_v45, %v5256_v47  ;;  %v10252_v45 = vld [vmem:[%s12700_s16 + $0x1e0] ss:$8 sps:$4 sm:$0xff]   ;;  %v10260_v47 = vld [vmem:[%s12700_s16 + $0x1d4] ss:$8 sps:$4 sm:$0xff]  }
 0x76f   :  { %v9686_v49 = vpop.f32.mrf.mxu0 }
 0x770   :  { %v11913_v53 = vpack.c.bf16 %v5257_v48, %v5257_v48  ;;  %v10293_v48 = vld [vmem:[%s12700_s16 + $0x84] ss:$8 sps:$4 sm:$0xff]   ;;  %v10291_v49 = vld [vmem:[%s12700_s16 + $0x80] ss:$8 sps:$4 sm:$0xff]  }
 0x771   :  { %v5259_v50 = vpop.f32.mrf.mxu0 }
 0x772   :  { %5579 = vmatmul.mubr.bf16.vlgmr.msra.gmra.mxu1 %v11913_v53  ;;  %5620 = vmatmul.mubr.bf16.vlgmr.msra.gmra.mxu0 %v11913_v53  ;;  %v10272_v50 = vld [vmem:[%s12700_s16 + $0x1b4] ss:$8 sps:$4 sm:$0xff]  }
 0x773   :  { %9689 = vmatpush3.bf16.msra.mxu1 %v10190_v51  ;;  %v9687_v46 = vpop.f32.mrf.mxu0  ;;  %9704 = vmatprep.mubr.msk.bf16.mxu1 %vm10606_vm8, %v10605_v62  ;;  %v10258_v51 = vld [vmem:[%s12700_s16 + $0x1d0] ss:$8 sps:$4 sm:$0xff]  }
 0x774   :  { %9690 = vmatprep.subr.bf16.mxu1 %v10605_v62  ;;  %6148 = vmatpush1.bf16.msra.mxu0 %v10201_v55  ;;  %v10264_v55 = vld [vmem:[%s12700_s16 + $0x1c0] ss:$8 sps:$4 sm:$0xff]   ;;  %v10278_v46 = vld [vmem:[%s12700_s16 + $0x1a4] ss:$8 sps:$4 sm:$0xff]  }
 0x775   :  { %6149 = vmatprep.subr.bf16.mxu0 %v10209_v58  ;;  %v10270_v58 = vld [vmem:[%s12700_s16 + $0x1b0] ss:$8 sps:$4 sm:$0xff]  }
 0x777   :  { %9691 = vmatpush3.bf16.msra.mxu1 %v10191_v54  ;;  %v10276_v54 = vld [vmem:[%s12700_s16 + $0x1a0] ss:$8 sps:$4 sm:$0xff]  }
 0x778   :  { %9692 = vmatprep.subr.bf16.mxu1 %v10605_v62  ;;  %6150 = vmatpush1.bf16.msra.mxu0 %v10207_v60  ;;  %v10284_v60 = vld [vmem:[%s12700_s16 + $0x194] ss:$8 sps:$4 sm:$0xff]  }
 0x779   :  { %6151 = vmatprep.subr.bf16.mxu0 %v10215_v0  ;;  %v10308_v0 = vld [vmem:[%s12700_s16 + $0x234] ss:$8 sps:$4 sm:$0xff]  }
 0x77b   :  { %9693 = vmatpush3.bf16.msra.mxu1 %v10192_v28  ;;  %v10282_v28 = vld [vmem:[%s12700_s16 + $0x190] ss:$8 sps:$4 sm:$0xff]  }
 0x77c   :  { %9694 = vmatprep.subr.bf16.mxu1 %v10605_v62  ;;  %6152 = vmatpush1.bf16.msra.mxu0 %v10213_v36  ;;  %v10290_v36 = vld [vmem:[%s12700_s16 + $0x184] ss:$8 sps:$4 sm:$0xff]  }
 0x77d   :  { %6153 = vmatprep.subr.bf16.mxu0 %v10221_v52  ;;  %v10288_v52 = vld [vmem:[%s12700_s16 + $0x180] ss:$8 sps:$4 sm:$0xff]  }
 0x77f   :  { %9695 = vmatpush3.bf16.msra.mxu1 %v10193_v63  ;;  %v10296_v63 = vld [vmem:[%s12704_s20 + $0x74] ss:$8 sps:$4 sm:$0xff]  }
 0x780   :  { %9696 = vmatprep.subr.bf16.mxu1 %v10605_v62  ;;  %6154 = vmatpush1.bf16.msra.mxu0 %v10219_v1  ;;  %v6521_v1 = vld [vmem:[%s12739_s13] sm:$0x3] }
 0x781   :  { %6155 = vmatprep.subr.bf16.mxu0 %v10227_v3  ;;  %6525 = vperm.xlu0 %9716, %v6521_v1   ;;  %v5313_v3 = vlaneseq }
 0x783   :  { %9697 = vmatpush3.bf16.msra.mxu1 %v10194_v4  ;;  %v12146_v4 = vshrl.u32 %v5313_v3, 7  ;;  %v10327_v3 = vld [vmem:[%s12704_s20] ss:$8 sps:$4 sm:$0xff]  }
 0x784   :  { %9698 = vmatprep.subr.bf16.mxu1 %v10605_v62  ;;  %6156 = vmatpush1.bf16.msra.mxu0 %v10225_v41 }
 0x785   :  { %6157 = vmatprep.subr.bf16.mxu0 %v10233_v5  ;;  %v12149_v41 = vsub.s32 0, %v12146_v4  ;;  %v12154_v5 = vld [vmem:[%s12699_s15] sm:$0x1f] }
 0x787   :  { %9699 = vmatpush3.bf16.msra.mxu1 %v10195_v7  ;;  %v5323_v7 = vsub.s32 2, %v12146_v4 }
 0x788   :  { %9700 = vmatprep.subr.bf16.mxu1 %v10605_v62  ;;  %6158 = vmatpush1.bf16.msra.mxu0 %v10231_v8  ;;  %v10607_v8 = vmov 1983009808  }
 0x789   :  { %6159 = vmatprep.subr.bf16.mxu0 %v10239_v10  ;;  %v5673_v10 = vunpack.c.l.s4 %v10607_v8  ;;  %v10332_v8 = vld [vmem:[%s12704_s20 + $0xf4] ss:$8 sps:$4 sm:$0xff]  }
 0x78b   :  { %9701 = vmatpush3.bf16.msra.mxu1 %v10196_v40  ;;  %v12158_v40 = vsub.s32 1, %v12146_v4 }
 0x78c   :  { %9702 = vmatprep.subr.bf16.mxu1 %v10605_v62  ;;  %6160 = vmatpush1.bf16.msra.mxu0 %v10237_v11  ;;  %v10206_v62 = vld [vmem:[%s12700_s16 + $0x164] ss:$8 sps:$4 sm:$0xff]   ;;  %v5327_v11 = vsub.s32 3, %v12146_v4 }
 0x78d   :  { %6161 = vmatprep.subr.bf16.mxu0 %v10245_v12  ;;  %v5316_v12 = vrot.slane %v12154_v5, %v12149_v41 }
 0x78f   :  { %9703 = vmatpush3.bf16.msra.mxu1 %v10197_v14  ;;  %v5324_v14 = vrot.slane %v12154_v5, %v5323_v7 }
 0x790   :  { %6188 = vmatprep.subr.bf16.mxu1 %v10200_v15  ;;  %6162 = vmatpush1.bf16.msra.mxu0 %v10243_v43  ;;  %v5674_v15 = vunpack.c.0.s8 %v5673_v10  ;;  %v5320_v43 = vrot.slane %v12154_v5, %v12158_v40 }
 0x791   :  { %6163 = vmatprep.subr.bf16.mxu0 %v10251_v16 }
 0x792   :  { %9705 = vmatmul.mubr.bf16.vlgmr.msra.gmra.mxu1 %v11913_v53  ;;  %v10266_v53 = vld [vmem:[%s12700_s16 + $0x1c4] ss:$8 sps:$4 sm:$0xff]  }
 0x793   :  { %6189 = vmatpush1.bf16.msra.mxu1 %v10198_v17 }
 0x794   :  { %6190 = vmatprep.subr.bf16.mxu1 %v10206_v62  ;;  %6164 = vmatpush2.bf16.msra.mxu0 %v10249_v2  ;;  %v5328_v62 = vrot.slane %v12154_v5, %v5327_v11 }
 0x795   :  { %6165 = vmatprep.subr.bf16.mxu0 %v10257_v20 }
 0x797   :  { %6191 = vmatpush1.bf16.msra.mxu1 %v10204_v61 }
 0x798   :  { %6192 = vmatprep.subr.bf16.mxu1 %v10212_v57  ;;  %6166 = vmatpush2.bf16.msra.mxu0 %v10255_v6  ;;  %v12170_v6 = vsub.s32 %v5674_v15, %v12146_v4  ;;  %v10333_v15 = vld [vmem:[%s12704_s20 + $0xe0] ss:$8 sps:$4 sm:$0xff]  }
 0x799   :  { %6167 = vmatprep.subr.bf16.mxu0 %v10263_v44 }
 0x79b   :  { %6193 = vmatpush1.bf16.msra.mxu1 %v10210_v22 }
 0x79c   :  { %6194 = vmatprep.subr.bf16.mxu1 %v10218_v23  ;;  %6168 = vmatpush2.bf16.msra.mxu0 %v10261_v24 }
 0x79d   :  { %6169 = vmatprep.subr.bf16.mxu0 %v10269_v56 }
 0x79f   :  { %6195 = vmatpush1.bf16.msra.mxu1 %v10216_v59 }
 0x7a0   :  { %6196 = vmatprep.subr.bf16.mxu1 %v10224_v18  ;;  %6170 = vmatpush2.bf16.msra.mxu0 %v10267_v21  ;;  %v10306_v18 = vld [vmem:[%s12700_s16 + $0x230] ss:$8 sps:$4 sm:$0xff]   ;;  %v10357_v21 = vld [vmem:[%s12704_s20 + $0x220] ss:$8 sps:$4 sm:$0xff]  }
 0x7a1   :  { %6171 = vmatprep.subr.bf16.mxu0 %v10275_v26 }
 0x7a3   :  { %6197 = vmatpush1.bf16.msra.mxu1 %v10222_v27 }
 0x7a4   :  { %6198 = vmatprep.subr.bf16.mxu1 %v10230_v29  ;;  %6172 = vmatpush2.bf16.msra.mxu0 %v10273_v30 }
 0x7a5   :  { %6173 = vmatprep.subr.bf16.mxu0 %v10281_v31  ;;  %v10294_v31 = vld [vmem:[%s12704_s20 + $0x70] ss:$8 sps:$4 sm:$0xff]  }
 0x7a7   :  { %6199 = vmatpush1.bf16.msra.mxu1 %v10228_v32 }
 0x7a8   :  { %6200 = vmatprep.subr.bf16.mxu1 %v10236_v33  ;;  %6174 = vmatpush2.bf16.msra.mxu0 %v10279_v34  ;;  %v10299_v34 = vld [vmem:[%s12704_s20 + $0x64] ss:$8 sps:$4 sm:$0xff]  }
 0x7a9   :  { %6175 = vmatprep.subr.bf16.mxu0 %v10287_v9  ;;  %v10320_v9 = vld [vmem:[%s12700_s16 + $0x214] ss:$8 sps:$4 sm:$0xff]  }
 0x7ab   :  { %6201 = vmatpush1.bf16.msra.mxu1 %v10234_v35  ;;  %v10314_v35 = vld [vmem:[%s12700_s16 + $0x224] ss:$8 sps:$4 sm:$0xff]  }
 0x7ac   :  { %6202 = vmatprep.subr.bf16.mxu1 %v10242_v37  ;;  %6176 = vmatpush2.bf16.msra.mxu0 %v10285_v25  ;;  %v10302_v25 = vld [vmem:[%s12704_s20 + $0x54] ss:$8 sps:$4 sm:$0xff]  }
 0x7ad   :  { %6177 = vmatprep.subr.bf16.mxu0 %v10293_v48  ;;  %v10326_v48 = vld [vmem:[%s12700_s16 + $0x204] ss:$8 sps:$4 sm:$0xff]  }
 0x7af   :  { %6203 = vmatpush1.bf16.msra.mxu1 %v10240_v39 }
 0x7b0   :  { %6204 = vmatprep.subr.bf16.mxu1 %v10248_v42  ;;  %6178 = vmatpush2.bf16.msra.mxu0 %v10291_v49  ;;  %v10312_v42 = vld [vmem:[%s12700_s16 + $0x220] ss:$8 sps:$4 sm:$0xff]   ;;  %v10305_v49 = vld [vmem:[%s12704_s20 + $0x44] ss:$8 sps:$4 sm:$0xff]  }
 0x7b1   :  { %6237 = vmatprep.subr.bf16.mxu0 %v10308_v0 }
 0x7b3   :  { %6205 = vmatpush2.bf16.msra.mxu1 %v10246_v19 }
 0x7b4   :  { %6206 = vmatprep.subr.bf16.mxu1 %v10254_v13  ;;  %v10297_v13 = vld [vmem:[%s12704_s20 + $0x60] ss:$8 sps:$4 sm:$0xff]  }
 0x7b7   :  { %6207 = vmatpush2.bf16.msra.mxu1 %v10252_v45  ;;  %v10318_v45 = vld [vmem:[%s12700_s16 + $0x210] ss:$8 sps:$4 sm:$0xff]  }
 0x7b8   :  { %6208 = vmatprep.subr.bf16.mxu1 %v10260_v47  ;;  %v10300_v47 = vld [vmem:[%s12704_s20 + $0x50] ss:$8 sps:$4 sm:$0xff]  }
 0x7bb   :  { %6209 = vmatpush2.bf16.msra.mxu1 %v10258_v51  ;;  %v10324_v51 = vld [vmem:[%s12700_s16 + $0x200] ss:$8 sps:$4 sm:$0xff]  }
 0x7bc   :  { %6210 = vmatprep.subr.bf16.mxu1 %v10266_v53  ;;  %v10303_v53 = vld [vmem:[%s12704_s20 + $0x40] ss:$8 sps:$4 sm:$0xff]  }
 0x7bf   :  { %6211 = vmatpush2.bf16.msra.mxu1 %v10264_v55  ;;  %v10311_v55 = vld [vmem:[%s12704_s20 + $0x34] ss:$8 sps:$4 sm:$0xff]  }
 0x7c0   :  { %6212 = vmatprep.subr.bf16.mxu1 %v10272_v50  ;;  %v10309_v50 = vld [vmem:[%s12704_s20 + $0x30] ss:$8 sps:$4 sm:$0xff]  }
 0x7c3   :  { %6213 = vmatpush2.bf16.msra.mxu1 %v10270_v58  ;;  %v10317_v58 = vld [vmem:[%s12704_s20 + $0x24] ss:$8 sps:$4 sm:$0xff]  }
 0x7c4   :  { %6214 = vmatprep.subr.bf16.mxu1 %v10278_v46  ;;  %v5331_v46 = vsub.s32 4, %v12146_v4 }
 0x7c6   :  { %v5332_v0 = vrot.slane %v12154_v5, %v5331_v46 }
 0x7c7   :  { %6215 = vmatpush2.bf16.msra.mxu1 %v10276_v54  ;;  %v10315_v54 = vld [vmem:[%s12704_s20 + $0x20] ss:$8 sps:$4 sm:$0xff]  }
 0x7c8   :  { %6216 = vmatprep.subr.bf16.mxu1 %v10284_v60  ;;  %v10323_v60 = vld [vmem:[%s12704_s20 + $0x14] ss:$8 sps:$4 sm:$0xff]  }
 0x7cb   :  { %6217 = vmatpush2.bf16.msra.mxu1 %v10282_v28  ;;  %v10321_v28 = vld [vmem:[%s12704_s20 + $0x10] ss:$8 sps:$4 sm:$0xff]  }
 0x7cc   :  { %6218 = vmatprep.subr.bf16.mxu1 %v10290_v36  ;;  %v10329_v36 = vld [vmem:[%s12704_s20 + $0x4] ss:$8 sps:$4 sm:$0xff]  }
 0x7cf   :  { %6219 = vmatpush2.bf16.msra.mxu1 %v10288_v52 }
 0x7d0   :  { %6901 = vmatprep.subr.bf16.mxu1 %v10296_v63 }
 0x832   :  { %v5580_v16 = vpop.f32.mrf.mxu1  ;;  %v5621_v17 = vpop.f32.mrf.mxu0 }
 0x833   :  { %v5581_v2 = vadd.f32 %v5580_v16, %v5316_v12  ;;  %v5622_v57 = vadd.f32 %v5621_v17, %v5324_v14  ;;  %v10330_v12 = vld [vmem:[%s12704_s20 + $0xf0] ss:$8 sps:$4 sm:$0xff]   ;;  %v10335_v14 = vld [vmem:[%s12704_s20 + $0xe4] ss:$8 sps:$4 sm:$0xff]  }
 0x834   :  { %v5582_v20 = vpop.f32.mrf.mxu1  ;;  %v5623_v61 = vpop.f32.mrf.mxu0  ;;  %v10336_v16 = vld [vmem:[%s12704_s20 + $0xd0] ss:$8 sps:$4 sm:$0xff]   ;;  %v10341_v17 = vld [vmem:[%s12704_s20 + $0xc4] ss:$8 sps:$4 sm:$0xff]  }
 0x835   :  { %v5583_v44 = vadd.f32 %v5582_v20, %v5320_v43  ;;  %v5624_v22 = vadd.f32 %v5623_v61, %v5328_v62  ;;  %v12179_v26 = vpack.c.bf16 %v5581_v2, %v5581_v2  ;;  %v5685_v32 = vrot.slane %v5622_v57, %v12170_v6  ;;  %v10338_v43 = vld [vmem:[%s12704_s20 + $0xd4] ss:$8 sps:$4 sm:$0xff]   ;;  %v10339_v62 = vld [vmem:[%s12704_s20 + $0xc0] ss:$8 sps:$4 sm:$0xff]   ;;  %v10342_v20 = vld [vmem:[%s12704_s20 + $0xb0] ss:$8 sps:$4 sm:$0xff]  }
 0x836   :  { %v5584_v23 = vpop.f32.mrf.mxu1  ;;  %v5625_v24 = vpop.f32.mrf.mxu0  ;;  %v12187_v33 = vpack.c.bf16 %v5622_v57, %v5622_v57  ;;  %v10347_v61 = vld [vmem:[%s12704_s20 + $0xa4] ss:$8 sps:$4 sm:$0xff]   ;;  %v10345_v57 = vld [vmem:[%s12704_s20 + $0xa0] ss:$8 sps:$4 sm:$0xff]  }
 0x837   :  { %v5671_v56 = vcombine.low %v5581_v2, %v5583_v44  ;;  %v5695_v59 = vpack.c.bf16 %v5583_v44, %v5583_v44  ;;  %v12181_v27 = vpack.c.bf16 %v5624_v22, %v5624_v22  ;;  %v10344_v2 = vld [vmem:[%s12704_s20 + $0xb4] ss:$8 sps:$4 sm:$0xff]   ;;  %v10348_v22 = vld [vmem:[%s12704_s20 + $0x90] ss:$8 sps:$4 sm:$0xff]   ;;  %v10353_v23 = vld [vmem:[%s12704_s20 + $0x84] ss:$8 sps:$4 sm:$0xff]  }
 0x838   :  { %v5585_v29 = vpop.f32.mrf.mxu1  ;;  %v5626_v30 = vpop.f32.mrf.mxu0  ;;  %v10350_v44 = vld [vmem:[%s12704_s20 + $0x94] ss:$8 sps:$4 sm:$0xff]   ;;  %v10351_v24 = vld [vmem:[%s12704_s20 + $0x80] ss:$8 sps:$4 sm:$0xff]  }
 0x839   :  { %6179 = vmatprep.mubr.bf16.mxu0 %v5695_v59  ;;  %v5678_v37 = vrot.slane %v5671_v56, %v12170_v6  ;;  %6220 = vmatprep.mubr.bf16.mxu1 %v12181_v27  ;;  %v10356_v56 = vld [vmem:[%s12704_s20 + $0x234] ss:$8 sps:$4 sm:$0xff]  }
 0x83a   :  { %6180 = vmatmul.mubr.bf16.vlgmr.msra.gmra.mxu0 %v12179_v26  ;;  %6221 = vmatmul.mubr.bf16.vlgmr.msra.gmra.mxu1 %v12187_v33  ;;  %v10362_v29 = vld [vmem:[%s12704_s20 + $0x214] ss:$8 sps:$4 sm:$0xff]  }
 0x83b   :  { %6238 = vmatpush1.bf16.msra.mxu0 %v10306_v18  ;;  %v5686_v19 = vcombine.low %v5678_v37, %v5685_v32  ;;  %6902 = vmatpush1.bf16.msra.mxu1 %v10294_v31  ;;  %v10359_v18 = vld [vmem:[%s12704_s20 + $0x224] ss:$8 sps:$4 sm:$0xff]   ;;  %v10366_v30 = vld [vmem:[%s12702_s18 + $0x78] sm:$0xff]   ;;  %v10368_v32 = vld [vmem:[%s12702_s18 + $0x70] sm:$0xff]  }
 0x83c   :  { %6933 = vmatprep.mubr.bf16.mxu1 %v5695_v59  ;;  %6903 = vmatprep.subr.bf16.mxu1 %v10299_v34  ;;  %v10354_v59 = vld [vmem:[%s12704_s20 + $0x230] ss:$8 sps:$4 sm:$0xff]   ;;  %v10363_v37 = vld [vmem:[%s12704_s20 + $0x200] ss:$8 sps:$4 sm:$0xff]  }
 0x83d   :  { %6239 = vmatprep.subr.bf16.mxu0 %v10314_v35  ;;  %5693 = vst.msk [vmem:[#allocation4] sm:$0x3f] %vm12200_vm13, %v5686_v19  ;;  %6261 = vmatprep.mubr.bf16.mxu0 %v10604_v38  ;;  %v10360_v31 = vld [vmem:[%s12704_s20 + $0x210] ss:$8 sps:$4 sm:$0xff]   ;;  %v10370_v35 = vld [vmem:[%s12702_s18 + $0x68] sm:$0xff]   ;;  %v10372_v19 = vld [vmem:[%s12702_s18 + $0x60] sm:$0xff]  }
 0x83e   :  { %v10369_v34 = vld [vmem:[%s12702_s18 + $0x30] sm:$0xff]  }
 0x83f   :  { %6240 = vmatpush1.bf16.msra.mxu0 %v10312_v42  ;;  %6904 = vmatpush1.bf16.msra.mxu1 %v10297_v13  ;;  %v10371_v42 = vld [vmem:[%s12702_s18 + $0x28] sm:$0xff]   ;;  %v10373_v13 = vld [vmem:[%s12702_s18 + $0x20] sm:$0xff]  }
 0x840   :  { %6241 = vmatprep.subr.bf16.mxu0 %v10320_v9  ;;  %6905 = vmatprep.subr.bf16.mxu1 %v10302_v25  ;;  %v10374_v9 = vld [vmem:[%s12702_s18 + $0x58] sm:$0xff]  }
 0x841   :  { %v10375_v25 = vld [vmem:[%s12702_s18 + $0x18] sm:$0xff]  }
 0x843   :  { %6242 = vmatpush1.bf16.msra.mxu0 %v10318_v45  ;;  %6906 = vmatpush1.bf16.msra.mxu1 %v10300_v47  ;;  %v10376_v45 = vld [vmem:[%s12702_s18 + $0x50] sm:$0xff]  }
 0x844   :  { %6243 = vmatprep.subr.bf16.mxu0 %v10326_v48  ;;  %6907 = vmatprep.subr.bf16.mxu1 %v10305_v49  ;;  %v10377_v47 = vld [vmem:[%s12702_s18 + $0x10] sm:$0xff]   ;;  %v10378_v48 = vld [vmem:[%s12702_s18 + $0x48] sm:$0xff]  }
 0x845   :  { %v10379_v49 = vld [vmem:[%s12702_s18 + $0x8] sm:$0xff]  }
 0x847   :  { %6244 = vmatpush1.bf16.msra.mxu0 %v10324_v51  ;;  %6908 = vmatpush1.bf16.msra.mxu1 %v10303_v53  ;;  %v10380_v51 = vld [vmem:[%s12702_s18 + $0x40] sm:$0xff]  }
 0x848   :  { %6909 = vmatprep.subr.bf16.mxu1 %v10311_v55  ;;  %9360 = vmatprep.subr.bf16.mxu0 %v10366_v30  ;;  %v10381_v53 = vld [vmem:[%s12702_s18] sm:$0xff]   ;;  %v10384_v55 = vld [vmem:[%s12704_s20 + $0x174] ss:$8 sps:$4 sm:$0xff]  }
 0x849   :  { %v10403_v30 = vld [vmem:[%s12704_s20 + $0x100] ss:$8 sps:$4 sm:$0xff]  }
 0x84b   :  { %6910 = vmatpush1.bf16.msra.mxu1 %v10309_v50 }
 0x84c   :  { %6911 = vmatprep.subr.bf16.mxu1 %v10317_v58 }
 0x84f   :  { %6912 = vmatpush1.bf16.msra.mxu1 %v10315_v54 }
 0x850   :  { %6913 = vmatprep.subr.bf16.mxu1 %v10323_v60 }
 0x852   :  { %v5662_v52 = vpop.f32.mrf.mxu1 }
 0x853   :  { %v5663_v63 = vadd.f32 %v5662_v52, %v5332_v0  ;;  %6914 = vmatpush1.bf16.msra.mxu1 %v10321_v28  ;;  %v5771_v52 = vld [vmem:[%s12701_s17] sm:$0x3] }
 0x854   :  { %v9706_v1 = vpop.f32.mrf.mxu1  ;;  %6915 = vmatprep.subr.bf16.mxu1 %v10329_v36 }
 0x855   :  { %v12264_v5 = vpack.c.bf16 %v5663_v63, %v5663_v63  ;;  %v5776_v63 = vrot.slane %v5771_v52, %v12149_v41  ;;  %v5780_v1 = vrot.slane %v5771_v52, %v12158_v40  ;;  %v10433_v52 = vld [vmem:[%s12707_s23 + $0x90] ss:$12 sps:$4 sm:$0xff]  }
 0x856   :  { %v5665_v10 = vpop.f32.mrf.mxu1 }
 0x857   :  { %8204 = vmatmul.mubr.msk.bf16.vlgmr.msra.gmra.mxu0 %vm6143_vm14, %v12264_v5  ;;  %6916 = vmatpush1.bf16.msra.mxu1 %v10327_v3 }
 0x858   :  { %v9707_v11 = vpop.f32.mrf.mxu1  ;;  %6917 = vmatprep.subr.bf16.mxu1 %v10332_v8 }
 0x85b   :  { %6918 = vmatpush2.bf16.msra.mxu1 %v10330_v12 }
 0x85c   :  { %6919 = vmatprep.subr.bf16.mxu1 %v10335_v14 }
 0x85f   :  { %6920 = vmatpush2.bf16.msra.mxu1 %v10333_v15 }
 0x860   :  { %6921 = vmatprep.subr.bf16.mxu1 %v10338_v43 }
 0x863   :  { %6922 = vmatpush2.bf16.msra.mxu1 %v10336_v16 }
 0x864   :  { %6923 = vmatprep.subr.bf16.mxu1 %v10341_v17  ;;  %v10382_v17 = vld [vmem:[%s12704_s20 + $0x170] ss:$8 sps:$4 sm:$0xff]  }
 0x867   :  { %6924 = vmatpush2.bf16.msra.mxu1 %v10339_v62 }
 0x868   :  { %6925 = vmatprep.subr.bf16.mxu1 %v10344_v2 }
 0x86b   :  { %6926 = vmatpush2.bf16.msra.mxu1 %v10342_v20  ;;  %v10387_v20 = vld [vmem:[%s12704_s20 + $0x164] ss:$8 sps:$4 sm:$0xff]  }
 0x86c   :  { %6927 = vmatprep.subr.bf16.mxu1 %v10347_v61  ;;  %v10385_v61 = vld [vmem:[%s12704_s20 + $0x160] ss:$8 sps:$4 sm:$0xff]  }
 0x86f   :  { %6928 = vmatpush2.bf16.msra.mxu1 %v10345_v57  ;;  %v10390_v57 = vld [vmem:[%s12704_s20 + $0x154] ss:$8 sps:$4 sm:$0xff]  }
 0x870   :  { %6929 = vmatprep.subr.bf16.mxu1 %v10350_v44  ;;  %v10388_v44 = vld [vmem:[%s12704_s20 + $0x150] ss:$8 sps:$4 sm:$0xff]  }
 0x873   :  { %6930 = vmatpush2.bf16.msra.mxu1 %v10348_v22  ;;  %v10393_v22 = vld [vmem:[%s12704_s20 + $0x144] ss:$8 sps:$4 sm:$0xff]  }
 0x874   :  { %6931 = vmatprep.subr.bf16.mxu1 %v10353_v23  ;;  %v10396_v23 = vld [vmem:[%s12704_s20 + $0x134] ss:$8 sps:$4 sm:$0xff]  }
 0x877   :  { %6932 = vmatpush2.bf16.msra.mxu1 %v10351_v24  ;;  %v10394_v24 = vld [vmem:[%s12704_s20 + $0x130] ss:$8 sps:$4 sm:$0xff]  }
 0x878   :  { %6991 = vmatprep.subr.bf16.mxu1 %v10356_v56  ;;  %v10399_v56 = vld [vmem:[%s12704_s20 + $0x124] ss:$8 sps:$4 sm:$0xff]  }
 0x87a   :  { %6934 = vmatmul.mubr.bf16.vlgmr.msra.gmra.mxu1 %v12179_v26  ;;  %v10367_v26 = vld [vmem:[%s12702_s18 + $0x38] sm:$0xff]  }
 0x87b   :  { %6992 = vmatpush1.bf16.msra.mxu1 %v10354_v59  ;;  %7015 = vmatprep.mubr.bf16.mxu1 %v10604_v38  ;;  %v10365_v38 = vld [vmem:[%s12704_s20 + $0x204] ss:$8 sps:$4 sm:$0xff]   ;;  %v10397_v59 = vld [vmem:[%s12704_s20 + $0x120] ss:$8 sps:$4 sm:$0xff]  }
 0x87c   :  { %6993 = vmatprep.subr.bf16.mxu1 %v10359_v18  ;;  %9361 = vmatpush3.bf16.msra.mxu0 %v10367_v26  ;;  %v10402_v18 = vld [vmem:[%s12704_s20 + $0x114] ss:$8 sps:$4 sm:$0xff]  }
 0x87d   :  { %9362 = vmatprep.subr.bf16.mxu0 %v10368_v32  ;;  %v10408_v26 = vld [vmem:[%s12704_s20 + $0x1f4] ss:$8 sps:$4 sm:$0xff]  }
 0x87f   :  { %6994 = vmatpush1.bf16.msra.mxu1 %v10357_v21  ;;  %v10400_v21 = vld [vmem:[%s12704_s20 + $0x110] ss:$8 sps:$4 sm:$0xff]  }
 0x880   :  { %6995 = vmatprep.subr.bf16.mxu1 %v10362_v29  ;;  %9363 = vmatpush3.bf16.msra.mxu0 %v10369_v34  ;;  %v10405_v29 = vld [vmem:[%s12704_s20 + $0x104] ss:$8 sps:$4 sm:$0xff]  }
 0x881   :  { %9364 = vmatprep.subr.bf16.mxu0 %v10370_v35  ;;  %v10411_v34 = vld [vmem:[%s12704_s20 + $0x1e4] ss:$8 sps:$4 sm:$0xff]  }
 0x883   :  { %6996 = vmatpush1.bf16.msra.mxu1 %v10360_v31 }
 0x884   :  { %6997 = vmatprep.subr.bf16.mxu1 %v10365_v38  ;;  %9365 = vmatpush3.bf16.msra.mxu0 %v10371_v42  ;;  %v10406_v38 = vld [vmem:[%s12704_s20 + $0x1f0] ss:$8 sps:$4 sm:$0xff]  }
 0x885   :  { %9366 = vmatprep.subr.bf16.mxu0 %v10372_v19  ;;  %v10414_v19 = vld [vmem:[%s12704_s20 + $0x1d4] ss:$8 sps:$4 sm:$0xff]  }
 0x887   :  { %6998 = vmatpush1.bf16.msra.mxu1 %v10363_v37  ;;  %v10409_v37 = vld [vmem:[%s12704_s20 + $0x1e0] ss:$8 sps:$4 sm:$0xff]  }
 0x888   :  { %9367 = vmatpush3.bf16.msra.mxu0 %v10373_v13  ;;  %v10412_v13 = vld [vmem:[%s12704_s20 + $0x1d0] ss:$8 sps:$4 sm:$0xff]  }
 0x889   :  { %9368 = vmatprep.subr.bf16.mxu0 %v10374_v9  ;;  %v10417_v9 = vld [vmem:[%s12704_s20 + $0x1c4] ss:$8 sps:$4 sm:$0xff]  }
 0x88a   :  { %8294 = vmatmul.mubr.msk.bf16.vlgmr.msra.gmra.mxu1 %vm6143_vm14, %v12264_v5 }
 0x88c   :  { %9369 = vmatpush3.bf16.msra.mxu0 %v10375_v25  ;;  %v10415_v25 = vld [vmem:[%s12704_s20 + $0x1c0] ss:$8 sps:$4 sm:$0xff]  }
 0x88d   :  { %9370 = vmatprep.subr.bf16.mxu0 %v10376_v45  ;;  %v10420_v45 = vld [vmem:[%s12704_s20 + $0x1b4] ss:$8 sps:$4 sm:$0xff]  }
 0x890   :  { %9371 = vmatpush3.bf16.msra.mxu0 %v10377_v47 }
 0x891   :  { %9372 = vmatprep.subr.bf16.mxu0 %v10378_v48  ;;  %v10418_v48 = vld [vmem:[%s12704_s20 + $0x1b0] ss:$8 sps:$4 sm:$0xff]  }
 0x894   :  { %9373 = vmatpush3.bf16.msra.mxu0 %v10379_v49 }
 0x895   :  { %9374 = vmatprep.subr.bf16.mxu0 %v10380_v51  ;;  %v10423_v51 = vld [vmem:[%s12704_s20 + $0x1a4] ss:$8 sps:$4 sm:$0xff]  }
 0x898   :  { %9375 = vmatpush3.bf16.msra.mxu0 %v10381_v53 }
 0x899   :  { %6942 = vmatprep.subr.bf16.mxu0 %v10384_v55  ;;  %v10421_v55 = vld [vmem:[%s12704_s20 + $0x1a0] ss:$8 sps:$4 sm:$0xff]  }
 0x8fa   :  { %v6181_v50 = vpop.f32.mrf.mxu0  ;;  %v6222_v58 = vpop.f32.mrf.mxu1 }
 0x8fb   :  { %v6182_v3 = vadd.f32 %v6181_v50, %v5776_v63  ;;  %v10436_v63 = vld [vmem:[%s12707_s23 + $0x78] ss:$12 sps:$4 sm:$0xff]  }
 0x8fc   :  { %v6183_v46 = vpop.f32.mrf.mxu0  ;;  %v6224_v54 = vpop.f32.mrf.mxu1 }
 0x8fd   :  { %v6184_v5 = vadd.f32 %v6183_v46, %v5780_v1  ;;  %v6223_v8 = vadd.f32 %v6222_v58, %v6182_v3  ;;  %v10426_v58 = vld [vmem:[%s12704_s20 + $0x194] ss:$8 sps:$4 sm:$0xff]   ;;  %v10424_v46 = vld [vmem:[%s12704_s20 + $0x190] ss:$8 sps:$4 sm:$0xff]   ;;  %v10439_v3 = vld [vmem:[%s12707_s23 + $0x60] ss:$12 sps:$4 sm:$0xff]  }
 0x8fe   :  { %v6185_v60 = vpop.f32.mrf.mxu0  ;;  %v6226_v0 = vpop.f32.mrf.mxu1  ;;  %v10441_v1 = vld [vmem:[%s12707_s23 + $0x64] ss:$12 sps:$4 sm:$0xff]  }
 0x8ff   :  { %v6225_v11 = vadd.f32 %v6224_v54, %v6184_v5  ;;  %v10429_v54 = vld [vmem:[%s12704_s20 + $0x184] ss:$8 sps:$4 sm:$0xff]   ;;  %v10427_v60 = vld [vmem:[%s12704_s20 + $0x180] ss:$8 sps:$4 sm:$0xff]  }
 0x900   :  { %v6186_v28 = vpop.f32.mrf.mxu0  ;;  %v6227_v36 = vpop.f32.mrf.mxu1  ;;  %v10430_v0 = vld [vmem:[%s12707_s23 + $0xa8] ss:$12 sps:$4 sm:$0xff]   ;;  %v10444_v5 = vld [vmem:[%s12707_s23 + $0x4c] ss:$12 sps:$4 sm:$0xff]  }
 0x901   :  { %v10432_v28 = vld [vmem:[%s12707_s23 + $0xac] ss:$12 sps:$4 sm:$0xff]   ;;  %v10435_v36 = vld [vmem:[%s12707_s23 + $0x94] ss:$12 sps:$4 sm:$0xff]  }
 0x902   :  { %7389 = vmatprep.subr.bf16.mxu1 %v10432_v28  ;;  %v6522_v28 = vld [vmem:[%s12705_s21] sm:$0x3]  ;;  %s10608_s21 = smov [#allocation6]  }
 0x903   :  { %7390 = vmatpush1.bf16.msra.mxu1 %v10430_v0 }
 0x904   :  { %7391 = vmatprep.subr.bf16.mxu1 %v10435_v36  ;;  %v6532_v36 = vrot.slane %v6522_v28, %v12149_v41 }
 0x907   :  { %7392 = vmatpush1.bf16.msra.mxu1 %v10433_v52  ;;  %v6526_v52 = vpop.permute.xlu0 %6525 }
 0x917   :  { %v6263_v10 = vpop.f32.mrf.mxu0 }
 0x918   :  { %v6264_v12 = vadd.f32 %v6263_v10, %v6223_v8  ;;  %v10442_v8 = vld [vmem:[%s12707_s23 + $0x48] ss:$12 sps:$4 sm:$0xff]  }
 0x919   :  { %v6265_v14 = vpop.f32.mrf.mxu0  ;;  %v10447_v10 = vld [vmem:[%s12707_s23 + $0x34] ss:$12 sps:$4 sm:$0xff]  }
 0x91a   :  { %v6266_v15 = vadd.f32 %v6265_v14, %v6225_v11  ;;  %v6270_v62 = vpack.c.bf16 %v6264_v12, %v6264_v12  ;;  %v10445_v11 = vld [vmem:[%s12707_s23 + $0x30] ss:$12 sps:$4 sm:$0xff]   ;;  %v10448_v14 = vld [vmem:[%s12707_s23 + $0x18] ss:$12 sps:$4 sm:$0xff]  }
 0x91b   :  { %v6267_v43 = vpop.f32.mrf.mxu0  ;;  %v10450_v12 = vld [vmem:[%s12707_s23 + $0x1c] ss:$12 sps:$4 sm:$0xff]  }
 0x91c   :  { %v6271_v16 = vpack.c.bf16 %v6266_v15, %v6266_v15  ;;  %v10453_v15 = vld [vmem:[%s12707_s23 + $0x4] ss:$12 sps:$4 sm:$0xff]   ;;  %v10451_v43 = vld [vmem:[%s12707_s23] ss:$12 sps:$4 sm:$0xff]  }
 0x91d   :  { %v6268_v2 = vpop.f32.mrf.mxu0 }
 0x91e   :  { %6439 = vmatprep.mubr.bf16.mxu0 %v6271_v16  ;;  %v10456_v16 = vld [vmem:[%s12707_s23 + $0x16c] ss:$12 sps:$4 sm:$0xff]   ;;  %v10458_v2 = vld [vmem:[%s12707_s23 + $0xb0] ss:$12 sps:$4 sm:$0xff]  }
 0x91f   :  { %6440 = vmatmul.mubr.bf16.vlgmr.msra.gmra.mxu0 %v6270_v62  ;;  %v10454_v62 = vld [vmem:[%s12707_s23 + $0x168] ss:$12 sps:$4 sm:$0xff]  }
 0x920   :  { %6943 = vmatpush1.bf16.msra.mxu0 %v10382_v17  ;;  %6974 = vmatprep.mubr.bf16.mxu0 %v12181_v27  ;;  %v10391_v27 = vld [vmem:[%s12704_s20 + $0x140] ss:$8 sps:$4 sm:$0xff]   ;;  %v10457_v17 = vld [vmem:[%s12707_s23 + $0x170] ss:$12 sps:$4 sm:$0xff]  }
 0x921   :  { %6944 = vmatprep.subr.bf16.mxu0 %v10387_v20  ;;  %v10461_v20 = vld [vmem:[%s12707_s23 + $0x154] ss:$12 sps:$4 sm:$0xff]  }
 0x924   :  { %6945 = vmatpush1.bf16.msra.mxu0 %v10385_v61  ;;  %v10462_v61 = vld [vmem:[%s12707_s23 + $0x158] ss:$12 sps:$4 sm:$0xff]  }
 0x925   :  { %6946 = vmatprep.subr.bf16.mxu0 %v10390_v57  ;;  %v10459_v57 = vld [vmem:[%s12707_s23 + $0x150] ss:$12 sps:$4 sm:$0xff]  }
 0x928   :  { %6947 = vmatpush1.bf16.msra.mxu0 %v10388_v44  ;;  %v10463_v44 = vld [vmem:[%s12707_s23 + $0x98] ss:$12 sps:$4 sm:$0xff]  }
 0x929   :  { %6948 = vmatprep.subr.bf16.mxu0 %v10393_v22  ;;  %v10466_v22 = vld [vmem:[%s12707_s23 + $0x13c] ss:$12 sps:$4 sm:$0xff]  }
 0x92c   :  { %6949 = vmatpush1.bf16.msra.mxu0 %v10391_v27  ;;  %v10467_v27 = vld [vmem:[%s12707_s23 + $0x140] ss:$12 sps:$4 sm:$0xff]  }
 0x92d   :  { %6950 = vmatprep.subr.bf16.mxu0 %v10396_v23  ;;  %v10464_v23 = vld [vmem:[%s12707_s23 + $0x138] ss:$12 sps:$4 sm:$0xff]  }
 0x930   :  { %6951 = vmatpush1.bf16.msra.mxu0 %v10394_v24  ;;  %v10468_v24 = vld [vmem:[%s12707_s23 + $0x80] ss:$12 sps:$4 sm:$0xff]  }
 0x931   :  { %6952 = vmatprep.subr.bf16.mxu0 %v10399_v56  ;;  %v10471_v56 = vld [vmem:[%s12707_s23 + $0x124] ss:$12 sps:$4 sm:$0xff]  }
 0x934   :  { %6953 = vmatpush1.bf16.msra.mxu0 %v10397_v59  ;;  %v10472_v59 = vld [vmem:[%s12707_s23 + $0x128] ss:$12 sps:$4 sm:$0xff]  }
 0x935   :  { %6954 = vmatprep.subr.bf16.mxu0 %v10402_v18  ;;  %v10469_v18 = vld [vmem:[%s12707_s23 + $0x120] ss:$12 sps:$4 sm:$0xff]  }
 0x938   :  { %6955 = vmatpush1.bf16.msra.mxu0 %v10400_v21  ;;  %v10473_v21 = vld [vmem:[%s12707_s23 + $0x68] ss:$12 sps:$4 sm:$0xff]  }
 0x939   :  { %6956 = vmatprep.subr.bf16.mxu0 %v10405_v29  ;;  %v10476_v29 = vld [vmem:[%s12707_s23 + $0x10c] ss:$12 sps:$4 sm:$0xff]  }
 0x93a   :  { %v12449_v31 = vpop.f32.mrf.mxu1 }
 0x93c   :  { %6957 = vmatpush1.bf16.msra.mxu0 %v10403_v30  ;;  %v12454_v32 = vpop.f32.mrf.mxu1  ;;  %v10477_v30 = vld [vmem:[%s12707_s23 + $0x110] ss:$12 sps:$4 sm:$0xff]  }
 0x93d   :  { %6958 = vmatprep.subr.bf16.mxu0 %v10408_v26  ;;  %v10474_v26 = vld [vmem:[%s12707_s23 + $0x108] ss:$12 sps:$4 sm:$0xff]  }
 0x93e   :  { %v6939_v35 = vpop.f32.mrf.mxu1 }
 0x93f   :  { %v10482_v35 = vld [vmem:[%s12707_s23 + $0xf8] ss:$12 sps:$4 sm:$0xff]  }
 0x940   :  { %6959 = vmatpush2.bf16.msra.mxu0 %v10406_v38  ;;  %v6940_v42 = vpop.f32.mrf.mxu1  ;;  %v10478_v38 = vld [vmem:[%s12707_s23 + $0x50] ss:$12 sps:$4 sm:$0xff]  }
 0x941   :  { %6960 = vmatprep.subr.bf16.mxu0 %v10411_v34  ;;  %v10481_v34 = vld [vmem:[%s12707_s23 + $0xf4] ss:$12 sps:$4 sm:$0xff]   ;;  %v10483_v42 = vld [vmem:[%s12707_s23 + $0x38] ss:$12 sps:$4 sm:$0xff]  }
 0x944   :  { %6961 = vmatpush2.bf16.msra.mxu0 %v10409_v37  ;;  %v10479_v37 = vld [vmem:[%s12707_s23 + $0xf0] ss:$12 sps:$4 sm:$0xff]  }
 0x945   :  { %6962 = vmatprep.subr.bf16.mxu0 %v10414_v19  ;;  %v10486_v19 = vld [vmem:[%s12707_s23 + $0xdc] ss:$12 sps:$4 sm:$0xff]  }
 0x948   :  { %6963 = vmatpush2.bf16.msra.mxu0 %v10412_v13  ;;  %v10487_v13 = vld [vmem:[%s12707_s23 + $0xe0] ss:$12 sps:$4 sm:$0xff]  }
 0x949   :  { %6964 = vmatprep.subr.bf16.mxu0 %v10417_v9  ;;  %v10484_v9 = vld [vmem:[%s12707_s23 + $0xd8] ss:$12 sps:$4 sm:$0xff]  }
 0x94a   :  { %v12477_v47 = vpop.f32.mrf.mxu1 }
 0x94c   :  { %6965 = vmatpush2.bf16.msra.mxu0 %v10415_v25  ;;  %v12482_v49 = vpop.f32.mrf.mxu1  ;;  %v10488_v25 = vld [vmem:[%s12707_s23 + $0x20] ss:$12 sps:$4 sm:$0xff]  }
 0x94d   :  { %6966 = vmatprep.subr.bf16.mxu0 %v10420_v45  ;;  %v10491_v45 = vld [vmem:[%s12707_s23 + $0xc4] ss:$12 sps:$4 sm:$0xff]  }
 0x94e   :  { %v7021_v53 = vpop.f32.mrf.mxu1 }
 0x94f   :  { %v10493_v53 = vld [vmem:[%s12707_s23 + $0x8] ss:$12 sps:$4 sm:$0xff]  }
 0x950   :  { %6967 = vmatpush2.bf16.msra.mxu0 %v10418_v48  ;;  %v7022_v50 = vpop.f32.mrf.mxu1  ;;  %v10492_v48 = vld [vmem:[%s12707_s23 + $0xc8] ss:$12 sps:$4 sm:$0xff]  }
 0x951   :  { %6968 = vmatprep.subr.bf16.mxu0 %v10423_v51  ;;  %v10489_v51 = vld [vmem:[%s12707_s23 + $0xc0] ss:$12 sps:$4 sm:$0xff]  }
 0x952   :  { %v8205_v50 = vld [vmem:[%s12703_s19] ss:$0 sm:$0xff] }
 0x954   :  { %6969 = vmatpush2.bf16.msra.mxu0 %v10421_v55 }
 0x955   :  { %6970 = vmatprep.subr.bf16.mxu0 %v10426_v58 }
 0x958   :  { %6971 = vmatpush2.bf16.msra.mxu0 %v10424_v46 }
 0x959   :  { %6972 = vmatprep.subr.bf16.mxu0 %v10429_v54 }
 0x95c   :  { %6973 = vmatpush2.bf16.msra.mxu0 %v10427_v60 }
 0x95d   :  { %9382 = vmatprep.subr.bf16.mxu0 %v10457_v17 }
 0x95f   :  { %6975 = vmatmul.mubr.bf16.vlgmr.msra.gmra.mxu0 %v12187_v33  ;;  %v10438_v33 = vld [vmem:[%s12707_s23 + $0x7c] ss:$12 sps:$4 sm:$0xff]  }
 0x960   :  { %7393 = vmatprep.subr.bf16.mxu1 %v10438_v33  ;;  %9383 = vmatpush3.bf16.msra.mxu0 %v10458_v2  ;;  %v6536_v33 = vrot.slane %v6522_v28, %v12158_v40 }
 0x961   :  { %7394 = vmatpush1.bf16.msra.mxu1 %v10436_v63  ;;  %9384 = vmatprep.subr.bf16.mxu0 %v10462_v61  ;;  %v6539_v63 = vmul.f32 %v6532_v36, %v6526_v52 }
 0x962   :  { %7395 = vmatprep.subr.bf16.mxu1 %v10441_v1  ;;  %v6540_v1 = vmul.f32 %v6536_v33, %v6526_v52 }
 0x964   :  { %9385 = vmatpush3.bf16.msra.mxu0 %v10463_v44 }
 0x965   :  { %7396 = vmatpush1.bf16.msra.mxu1 %v10439_v3  ;;  %9386 = vmatprep.subr.bf16.mxu0 %v10467_v27  ;;  %v7024_v3 = vld [vmem:[%s12706_s22] sm:$0x3]  ;;  %s7507_s22 = sshll.u32 %s10608_s21, 4  ;;  %s7508_s22 = int_to_ptr.vmem [resolvable:$true] %s7507_s22 }
 0x966   :  { %7397 = vmatprep.subr.bf16.mxu1 %v10444_v5  ;;  %v6936_v5 = vadd.f32 %v12449_v31, %v6539_v63  ;;  %s10540_s28 = scalar_lea.vmem %s7508_s22, 32  ;;  %p10545_p1 = scmp.lt.s32.totalorder %s7508_s22, %s7508_s22 }
 0x967   :  { %p10541_p0 = scmp.ne.s32.totalorder %s7508_s22, %s10540_s28  ;;  %p10546_p2 = scmp.lt.s32.totalorder %s10540_s28, %s10540_s28 }
 0x968   :  { %9387 = vmatpush3.bf16.msra.mxu0 %v10468_v24 }
 0x969   :  { %7398 = vmatpush1.bf16.msra.mxu1 %v10442_v8  ;;  %9388 = vmatprep.subr.bf16.mxu0 %v10472_v59  ;;  %p10547_p3 = por %p10546_p2, %p10545_p1 }
 0x96a   :  { %7399 = vmatprep.subr.bf16.mxu1 %v10447_v10  ;;  %v6938_v10 = vadd.f32 %v12454_v32, %v6540_v1 }
 0x96b   :  { %p10548_p4 = pnand %p10547_p3, %p10541_p0 }
 0x96c   :  { %9389 = vmatpush3.bf16.msra.mxu0 %v10473_v21 }
 0x96d   :  { %7400 = vmatpush1.bf16.msra.mxu1 %v10445_v11  ;;  %9390 = vmatprep.subr.bf16.mxu0 %v10477_v30 }
 0x96e   :  { %7401 = vmatprep.subr.bf16.mxu1 %v10450_v12  ;;  %v7029_v12 = vrot.slane %v7024_v3, %v12149_v41 }
 0x970   :  { %9391 = vmatpush3.bf16.msra.mxu0 %v10478_v38 }
 0x971   :  { %7402 = vmatpush1.bf16.msra.mxu1 %v10448_v14  ;;  %9392 = vmatprep.subr.bf16.mxu0 %v10482_v35 }
 0x972   :  { %7403 = vmatprep.subr.bf16.mxu1 %v10453_v15 }
 0x974   :  { %9393 = vmatpush3.bf16.msra.mxu0 %v10483_v42 }
 0x975   :  { %7404 = vmatpush1.bf16.msra.mxu1 %v10451_v43  ;;  %9394 = vmatprep.subr.bf16.mxu0 %v10487_v13 }
 0x976   :  { %7405 = vmatprep.subr.bf16.mxu1 %v10456_v16  ;;  %v7033_v16 = vrot.slane %v7024_v3, %v12158_v40 }
 0x978   :  { %9395 = vmatpush3.bf16.msra.mxu0 %v10488_v25 }
 0x979   :  { %7406 = vmatpush2.bf16.msra.mxu1 %v10454_v62  ;;  %9396 = vmatprep.subr.bf16.mxu0 %v10492_v48 }
 0x97a   :  { %7407 = vmatprep.subr.bf16.mxu1 %v10461_v20 }
 0x97c   :  { %9397 = vmatpush3.bf16.msra.mxu0 %v10493_v53 }
 0x97d   :  { %7408 = vmatpush2.bf16.msra.mxu1 %v10459_v57 }
 0x97e   :  { %7409 = vmatprep.subr.bf16.mxu1 %v10466_v22 }
 0x981   :  { %7410 = vmatpush2.bf16.msra.mxu1 %v10464_v23 }
 0x982   :  { %7411 = vmatprep.subr.bf16.mxu1 %v10471_v56 }
 0x985   :  { %7412 = vmatpush2.bf16.msra.mxu1 %v10469_v18 }
 0x986   :  { %7413 = vmatprep.subr.bf16.mxu1 %v10476_v29 }
 0x989   :  { %7414 = vmatpush2.bf16.msra.mxu1 %v10474_v26 }
 0x98a   :  { %7415 = vmatprep.subr.bf16.mxu1 %v10481_v34 }
 0x98d   :  { %7416 = vmatpush2.bf16.msra.mxu1 %v10479_v37 }
 0x98e   :  { %7417 = vmatprep.subr.bf16.mxu1 %v10486_v19 }
 0x991   :  { %7418 = vmatpush2.bf16.msra.mxu1 %v10484_v9 }
 0x992   :  { %7419 = vmatprep.subr.bf16.mxu1 %v10491_v45 }
 0x995   :  { %7420 = vmatpush2.bf16.msra.mxu1 %v10489_v51 }
 0x9df   :  { %v9376_v55 = vpop.f32.mrf.mxu0 }
 0x9e1   :  { %v9377_v58 = vpop.f32.mrf.mxu0 }
 0x9e2   :  { %v9378_v46 = vadd.f32 %v9377_v58, %v9376_v55 }
 0x9e3   :  { %v9379_v54 = vpop.f32.mrf.mxu0 }
 0x9e4   :  { %v6442_v60 = vadd.f32 %v9378_v46, %v8205_v50 }
 0x9e5   :  { %v9380_v0 = vpop.f32.mrf.mxu0 }
 0x9e6   :  { %6448 = vst.msk [vmem:[#allocation6] sm:$0x3] %vm6447_vm15, %v6442_v60 }
 0xa1f   :  { %v6976_v8 = vpop.f32.mrf.mxu0 }
 0xa20   :  { %v6977_v11 = vadd.f32 %v6976_v8, %v6936_v5 }
 0xa21   :  { %v6978_v14 = vpop.f32.mrf.mxu0 }
 0xa22   :  { %v7018_v15 = vadd.f32 %v12477_v47, %v6977_v11  ;;  %v6979_v43 = vadd.f32 %v6978_v14, %v6938_v10 }
 0xa23   :  { %v6980_v17 = vpop.f32.mrf.mxu0 }
 0xa24   :  { %v7036_v62 = vadd.f32 %v7029_v12, %v7018_v15  ;;  %v7020_v2 = vadd.f32 %v12482_v49, %v6979_v43 }
 0xa25   :  { %v6981_v20 = vpop.f32.mrf.mxu0 }
 0xa26   :  { %v7040_v61 = vmin.f32 %v7036_v62, 0.0  ;;  %v7037_v57 = vadd.f32 %v7033_v16, %v7020_v2  ;;  %vm7038_vm2 = vcmp.gt.f32.partialorder %v7036_v62, 0.0 }
 0xa28   :  { %v7042_v31 = vmul.f32 1.442695, %v7040_v61  ;;  %v7041_v44 = vmin.f32 %v7037_v57, 0.0  ;;  %vm7039_vm3 = vcmp.gt.f32.partialorder %v7037_v57, 0.0 }
 0xa2a   :  { %10536 = vpow2.f32 %v7042_v31  ;;  %v7044_v32 = vmul.f32 1.442695, %v7041_v44 }
 0xa2c   :  { %10538 = vpow2.f32 %v7044_v32 }
 0xa37   :  { %v10537_v22 = vpop.eup %10536 }
 0xa38   :  { %v8295_v27 = vadd.f32 -1.0, %v10537_v22 }
 0xa39   :  { %v10539_v23 = vpop.eup %10538 }
 0xa3a   :  { %v8296_v47 = vadd.f32 -1.0, %v10539_v23  ;;  %v7048_v24 = vsel %vm7038_vm2, %v7036_v62, %v8295_v27 }
 0xa3b   :  { %v7050_v18 = vpack.c.bf16 %v7048_v24, %v7048_v24 }
 0xa3c   :  { %v7049_v56 = vsel %vm7039_vm3, %v7037_v57, %v8296_v47 }
 0xa3d   :  { %v7051_v59 = vpack.c.bf16 %v7049_v56, %v7049_v56 }
 0xa3f   :  { %7421 = vmatprep.mubr.bf16.mxu1 %v7051_v59  ;;  %7462 = vmatprep.mubr.bf16.mxu0 %v7051_v59 }
 0xa40   :  { %7422 = vmatmul.mubr.bf16.vlgmr.msra.gmra.mxu1 %v7050_v18  ;;  %7463 = vmatmul.mubr.bf16.vlgmr.msra.gmra.mxu0 %v7050_v18 }
 0xa41   :  { %10551 = shalt.err (!%p10548_p4)
}
 0xa42   :  { %7510 = dma.vmem_to_hbm [thread:$0]  %s7508_s22, 32, %s12710_s26, [#allocation7]  }
 0xa43   :  { %s10560_s0 = scalar_lea.vmem %s7498_s9, 96  ;;  %p10565_p6 = scmp.lt.s32.totalorder %s7498_s9, %s7498_s9 }
 0xa44   :  { %p10561_p5 = scmp.ne.s32.totalorder %s7498_s9, %s10560_s0  ;;  %p10566_p7 = scmp.lt.s32.totalorder %s10560_s0, %s10560_s0 }
 0xa46   :  { %p10567_p8 = por %p10566_p7, %p10565_p6 }
 0xa48   :  { %p10568_p9 = pnand %p10567_p8, %p10561_p5 }
 0xa4a   :  { %10571 = shalt.err (!%p10568_p9)
}
 0xa4b   :  { %7500 = dma.vmem_to_hbm [thread:$0]  %s7498_s9, 96, %s12709_s25, [#allocation5]   ;;  %v7116_v49 = vld [vmem:[%s12708_s24] sm:$0x7] }
 0xa4c   :  { %v7121_v21 = vrot.slane %v7116_v49, %v12149_v41  ;;  %v7125_v29 = vrot.slane %v7116_v49, %v12158_v40  ;;  %v7129_v38 = vrot.slane %v7116_v49, %v5323_v7  ;;  %s10610_s24 = smov [#allocation8]  }
 0xa4d   :  { %s7517_s25 = sshll.u32 %s10610_s24, 4  ;;  %s7518_s25 = int_to_ptr.vmem [resolvable:$true] %s7517_s25 }
 0xa4e   :  { %s10580_s26 = scalar_lea.vmem %s7518_s25, 96  ;;  %p10585_p11 = scmp.lt.s32.totalorder %s7518_s25, %s7518_s25 }
 0xa4f   :  { %p10581_p10 = scmp.ne.s32.totalorder %s7518_s25, %s10580_s26  ;;  %p10586_p12 = scmp.lt.s32.totalorder %s10580_s26, %s10580_s26 }
 0xa51   :  { %p10587_p13 = por %p10586_p12, %p10585_p11 }
 0xa53   :  { %p10588_p0 = pnand %p10587_p13, %p10581_p10 }
 0xb00   :  { %v7423_v30 = vpop.f32.mrf.mxu1  ;;  %v9398_v26 = vpop.f32.mrf.mxu0 }
 0xb01   :  { %v7424_v37 = vadd.f32 %v7423_v30, %v7121_v21 }
 0xb02   :  { %v7425_v34 = vpop.f32.mrf.mxu1  ;;  %v9399_v35 = vpop.f32.mrf.mxu0 }
 0xb03   :  { %v7426_v42 = vadd.f32 %v7425_v34, %v7125_v29  ;;  %v9400_v19 = vadd.f32 %v9399_v35, %v9398_v26 }
 0xb04   :  { %v7427_v13 = vpop.f32.mrf.mxu1  ;;  %v9401_v9 = vpop.f32.mrf.mxu0 }
 0xb05   :  { %v7473_v25 = vcombine.low %v7424_v37, %v7426_v42  ;;  %v7465_v45 = vadd.f32 %v9400_v19, %v7129_v38 }
 0xb06   :  { %v7428_v48 = vpop.f32.mrf.mxu1  ;;  %v9402_v51 = vpop.f32.mrf.mxu0 }
 0xb07   :  { %v7480_v41 = vrot.slane %v7473_v25, %v12170_v6  ;;  %v7487_v40 = vrot.slane %v7465_v45, %v12170_v6 }
 0xb09   :  { %v7488_v53 = vcombine.low %v7480_v41, %v7487_v40 }
 0xb0b   :  { %7490 = vst.msk [vmem:[#allocation8] sm:$0x3f] %vm12200_vm13, %v7488_v53 }
 0xb0c   :  { %10591 = shalt.err (!%p10588_p0)
}
 0xb0d   :  { %7520 = dma.vmem_to_hbm [thread:$0]  %s7518_s25, 96, %s12711_s27, [#allocation7]  }
 0xb0e   :  { %10600 = dma.done.wait [#allocation5], 96  }
 0xb0f   :  { %10601 = vsyncadd [#allocation5], 4294967200 }
 0xb10   :  { %10602 = dma.done.wait [#allocation7], 128  }
 0xb11   :  { %10603 = vsyncadd [#allocation7], 4294967168 }
 0xb12   :  { %7530 = vsyncpa [#allocation5], 1 }
 0xb13   :  { %7531 = vsyncpa [#allocation7], 1 }

</bundles_post_ra>
